<compile_context>
chip_gen: v7x
topology: tpu7x:2x2x1
jax: 0.10.0
libtpu: 0.0.40
codegen_flags: <defaults>
</compile_context>

<pallas_src>
import jax
import jax.numpy as jnp
from jax.experimental import pallas as pl
from jax.experimental.pallas import tpu as pltpu

KERNEL_SIZE = 3
BN_EPS = 1e-5


def _pick_vmem_limit_bytes():
    """Generation-aware VMEM budget: ~3/4 of per-core capacity, capped, safe fallback."""
    try:
        cap = int(pltpu.get_tpu_info().vmem_capacity_bytes)
    except Exception:
        cap = 64 * 1024 * 1024          # conservative: v7x per-TC capacity
    return min((cap * 3) // 4, 96 * 1024 * 1024)


_VMEM_LIMIT_BYTES = _pick_vmem_limit_bytes()


# ------------------------------ fused Pallas kernel ------------------------------


def _make_up_conv_kernel(deep_k: bool):
    """deep_k=True: single (H*W, 9*Cin)@(9*Cin, 4*Cout) matmul (requires Cin % 128 == 0 for a
    shuffle-free lane concat).  deep_k=False: 9 accumulated K=Cin matmuls (small Cin)."""

    def kernel(x_ref, wp_ref, gamma_ref, beta_ref, out_ref,
               pad_scr, y_scr, sum_scr, sq_scr, scale_scr, shift_scr):
        phase = pl.program_id(0)
        bidx = pl.program_id(1)
        n_batch = pl.num_programs(1)

        H = out_ref.shape[1]
        W = out_ref.shape[2]
        c4 = out_ref.shape[3]            # 4 * Cout, packed sub-pixel channels (a, b, cout)
        cout = c4 // 4
        cin = x_ref.shape[3]

        @pl.when(jnp.logical_and(phase == 0, bidx == 0))
        def _init():
            sum_scr[...] = jnp.zeros_like(sum_scr)
            sq_scr[...] = jnp.zeros_like(sq_scr)
            # Zero once: the border stays zero across the batch loop (only the interior is
            # rewritten per image), so this is the in-kernel 1-pixel zero pad.
            pad_scr[...] = jnp.zeros_like(pad_scr)

        @pl.when(phase == 0)
        def _conv_and_stats():
            # In-kernel padding: copy the unpadded image into the interior of the scratch.
            pad_scr[1:H + 1, 1:W + 1, :] = x_ref[0]
            xp = pad_scr[...]                                   # (H+2, W+2, Cin) bf16

            if deep_k:
                taps = [xp[p:p + H, q:q + W, :]
                        for p in range(KERNEL_SIZE) for q in range(KERNEL_SIZE)]
                patches = jnp.concatenate(taps, axis=-1).reshape(H * W, 9 * cin)
                acc = jnp.dot(patches, wp_ref[...],
                              preferred_element_type=jnp.float32)   # (H*W, 4*Cout) f32
            else:
                acc = jnp.zeros((H * W, c4), jnp.float32)
                t = 0
                for p in range(KERNEL_SIZE):
                    for q in range(KERNEL_SIZE):
                        tap = xp[p:p + H, q:q + W, :].reshape(H * W, cin)
                        acc = acc + jnp.dot(tap, wp_ref[t],
                                            preferred_element_type=jnp.float32)
                        t += 1

            # Stats from the f32 accumulator; staged activation stored in bf16 (halves VMEM).
            sum_scr[...] += jnp.sum(acc, axis=0, keepdims=True)
            sq_scr[...] += jnp.sum(acc * acc, axis=0, keepdims=True)
            y_scr[bidx] = acc.reshape(H, W, c4).astype(jnp.bfloat16)

        @pl.when(jnp.logical_and(phase == 1, bidx == 0))
        def _fold_bn_stats():
            count = jnp.asarray(n_batch * 4 * H * W, dtype=jnp.float32)
            s = sum_scr[...]
            q = sq_scr[...]
            # Fold the 4 sub-pixel slots into true per-channel stats over (N, 2H, 2W).
            s_c = (s[:, 0:cout] + s[:, cout:2 * cout]
                   + s[:, 2 * cout:3 * cout] + s[:, 3 * cout:4 * cout])
            q_c = (q[:, 0:cout] + q[:, cout:2 * cout]
                   + q[:, 2 * cout:3 * cout] + q[:, 3 * cout:4 * cout])
            mean = s_c / count
            # Clamp: E[x^2] - mean^2 can go slightly negative from f.p. cancellation.
            var = jnp.maximum(q_c / count - mean * mean, 0.0)   # biased variance (training BN)
            inv = gamma_ref[...] * jax.lax.rsqrt(var + BN_EPS)
            shift = beta_ref[...] - mean * inv
            scale_scr[...] = jnp.concatenate([inv] * 4, axis=-1)    # tile to packed layout
            shift_scr[...] = jnp.concatenate([shift] * 4, axis=-1)

        @pl.when(phase == 1)
        def _bn_relu():
            z = y_scr[bidx].astype(jnp.float32) * scale_scr[...] + shift_scr[...]
            out_ref[...] = jnp.maximum(z, 0.0).reshape(1, H, W, c4)

    return kernel


# --------------------------------- JAX wrapper -----------------------------------


@jax.jit
def up_conv_forward(x_nchw, w_hwio, bias, gamma, beta):
    """up_conv forward.  x_nchw: (N, Cin, H, W) f32 -> (N, Cout, 2H, 2W) f32."""
    n, cin, h, w = x_nchw.shape
    cout = w_hwio.shape[-1]
    c4 = 4 * cout
    h2, w2 = 2 * h, 2 * w

    # NCHW -> NHWC at the ORIGINAL resolution, cast to bf16 here (halves input HBM traffic;
    # MXU operand precision is bf16 anyway).  The zero pad happens inside the kernel.
    x_nhwc = jnp.transpose(x_nchw, (0, 2, 3, 1)).astype(jnp.bfloat16)

    # Collapse (nearest-2x upsample o 3x3 conv) into 4 sub-pixel kernels on the 3x3 tap grid.
    # collapse[a, p, ky] = 1 iff conv row ky contributes to x-row tap p for output sub-row a.
    collapse = jnp.array([[[1, 0, 0], [0, 1, 1], [0, 0, 0]],
                          [[0, 0, 0], [1, 1, 0], [0, 0, 1]]], dtype=jnp.float32)
    w_eff = jnp.einsum("apy,bqx,yxio->pqiabo", collapse, collapse,
                       w_hwio.astype(jnp.float32))              # (3,3,Cin,2,2,Cout)

    deep_k = (cin % 128 == 0)   # lane-aligned concat only when Cin is a multiple of 128
    if deep_k:
        w_packed = w_eff.reshape(9 * cin, c4).astype(jnp.bfloat16)
        w_spec = pl.BlockSpec((9 * cin, c4), lambda s, b: (0, 0))
    else:
        w_packed = w_eff.reshape(9, cin, c4).astype(jnp.bfloat16)
        w_spec = pl.BlockSpec((9, cin, c4), lambda s, b: (0, 0, 0))

    # Conv bias is redundant under training-mode BatchNorm (the batch mean cancels it exactly).
    del bias

    gamma2d = gamma.reshape(1, cout).astype(jnp.float32)
    beta2d = beta.reshape(1, cout).astype(jnp.float32)

    y_packed = pl.pallas_call(
        _make_up_conv_kernel(deep_k),
        out_shape=jax.ShapeDtypeStruct((n, h, w, c4), jnp.float32),
        grid=(2, n),                                            # (phase, batch), sequential
        in_specs=[
            # Phase 1 never reads x: pin its block index to 0 so the whole input is not
            # re-DMA'd during the writeback-bound phase (only one spurious block-0 fetch).
            pl.BlockSpec((1, h, w, cin), lambda s, b: ((1 - s) * b, 0, 0, 0)),
            w_spec,
            pl.BlockSpec((1, cout), lambda s, b: (0, 0)),
            pl.BlockSpec((1, cout), lambda s, b: (0, 0)),
        ],
        # Output residency: during phase 0 (s=0) the block index stays 0 and out_ref is never
        # written, so no (stale) writeback happens; the first index change occurs only AFTER
        # phase-1 b=0 has fully rewritten block 0, so every flushed block carries valid data.
        out_specs=pl.BlockSpec((1, h, w, c4), lambda s, b: (b * s, 0, 0, 0)),
        scratch_shapes=[
            pltpu.VMEM((h + 2, w + 2, cin), jnp.bfloat16),      # in-kernel padded image
            pltpu.VMEM((n, h, w, c4), jnp.bfloat16),            # staged conv output (on-chip)
            pltpu.VMEM((1, c4), jnp.float32),                   # per packed-channel sum
            pltpu.VMEM((1, c4), jnp.float32),                   # per packed-channel sum of sq
            pltpu.VMEM((1, c4), jnp.float32),                   # folded BN scale (packed)
            pltpu.VMEM((1, c4), jnp.float32),                   # folded BN shift (packed)
        ],
        compiler_params=pltpu.CompilerParams(
            dimension_semantics=("arbitrary", "arbitrary"),
            vmem_limit_bytes=_VMEM_LIMIT_BYTES,
        ),
    )(x_nhwc, w_packed, gamma2d, beta2d)

    # Sub-pixel unshuffle + NCHW permute: (N, H, W, (a, b, Cout)) -> (N, Cout, 2H, 2W).
    # The only XLA pass over the output (NCHW interface cost); keep the packed NHWC layout
    # downstream to avoid it entirely.
    out = y_packed.reshape(n, h, w, 2, 2, cout)
    out = jnp.transpose(out, (0, 5, 1, 3, 2, 4)).reshape(n, cout, h2, w2)
    return out


# ------------------------------- pure-JAX reference -------------------------------


def up_conv_reference(x_nchw, w_hwio, bias, gamma, beta):
    x_nhwc = jnp.transpose(x_nchw, (0, 2, 3, 1)).astype(jnp.float32)
    x_up = jnp.repeat(jnp.repeat(x_nhwc, 2, axis=1), 2, axis=2)
    y = jax.lax.conv_general_dilated(
        x_up, w_hwio.astype(jnp.float32), window_strides=(1, 1), padding="SAME",
        dimension_numbers=("NHWC", "HWIO", "NHWC")) + bias
    mean = jnp.mean(y, axis=(0, 1, 2))
    var = jnp.mean(jnp.square(y - mean), axis=(0, 1, 2))
    yn = (y - mean) / jnp.sqrt(var + BN_EPS) * gamma + beta
    return jnp.transpose(jnp.maximum(yn, 0.0), (0, 3, 1, 2))


# -------------------------------------- main ---------------------------------------


if __name__ == "__main__":
    # OUT_CH=32 so the packed output width 4*Cout = 128 (lane-dense, unmasked stores).
    N, IN_CH, OUT_CH, H, W = 2, 4, 32, 16, 16

    key = jax.random.PRNGKey(0)
    kx, kw, kb, kg, kbt = jax.random.split(key, 5)

    x = jax.random.normal(kx, (N, IN_CH, H, W), dtype=jnp.float32)
    # Conv2d weight built directly in HWIO (PyTorch stores OIHW; layout permute only).
    w = jax.random.normal(kw, (KERNEL_SIZE, KERNEL_SIZE, IN_CH, OUT_CH),
                          dtype=jnp.float32) * 0.1
    b = jax.random.normal(kb, (OUT_CH,), dtype=jnp.float32) * 0.1
    gamma = 1.0 + 0.1 * jax.random.normal(kg, (OUT_CH,), dtype=jnp.float32)
    beta = 0.1 * jax.random.normal(kbt, (OUT_CH,), dtype=jnp.float32)

    out = jax.block_until_ready(up_conv_forward(x, w, b, gamma, beta))
    ref = jax.block_until_ready(up_conv_reference(x, w, b, gamma, beta))

    assert out.shape == (N, OUT_CH, 2 * H, 2 * W), out.shape
    # bf16 MXU operands + bf16 on-chip staging vs an f32 reference; outputs are BN-normalized
    # (O(1) scale), so atol=3e-2 with rtol=2e-2 is a meaningful correctness bound.
    diff = jnp.abs(out - ref)
    tol = 3e-2 + 2e-2 * jnp.abs(ref)
    excess = float(jnp.max(diff - tol))
    assert excess <= 0.0, f"max excess over tolerance: {excess}"
    print("KERNEL_OK")
</pallas_src>

<mosaic_0001>
module attributes {stable_mosaic.version = 11 : i64} {
  func.func @kernel(%arg0: i32, %arg1: i32, %arg2: memref<1x16x16x4xbf16, #tpu.memory_space<vmem>>, %arg3: memref<9x4x128xbf16, #tpu.memory_space<vmem>>, %arg4: memref<1x32xf32, #tpu.memory_space<vmem>>, %arg5: memref<1x32xf32, #tpu.memory_space<vmem>>, %arg6: memref<1x16x16x128xf32, #tpu.memory_space<vmem>>, %arg7: memref<18x18x4xbf16, #tpu.memory_space<vmem>>, %arg8: memref<2x16x16x128xbf16, #tpu.memory_space<vmem>>, %arg9: memref<1x128xf32, #tpu.memory_space<vmem>>, %arg10: memref<1x128xf32, #tpu.memory_space<vmem>>, %arg11: memref<1x128xf32, #tpu.memory_space<vmem>>, %arg12: memref<1x128xf32, #tpu.memory_space<vmem>>) attributes {dimension_semantics = [#tpu.dimension_semantics<arbitrary>, #tpu.dimension_semantics<arbitrary>], iteration_bounds = array<i64: 2, 2>, scalar_prefetch = 0 : i64, scratch_operands = 6 : i64, tpu.core_type = #tpu.core_type<tc>, window_params = [{transform_indices = @transform_0, window_bounds = array<i64: 1, 16, 16, 4>}, {pipeline_mode = #tpu.pipeline_mode<synchronous>, transform_indices = @transform_1, window_bounds = array<i64: 9, 4, 128>}, {pipeline_mode = #tpu.pipeline_mode<synchronous>, transform_indices = @transform_2, window_bounds = array<i64: 1, 32>}, {pipeline_mode = #tpu.pipeline_mode<synchronous>, transform_indices = @transform_3, window_bounds = array<i64: 1, 32>}, {transform_indices = @transform_4, window_bounds = array<i64: 1, 16, 16, 128>}]} {
    %c0_i32 = arith.constant 0 : i32
    %0 = arith.cmpi eq, %arg0, %c0_i32 : i32
    %c0_i32_0 = arith.constant 0 : i32
    %1 = arith.cmpi eq, %arg1, %c0_i32_0 : i32
    %2 = arith.andi %0, %1 : i1
    %3 = arith.extui %2 : i1 to i32
    %c0_i32_1 = arith.constant 0 : i32
    %4 = arith.cmpi ne, %3, %c0_i32_1 : i32
    scf.if %4 {
      %cst = arith.constant 0.000000e+00 : f32
      %16 = vector.broadcast %cst : f32 to vector<1x128xf32>
      %c0 = arith.constant 0 : index
      %c0_8 = arith.constant 0 : index
      %17 = vector.load %arg9[%c0, %c0_8] : memref<1x128xf32, #tpu.memory_space<vmem>>, vector<1x128xf32>
      tpu.vector_store %arg9[%c0, %c0_8], %16 {strides = array<i32>} : memref<1x128xf32, #tpu.memory_space<vmem>>, vector<1x128xf32>,
      %cst_9 = arith.constant 0.000000e+00 : f32
      %18 = vector.broadcast %cst_9 : f32 to vector<1x128xf32>
      %c0_10 = arith.constant 0 : index
      %c0_11 = arith.constant 0 : index
      %19 = vector.load %arg10[%c0_10, %c0_11] : memref<1x128xf32, #tpu.memory_space<vmem>>, vector<1x128xf32>
      tpu.vector_store %arg10[%c0_10, %c0_11], %18 {strides = array<i32>} : memref<1x128xf32, #tpu.memory_space<vmem>>, vector<1x128xf32>,
      %cst_12 = arith.constant 0.000000e+00 : bf16
      %20 = vector.broadcast %cst_12 : bf16 to vector<18x18x4xbf16>
      %c0_13 = arith.constant 0 : index
      %c0_14 = arith.constant 0 : index
      %c0_15 = arith.constant 0 : index
      %21 = vector.load %arg7[%c0_13, %c0_14, %c0_15] : memref<18x18x4xbf16, #tpu.memory_space<vmem>>, vector<18x18x4xbf16>
      tpu.vector_store %arg7[%c0_13, %c0_14, %c0_15], %20 {strides = array<i32>} : memref<18x18x4xbf16, #tpu.memory_space<vmem>>, vector<18x18x4xbf16>,
    } else {
    }
    %c0_i32_2 = arith.constant 0 : i32
    %5 = arith.cmpi eq, %arg0, %c0_i32_2 : i32
    %6 = arith.extui %5 : i1 to i32
    %c0_i32_3 = arith.constant 0 : i32
    %7 = arith.cmpi ne, %6, %c0_i32_3 : i32
    scf.if %7 {
      %c0 = arith.constant 0 : index
      %c0_8 = arith.constant 0 : index
      %c0_9 = arith.constant 0 : index
      %c0_10 = arith.constant 0 : index
      %16 = vector.load %arg2[%c0, %c0_8, %c0_9, %c0_10] : memref<1x16x16x4xbf16, #tpu.memory_space<vmem>>, vector<1x16x16x4xbf16>
      %17 = vector.shape_cast %16 : vector<1x16x16x4xbf16> to vector<16x16x4xbf16>
      %c1 = arith.constant 1 : index
      %c1_11 = arith.constant 1 : index
      %c0_12 = arith.constant 0 : index
      %18 = vector.load %arg7[%c1, %c1_11, %c0_12] : memref<18x18x4xbf16, #tpu.memory_space<vmem>>, vector<16x16x4xbf16>
      tpu.vector_store %arg7[%c1, %c1_11, %c0_12], %17 {strides = array<i32>} : memref<18x18x4xbf16, #tpu.memory_space<vmem>>, vector<16x16x4xbf16>,
      %c0_13 = arith.constant 0 : index
      %c0_14 = arith.constant 0 : index
      %c0_15 = arith.constant 0 : index
      %19 = vector.load %arg7[%c0_13, %c0_14, %c0_15] : memref<18x18x4xbf16, #tpu.memory_space<vmem>>, vector<18x18x4xbf16>
      %cst = arith.constant 0.000000e+00 : f32
      %20 = vector.broadcast %cst : f32 to vector<256x128xf32>
      %21 = vector.extract_strided_slice %19 {offsets = [0, 0, 0], sizes = [16, 16, 4], strides = [1, 1, 1]} : vector<18x18x4xbf16> to vector<16x16x4xbf16>
      %22 = vector.shape_cast %21 : vector<16x16x4xbf16> to vector<256x4xbf16>
      %c0_16 = arith.constant 0 : index
      %c0_17 = arith.constant 0 : index
      %c0_18 = arith.constant 0 : index
      %23 = vector.load %arg3[%c0_16, %c0_17, %c0_18] : memref<9x4x128xbf16, #tpu.memory_space<vmem>>, vector<1x4x128xbf16>
      %24 = vector.shape_cast %23 : vector<1x4x128xbf16> to vector<4x128xbf16>
      %cst_19 = arith.constant dense<0.000000e+00> : vector<256x128xf32>
      %25 = tpu.matmul %22, %24, %cst_19 {dimension_numbers = #tpu.dot_dimension_numbers<[1], [0], [0], [1], [0, 0, 1, 1], [], []>} : vector<256x4xbf16>, vector<4x128xbf16>, vector<256x128xf32> -> vector<256x128xf32>
      %26 = arith.addf %20, %25 : vector<256x128xf32>
      %27 = vector.extract_strided_slice %19 {offsets = [0, 1, 0], sizes = [16, 16, 4], strides = [1, 1, 1]} : vector<18x18x4xbf16> to vector<16x16x4xbf16>
      %28 = vector.shape_cast %27 : vector<16x16x4xbf16> to vector<256x4xbf16>
      %c1_20 = arith.constant 1 : index
      %c0_21 = arith.constant 0 : index
      %c0_22 = arith.constant 0 : index
      %29 = vector.load %arg3[%c1_20, %c0_21, %c0_22] : memref<9x4x128xbf16, #tpu.memory_space<vmem>>, vector<1x4x128xbf16>
      %30 = vector.shape_cast %29 : vector<1x4x128xbf16> to vector<4x128xbf16>
      %cst_23 = arith.constant dense<0.000000e+00> : vector<256x128xf32>
      %31 = tpu.matmul %28, %30, %cst_23 {dimension_numbers = #tpu.dot_dimension_numbers<[1], [0], [0], [1], [0, 0, 1, 1], [], []>} : vector<256x4xbf16>, vector<4x128xbf16>, vector<256x128xf32> -> vector<256x128xf32>
      %32 = arith.addf %26, %31 : vector<256x128xf32>
      %33 = vector.extract_strided_slice %19 {offsets = [0, 2, 0], sizes = [16, 16, 4], strides = [1, 1, 1]} : vector<18x18x4xbf16> to vector<16x16x4xbf16>
      %34 = vector.shape_cast %33 : vector<16x16x4xbf16> to vector<256x4xbf16>
      %c2 = arith.constant 2 : index
      %c0_24 = arith.constant 0 : index
      %c0_25 = arith.constant 0 : index
      %35 = vector.load %arg3[%c2, %c0_24, %c0_25] : memref<9x4x128xbf16, #tpu.memory_space<vmem>>, vector<1x4x128xbf16>
      %36 = vector.shape_cast %35 : vector<1x4x128xbf16> to vector<4x128xbf16>
      %cst_26 = arith.constant dense<0.000000e+00> : vector<256x128xf32>
      %37 = tpu.matmul %34, %36, %cst_26 {dimension_numbers = #tpu.dot_dimension_numbers<[1], [0], [0], [1], [0, 0, 1, 1], [], []>} : vector<256x4xbf16>, vector<4x128xbf16>, vector<256x128xf32> -> vector<256x128xf32>
      %38 = arith.addf %32, %37 : vector<256x128xf32>
      %39 = vector.extract_strided_slice %19 {offsets = [1, 0, 0], sizes = [16, 16, 4], strides = [1, 1, 1]} : vector<18x18x4xbf16> to vector<16x16x4xbf16>
      %40 = vector.shape_cast %39 : vector<16x16x4xbf16> to vector<256x4xbf16>
      %c3 = arith.constant 3 : index
      %c0_27 = arith.constant 0 : index
      %c0_28 = arith.constant 0 : index
      %41 = vector.load %arg3[%c3, %c0_27, %c0_28] : memref<9x4x128xbf16, #tpu.memory_space<vmem>>, vector<1x4x128xbf16>
      %42 = vector.shape_cast %41 : vector<1x4x128xbf16> to vector<4x128xbf16>
      %cst_29 = arith.constant dense<0.000000e+00> : vector<256x128xf32>
      %43 = tpu.matmul %40, %42, %cst_29 {dimension_numbers = #tpu.dot_dimension_numbers<[1], [0], [0], [1], [0, 0, 1, 1], [], []>} : vector<256x4xbf16>, vector<4x128xbf16>, vector<256x128xf32> -> vector<256x128xf32>
      %44 = arith.addf %38, %43 : vector<256x128xf32>
      %45 = vector.extract_strided_slice %19 {offsets = [1, 1, 0], sizes = [16, 16, 4], strides = [1, 1, 1]} : vector<18x18x4xbf16> to vector<16x16x4xbf16>
      %46 = vector.shape_cast %45 : vector<16x16x4xbf16> to vector<256x4xbf16>
      %c4 = arith.constant 4 : index
      %c0_30 = arith.constant 0 : index
      %c0_31 = arith.constant 0 : index
      %47 = vector.load %arg3[%c4, %c0_30, %c0_31] : memref<9x4x128xbf16, #tpu.memory_space<vmem>>, vector<1x4x128xbf16>
      %48 = vector.shape_cast %47 : vector<1x4x128xbf16> to vector<4x128xbf16>
      %cst_32 = arith.constant dense<0.000000e+00> : vector<256x128xf32>
      %49 = tpu.matmul %46, %48, %cst_32 {dimension_numbers = #tpu.dot_dimension_numbers<[1], [0], [0], [1], [0, 0, 1, 1], [], []>} : vector<256x4xbf16>, vector<4x128xbf16>, vector<256x128xf32> -> vector<256x128xf32>
      %50 = arith.addf %44, %49 : vector<256x128xf32>
      %51 = vector.extract_strided_slice %19 {offsets = [1, 2, 0], sizes = [16, 16, 4], strides = [1, 1, 1]} : vector<18x18x4xbf16> to vector<16x16x4xbf16>
      %52 = vector.shape_cast %51 : vector<16x16x4xbf16> to vector<256x4xbf16>
      %c5 = arith.constant 5 : index
      %c0_33 = arith.constant 0 : index
      %c0_34 = arith.constant 0 : index
      %53 = vector.load %arg3[%c5, %c0_33, %c0_34] : memref<9x4x128xbf16, #tpu.memory_space<vmem>>, vector<1x4x128xbf16>
      %54 = vector.shape_cast %53 : vector<1x4x128xbf16> to vector<4x128xbf16>
      %cst_35 = arith.constant dense<0.000000e+00> : vector<256x128xf32>
      %55 = tpu.matmul %52, %54, %cst_35 {dimension_numbers = #tpu.dot_dimension_numbers<[1], [0], [0], [1], [0, 0, 1, 1], [], []>} : vector<256x4xbf16>, vector<4x128xbf16>, vector<256x128xf32> -> vector<256x128xf32>
      %56 = arith.addf %50, %55 : vector<256x128xf32>
      %57 = vector.extract_strided_slice %19 {offsets = [2, 0, 0], sizes = [16, 16, 4], strides = [1, 1, 1]} : vector<18x18x4xbf16> to vector<16x16x4xbf16>
      %58 = vector.shape_cast %57 : vector<16x16x4xbf16> to vector<256x4xbf16>
      %c6 = arith.constant 6 : index
      %c0_36 = arith.constant 0 : index
      %c0_37 = arith.constant 0 : index
      %59 = vector.load %arg3[%c6, %c0_36, %c0_37] : memref<9x4x128xbf16, #tpu.memory_space<vmem>>, vector<1x4x128xbf16>
      %60 = vector.shape_cast %59 : vector<1x4x128xbf16> to vector<4x128xbf16>
      %cst_38 = arith.constant dense<0.000000e+00> : vector<256x128xf32>
      %61 = tpu.matmul %58, %60, %cst_38 {dimension_numbers = #tpu.dot_dimension_numbers<[1], [0], [0], [1], [0, 0, 1, 1], [], []>} : vector<256x4xbf16>, vector<4x128xbf16>, vector<256x128xf32> -> vector<256x128xf32>
      %62 = arith.addf %56, %61 : vector<256x128xf32>
      %63 = vector.extract_strided_slice %19 {offsets = [2, 1, 0], sizes = [16, 16, 4], strides = [1, 1, 1]} : vector<18x18x4xbf16> to vector<16x16x4xbf16>
      %64 = vector.shape_cast %63 : vector<16x16x4xbf16> to vector<256x4xbf16>
      %c7 = arith.constant 7 : index
      %c0_39 = arith.constant 0 : index
      %c0_40 = arith.constant 0 : index
      %65 = vector.load %arg3[%c7, %c0_39, %c0_40] : memref<9x4x128xbf16, #tpu.memory_space<vmem>>, vector<1x4x128xbf16>
      %66 = vector.shape_cast %65 : vector<1x4x128xbf16> to vector<4x128xbf16>
      %cst_41 = arith.constant dense<0.000000e+00> : vector<256x128xf32>
      %67 = tpu.matmul %64, %66, %cst_41 {dimension_numbers = #tpu.dot_dimension_numbers<[1], [0], [0], [1], [0, 0, 1, 1], [], []>} : vector<256x4xbf16>, vector<4x128xbf16>, vector<256x128xf32> -> vector<256x128xf32>
      %68 = arith.addf %62, %67 : vector<256x128xf32>
      %69 = vector.extract_strided_slice %19 {offsets = [2, 2, 0], sizes = [16, 16, 4], strides = [1, 1, 1]} : vector<18x18x4xbf16> to vector<16x16x4xbf16>
      %70 = vector.shape_cast %69 : vector<16x16x4xbf16> to vector<256x4xbf16>
      %c8 = arith.constant 8 : index
      %c0_42 = arith.constant 0 : index
      %c0_43 = arith.constant 0 : index
      %71 = vector.load %arg3[%c8, %c0_42, %c0_43] : memref<9x4x128xbf16, #tpu.memory_space<vmem>>, vector<1x4x128xbf16>
      %72 = vector.shape_cast %71 : vector<1x4x128xbf16> to vector<4x128xbf16>
      %cst_44 = arith.constant dense<0.000000e+00> : vector<256x128xf32>
      %73 = tpu.matmul %70, %72, %cst_44 {dimension_numbers = #tpu.dot_dimension_numbers<[1], [0], [0], [1], [0, 0, 1, 1], [], []>} : vector<256x4xbf16>, vector<4x128xbf16>, vector<256x128xf32> -> vector<256x128xf32>
      %74 = arith.addf %68, %73 : vector<256x128xf32>
      %c0_45 = arith.constant 0 : index
      %c0_46 = arith.constant 0 : index
      %75 = vector.load %arg9[%c0_45, %c0_46] : memref<1x128xf32, #tpu.memory_space<vmem>>, vector<1x128xf32>
      %cst_47 = arith.constant dense<0.000000e+00> : vector<128xf32>
      %76 = vector.multi_reduction <add>, %74, %cst_47 [0] : vector<256x128xf32> to vector<128xf32>
      %77 = vector.shape_cast %76 : vector<128xf32> to vector<1x128xf32>
      %78 = arith.addf %75, %77 : vector<1x128xf32>
      %c0_48 = arith.constant 0 : index
      %c0_49 = arith.constant 0 : index
      %79 = vector.load %arg9[%c0_48, %c0_49] : memref<1x128xf32, #tpu.memory_space<vmem>>, vector<1x128xf32>
      tpu.vector_store %arg9[%c0_48, %c0_49], %78 {strides = array<i32>} : memref<1x128xf32, #tpu.memory_space<vmem>>, vector<1x128xf32>,
      %c0_50 = arith.constant 0 : index
      %c0_51 = arith.constant 0 : index
      %80 = vector.load %arg10[%c0_50, %c0_51] : memref<1x128xf32, #tpu.memory_space<vmem>>, vector<1x128xf32>
      %81 = arith.mulf %74, %74 : vector<256x128xf32>
      %cst_52 = arith.constant dense<0.000000e+00> : vector<128xf32>
      %82 = vector.multi_reduction <add>, %81, %cst_52 [0] : vector<256x128xf32> to vector<128xf32>
      %83 = vector.shape_cast %82 : vector<128xf32> to vector<1x128xf32>
      %84 = arith.addf %80, %83 : vector<1x128xf32>
      %c0_53 = arith.constant 0 : index
      %c0_54 = arith.constant 0 : index
      %85 = vector.load %arg10[%c0_53, %c0_54] : memref<1x128xf32, #tpu.memory_space<vmem>>, vector<1x128xf32>
      tpu.vector_store %arg10[%c0_53, %c0_54], %84 {strides = array<i32>} : memref<1x128xf32, #tpu.memory_space<vmem>>, vector<1x128xf32>,
      %86 = vector.shape_cast %74 : vector<256x128xf32> to vector<16x16x128xf32>
      %87 = arith.truncf %86 : vector<16x16x128xf32> to vector<16x16x128xbf16>
      %88 = arith.index_cast %arg1 : i32 to index
      %c0_55 = arith.constant 0 : index
      %c0_56 = arith.constant 0 : index
      %c0_57 = arith.constant 0 : index
      %89 = vector.load %arg8[%88, %c0_55, %c0_56, %c0_57] : memref<2x16x16x128xbf16, #tpu.memory_space<vmem>>, vector<1x16x16x128xbf16>
      %90 = vector.shape_cast %89 : vector<1x16x16x128xbf16> to vector<16x16x128xbf16>
      %91 = vector.shape_cast %87 : vector<16x16x128xbf16> to vector<1x16x16x128xbf16>
      tpu.vector_store %arg8[%88, %c0_55, %c0_56, %c0_57], %91 {strides = array<i32>} : memref<2x16x16x128xbf16, #tpu.memory_space<vmem>>, vector<1x16x16x128xbf16>,
    } else {
    }
    %c1_i32 = arith.constant 1 : i32
    %8 = arith.cmpi eq, %arg0, %c1_i32 : i32
    %c0_i32_4 = arith.constant 0 : i32
    %9 = arith.cmpi eq, %arg1, %c0_i32_4 : i32
    %10 = arith.andi %8, %9 : i1
    %11 = arith.extui %10 : i1 to i32
    %c0_i32_5 = arith.constant 0 : i32
    %12 = arith.cmpi ne, %11, %c0_i32_5 : i32
    scf.if %12 {
      %c0 = arith.constant 0 : index
      %c0_8 = arith.constant 0 : index
      %16 = vector.load %arg9[%c0, %c0_8] : memref<1x128xf32, #tpu.memory_space<vmem>>, vector<1x128xf32>
      %c0_9 = arith.constant 0 : index
      %c0_10 = arith.constant 0 : index
      %17 = vector.load %arg10[%c0_9, %c0_10] : memref<1x128xf32, #tpu.memory_space<vmem>>, vector<1x128xf32>
      %18 = vector.extract_strided_slice %16 {offsets = [0, 0], sizes = [1, 32], strides = [1, 1]} : vector<1x128xf32> to vector<1x32xf32>
      %19 = vector.extract_strided_slice %16 {offsets = [0, 32], sizes = [1, 32], strides = [1, 1]} : vector<1x128xf32> to vector<1x32xf32>
      %20 = arith.addf %18, %19 : vector<1x32xf32>
      %21 = vector.extract_strided_slice %16 {offsets = [0, 64], sizes = [1, 32], strides = [1, 1]} : vector<1x128xf32> to vector<1x32xf32>
      %22 = arith.addf %20, %21 : vector<1x32xf32>
      %23 = vector.extract_strided_slice %16 {offsets = [0, 96], sizes = [1, 32], strides = [1, 1]} : vector<1x128xf32> to vector<1x32xf32>
      %24 = arith.addf %22, %23 : vector<1x32xf32>
      %25 = vector.extract_strided_slice %17 {offsets = [0, 0], sizes = [1, 32], strides = [1, 1]} : vector<1x128xf32> to vector<1x32xf32>
      %26 = vector.extract_strided_slice %17 {offsets = [0, 32], sizes = [1, 32], strides = [1, 1]} : vector<1x128xf32> to vector<1x32xf32>
      %27 = arith.addf %25, %26 : vector<1x32xf32>
      %28 = vector.extract_strided_slice %17 {offsets = [0, 64], sizes = [1, 32], strides = [1, 1]} : vector<1x128xf32> to vector<1x32xf32>
      %29 = arith.addf %27, %28 : vector<1x32xf32>
      %30 = vector.extract_strided_slice %17 {offsets = [0, 96], sizes = [1, 32], strides = [1, 1]} : vector<1x128xf32> to vector<1x32xf32>
      %31 = arith.addf %29, %30 : vector<1x32xf32>
      %cst = arith.constant 2.048000e+03 : f32
      %32 = vector.broadcast %cst : f32 to vector<1x32xf32>
      %33 = arith.divf %24, %32 : vector<1x32xf32>
      %cst_11 = arith.constant 2.048000e+03 : f32
      %34 = vector.broadcast %cst_11 : f32 to vector<1x32xf32>
      %35 = arith.divf %31, %34 : vector<1x32xf32>
      %36 = arith.mulf %33, %33 : vector<1x32xf32>
      %37 = arith.subf %35, %36 : vector<1x32xf32>
      %cst_12 = arith.constant 0.000000e+00 : f32
      %38 = vector.broadcast %cst_12 : f32 to vector<1x32xf32>
      %39 = arith.maximumf %37, %38 : vector<1x32xf32>
      %c0_13 = arith.constant 0 : index
      %c0_14 = arith.constant 0 : index
      %40 = vector.load %arg4[%c0_13, %c0_14] : memref<1x32xf32, #tpu.memory_space<vmem>>, vector<1x32xf32>
      %cst_15 = arith.constant 9.99999974E-6 : f32
      %41 = vector.broadcast %cst_15 : f32 to vector<1x32xf32>
      %42 = arith.addf %39, %41 : vector<1x32xf32>
      %43 = math.rsqrt %42 : vector<1x32xf32>
      %44 = arith.mulf %40, %43 : vector<1x32xf32>
      %c0_16 = arith.constant 0 : index
      %c0_17 = arith.constant 0 : index
      %45 = vector.load %arg5[%c0_16, %c0_17] : memref<1x32xf32, #tpu.memory_space<vmem>>, vector<1x32xf32>
      %46 = arith.mulf %33, %44 : vector<1x32xf32>
      %47 = arith.subf %45, %46 : vector<1x32xf32>
      %48 = tpu.concatenate %44, %44, %44, %44 in 1 : vector<1x32xf32>, vector<1x32xf32>, vector<1x32xf32>, vector<1x32xf32> -> vector<1x128xf32>
      %c0_18 = arith.constant 0 : index
      %c0_19 = arith.constant 0 : index
      %49 = vector.load %arg11[%c0_18, %c0_19] : memref<1x128xf32, #tpu.memory_space<vmem>>, vector<1x128xf32>
      tpu.vector_store %arg11[%c0_18, %c0_19], %48 {strides = array<i32>} : memref<1x128xf32, #tpu.memory_space<vmem>>, vector<1x128xf32>,
      %50 = tpu.concatenate %47, %47, %47, %47 in 1 : vector<1x32xf32>, vector<1x32xf32>, vector<1x32xf32>, vector<1x32xf32> -> vector<1x128xf32>
      %c0_20 = arith.constant 0 : index
      %c0_21 = arith.constant 0 : index
      %51 = vector.load %arg12[%c0_20, %c0_21] : memref<1x128xf32, #tpu.memory_space<vmem>>, vector<1x128xf32>
      tpu.vector_store %arg12[%c0_20, %c0_21], %50 {strides = array<i32>} : memref<1x128xf32, #tpu.memory_space<vmem>>, vector<1x128xf32>,
    } else {
    }
    %c1_i32_6 = arith.constant 1 : i32
    %13 = arith.cmpi eq, %arg0, %c1_i32_6 : i32
    %14 = arith.extui %13 : i1 to i32
    %c0_i32_7 = arith.constant 0 : i32
    %15 = arith.cmpi ne, %14, %c0_i32_7 : i32
    scf.if %15 {
      %16 = arith.index_cast %arg1 : i32 to index
      %c0 = arith.constant 0 : index
      %c0_8 = arith.constant 0 : index
      %c0_9 = arith.constant 0 : index
      %17 = vector.load %arg8[%16, %c0, %c0_8, %c0_9] : memref<2x16x16x128xbf16, #tpu.memory_space<vmem>>, vector<1x16x16x128xbf16>
      %18 = vector.shape_cast %17 : vector<1x16x16x128xbf16> to vector<16x16x128xbf16>
      %19 = arith.extf %18 : vector<16x16x128xbf16> to vector<16x16x128xf32>
      %c0_10 = arith.constant 0 : index
      %c0_11 = arith.constant 0 : index
      %20 = vector.load %arg11[%c0_10, %c0_11] : memref<1x128xf32, #tpu.memory_space<vmem>>, vector<1x128xf32>
      %21 = vector.shape_cast %20 : vector<1x128xf32> to vector<1x1x128xf32>
      %22 = vector.broadcast %21 : vector<1x1x128xf32> to vector<16x16x128xf32>
      %23 = arith.mulf %19, %22 : vector<16x16x128xf32>
      %c0_12 = arith.constant 0 : index
      %c0_13 = arith.constant 0 : index
      %24 = vector.load %arg12[%c0_12, %c0_13] : memref<1x128xf32, #tpu.memory_space<vmem>>, vector<1x128xf32>
      %25 = vector.shape_cast %24 : vector<1x128xf32> to vector<1x1x128xf32>
      %26 = vector.broadcast %25 : vector<1x1x128xf32> to vector<16x16x128xf32>
      %27 = arith.addf %23, %26 : vector<16x16x128xf32>
      %cst = arith.constant 0.000000e+00 : f32
      %28 = vector.broadcast %cst : f32 to vector<16x16x128xf32>
      %29 = arith.maximumf %27, %28 : vector<16x16x128xf32>
      %30 = vector.shape_cast %29 : vector<16x16x128xf32> to vector<1x16x16x128xf32>
      %c0_14 = arith.constant 0 : index
      %c0_15 = arith.constant 0 : index
      %c0_16 = arith.constant 0 : index
      %c0_17 = arith.constant 0 : index
      %31 = vector.load %arg6[%c0_14, %c0_15, %c0_16, %c0_17] : memref<1x16x16x128xf32, #tpu.memory_space<vmem>>, vector<1x16x16x128xf32>
      tpu.vector_store %arg6[%c0_14, %c0_15, %c0_16, %c0_17], %30 {strides = array<i32>} : memref<1x16x16x128xf32, #tpu.memory_space<vmem>>, vector<1x16x16x128xf32>,
    } else {
    }
    return
  }
  func.func @transform_0(%arg0: i32, %arg1: i32) -> (i32, i32, i32, i32) {
    %c1_i32 = arith.constant 1 : i32
    %0 = arith.subi %c1_i32, %arg0 : i32
    %1 = arith.muli %0, %arg1 : i32
    %c0_i32 = arith.constant 0 : i32
    %c0_i32_0 = arith.constant 0 : i32
    %c0_i32_1 = arith.constant 0 : i32
    %c0_i32_2 = arith.constant 0 : i32
    return %1, %c0_i32, %c0_i32_0, %c0_i32_1 : i32, i32, i32, i32
  }
  func.func @transform_1(%arg0: i32, %arg1: i32) -> (i32, i32, i32) {
    %c0_i32 = arith.constant 0 : i32
    %c0_i32_0 = arith.constant 0 : i32
    %c0_i32_1 = arith.constant 0 : i32
    %c0_i32_2 = arith.constant 0 : i32
    return %c0_i32, %c0_i32_0, %c0_i32_1 : i32, i32, i32
  }
  func.func @transform_2(%arg0: i32, %arg1: i32) -> (i32, i32) {
    %c0_i32 = arith.constant 0 : i32
    %c0_i32_0 = arith.constant 0 : i32
    %c0_i32_1 = arith.constant 0 : i32
    return %c0_i32, %c0_i32_0 : i32, i32
  }
  func.func @transform_3(%arg0: i32, %arg1: i32) -> (i32, i32) {
    %c0_i32 = arith.constant 0 : i32
    %c0_i32_0 = arith.constant 0 : i32
    %c0_i32_1 = arith.constant 0 : i32
    return %c0_i32, %c0_i32_0 : i32, i32
  }
  func.func @transform_4(%arg0: i32, %arg1: i32) -> (i32, i32, i32, i32) {
    %0 = arith.muli %arg1, %arg0 : i32
    %c0_i32 = arith.constant 0 : i32
    %c0_i32_0 = arith.constant 0 : i32
    %c0_i32_1 = arith.constant 0 : i32
    %c0_i32_2 = arith.constant 0 : i32
    return %0, %c0_i32, %c0_i32_0, %c0_i32_1 : i32, i32, i32, i32
  }
}

</mosaic_0001>

<bundles_post_ra>
// kernel: up_conv_forward.1
= control target key start
LH: loop header
LB: loop body
LE: loop exit
PB: predicated region body
PF: predicated region fallthrough
CT: control target
= control target key end

     0   :  { %s5092_s15 = smov 0   ;;  %s5094_s16 = smov 0   ;;  %s6449_s0 = inlined_call_operand.vmem [shape: bf16[2,16,16,4], index: 0, kind: input, shape index: {}]   ;;  %s6450_s1 = inlined_call_operand.vmem [shape: bf16[9,4,128], index: 1, kind: input, shape index: {}]   ;;  %s6451_s2 = inlined_call_operand.vmem [shape: f32[1,32], index: 2, kind: input, shape index: {}]   ;;  %s6452_s3 = inlined_call_operand.vmem [shape: f32[1,32], index: 3, kind: input, shape index: {}]   ;;  %s6453_s4 = inlined_call_operand.vmem [shape: f32[2,16,16,128], index: 4, kind: output, shape index: {}]  }
   0x1   :  { %s5096_s17 = smov 0   ;;  %s5098_s18 = smov 0  }
   0x2   :  { %s5100_s19 = smov 0  }
   0x3 LB: > { %s23_s20 = sadd.s32 1, %s5052_s17  ;;  %s26_s21 = sadd.s32 1, %s5056_s18  ;;  %s5060_s19 = sphi %s5100_s19, %s14_s19   ;;  %s5056_s18 = sphi %s5098_s18, %s6512_s18   ;;  %s5052_s17 = sphi %s5096_s17, %s6511_s17   ;;  %s5048_s16 = sphi %s5094_s16, %s6510_s16   ;;  %s5044_s15 = sphi %s5092_s15, %s6509_s15  }
   0x4   : > { %p24_p0 = scmp.ge.s32.totalorder %s23_s20, 2  ;;  %p3992_p1 = scmp.ge.s32.totalorder %s5060_s19, 1 }
   0x5   : > { %p184_p2 = scmp.lt.s32.totalorder %s5060_s19, 5 }
   0x6   : > { %s6514_s20 = smov (%p24_p0, %s23_s20), 0  ;;  %s6516_s21 = smov (!%p24_p0, %s26_s21), %s5056_s18 }
   0x7   : > { %p185_p3 = pnand %p3992_p1, %p184_p2  ;;  %p28_p4 = scmp.ge.s32.totalorder %s6516_s21, 2 }
   0x8   : > { %s213_s22 = ssub.s32 (!%p185_p3), 1, %s5048_s16  ;;  %s222_s23 = smul.u32 (!%p185_p3), %s5044_s15, %s5048_s16 }
   0x9   : > { %s6518_s21 = smov (%p28_p4, %s6516_s21), 0  ;;  %188 = sbr.rel (%p185_p3) target bundleno = 996 (0x3e4), region = 36 }
   0xa   : > { %s214_s24 = smul.u32 (!%p185_p3), %s5044_s15, %s213_s22  ;;  %p230_p5 = scmp.eq.s32.totalorder (!%p185_p3), %s5048_s16, 0 }
   0xb   : > { %p223_p6 = scmp.lt.s32.totalorder (!%p185_p3), %s222_s23, 1  ;;  %p231_p7 = scmp.eq.s32.totalorder (!%p185_p3), %s5044_s15, 0 }
   0xc   : > { %p215_p8 = scmp.lt.s32.totalorder (!%p185_p3), %s214_s24, 1 }
   0xd   : > { %p232_p9 = pnand (!%p185_p3), %p231_p7, %p230_p5 }
  0x10   : > { %s6520_s23 = smov (!%p223_p6, %s222_s23), 1  ;;  %s6522_s24 = smov (!%p215_p8, %s214_s24), 1 }
  0x11   : > { %s4232_s25 = sshll.u32 %s6520_s23, 8  ;;  %s4231_s26 = sshll.u32 %s6522_s24, 7  ;;  %vm238_vm0 = vcmask (!%p232_p9), 27648   ;;  %vm241_vm1 = vcmask (!%p232_p9), 24576   ;;  %v5062_v0 = vmov (!%p232_p9), 0.0   ;;  %v5063_v1 = vmov (!%p232_p9), 0  }
  0x12   : > { %s5137_s29 = scalar_lea.vmem %s6453_s4, %s4232_s25  ;;  %s5142_s6 = scalar_lea.vmem %s6449_s0, %s4231_s26  ;;  %236 = vst [vmem:[#allocation4] sm:$0x1] (!%p232_p9), %v5062_v0  ;;  %237 = vst [vmem:[#allocation5] sm:$0x1] (!%p232_p9), %v5062_v0 }
  0x13   : > { %235 = sbr.rel (%p232_p9) target bundleno = 46 (0x2e), region = 40  ;;  %239 = vst.msk [vmem:[#allocation2] sm:$0xf] (!%p232_p9), %vm238_vm0, %v5063_v1  ;;  %240 = vst.msk [vmem:[#allocation2 + $0x4] sm:$0xf] (!%p232_p9), %vm238_vm0, %v5063_v1 }
  0x14   : > { %243 = vst.msk [vmem:[#allocation2 + $0xc] sm:$0xf] (!%p232_p9), %vm238_vm0, %v5063_v1  ;;  %244 = vst.msk [vmem:[#allocation2 + $0x10] sm:$0xf] (!%p232_p9), %vm238_vm0, %v5063_v1 }
  0x15   : > { %246 = vst.msk [vmem:[#allocation2 + $0x18] sm:$0xf] (!%p232_p9), %vm238_vm0, %v5063_v1  ;;  %247 = vst.msk [vmem:[#allocation2 + $0x1c] sm:$0xf] (!%p232_p9), %vm238_vm0, %v5063_v1 }
  0x16   : > { %249 = vst.msk [vmem:[#allocation2 + $0x24] sm:$0xf] (!%p232_p9), %vm238_vm0, %v5063_v1  ;;  %250 = vst.msk [vmem:[#allocation2 + $0x28] sm:$0xf] (!%p232_p9), %vm238_vm0, %v5063_v1 }
  0x17   : > { %252 = vst.msk [vmem:[#allocation2 + $0x30] sm:$0xf] (!%p232_p9), %vm238_vm0, %v5063_v1  ;;  %253 = vst.msk [vmem:[#allocation2 + $0x34] sm:$0xf] (!%p232_p9), %vm238_vm0, %v5063_v1 }
  0x18   : > { %255 = vst.msk [vmem:[#allocation2 + $0x3c] sm:$0xf] (!%p232_p9), %vm238_vm0, %v5063_v1  ;;  %256 = vst.msk [vmem:[#allocation2 + $0x40] sm:$0xf] (!%p232_p9), %vm238_vm0, %v5063_v1 }
  0x19   : > { %258 = vst.msk [vmem:[#allocation2 + $0x48] sm:$0xf] (!%p232_p9), %vm238_vm0, %v5063_v1  ;;  %259 = vst.msk [vmem:[#allocation2 + $0x4c] sm:$0xf] (!%p232_p9), %vm238_vm0, %v5063_v1 }
  0x1a   : > { %261 = vst.msk [vmem:[#allocation2 + $0x54] sm:$0xf] %vm238_vm0, %v5063_v1  ;;  %262 = vst.msk [vmem:[#allocation2 + $0x58] sm:$0xf] %vm238_vm0, %v5063_v1 }
  0x1b   : > { %264 = vst.msk [vmem:[#allocation2 + $0x60] sm:$0xf] %vm238_vm0, %v5063_v1  ;;  %265 = vst.msk [vmem:[#allocation2 + $0x64] sm:$0xf] %vm238_vm0, %v5063_v1 }
  0x1c   : > { %267 = vst.msk [vmem:[#allocation2 + $0x6c] sm:$0xf] %vm238_vm0, %v5063_v1  ;;  %268 = vst.msk [vmem:[#allocation2 + $0x70] sm:$0xf] %vm238_vm0, %v5063_v1 }
  0x1d   : > { %270 = vst.msk [vmem:[#allocation2 + $0x78] sm:$0xf] %vm238_vm0, %v5063_v1  ;;  %271 = vst.msk [vmem:[#allocation2 + $0x7c] sm:$0xf] %vm238_vm0, %v5063_v1 }
  0x1e   : > { %273 = vst.msk [vmem:[#allocation2 + $0x84] sm:$0xf] %vm238_vm0, %v5063_v1  ;;  %274 = vst.msk [vmem:[#allocation2 + $0x88] sm:$0xf] %vm238_vm0, %v5063_v1 }
  0x1f   : > { %276 = vst.msk [vmem:[#allocation2 + $0x90] sm:$0xf] %vm238_vm0, %v5063_v1  ;;  %277 = vst.msk [vmem:[#allocation2 + $0x94] sm:$0xf] %vm238_vm0, %v5063_v1 }
  0x20   : > { %279 = vst.msk [vmem:[#allocation2 + $0x9c] sm:$0xf] %vm238_vm0, %v5063_v1  ;;  %280 = vst.msk [vmem:[#allocation2 + $0xa0] sm:$0xf] %vm238_vm0, %v5063_v1 }
  0x21   : > { %282 = vst.msk [vmem:[#allocation2 + $0xa8] sm:$0xf] %vm238_vm0, %v5063_v1  ;;  %283 = vst.msk [vmem:[#allocation2 + $0xac] sm:$0xf] %vm238_vm0, %v5063_v1 }
  0x22   : > { %285 = vst.msk [vmem:[#allocation2 + $0xb4] sm:$0xf] %vm238_vm0, %v5063_v1  ;;  %286 = vst.msk [vmem:[#allocation2 + $0xb8] sm:$0xf] %vm238_vm0, %v5063_v1 }
  0x23   : > { %288 = vst.msk [vmem:[#allocation2 + $0xc0] sm:$0xf] %vm238_vm0, %v5063_v1  ;;  %289 = vst.msk [vmem:[#allocation2 + $0xc4] sm:$0xf] %vm238_vm0, %v5063_v1 }
  0x24   : > { %291 = vst.msk [vmem:[#allocation2 + $0xcc] sm:$0xf] %vm238_vm0, %v5063_v1  ;;  %292 = vst.msk [vmem:[#allocation2 + $0xd0] sm:$0xf] %vm238_vm0, %v5063_v1 }
  0x25   : > { %242 = vst.msk [vmem:[#allocation2 + $0x8] sm:$0x1] %vm241_vm1, %v5063_v1  ;;  %245 = vst.msk [vmem:[#allocation2 + $0x14] sm:$0x1] %vm241_vm1, %v5063_v1 }
  0x26   : > { %248 = vst.msk [vmem:[#allocation2 + $0x20] sm:$0x1] %vm241_vm1, %v5063_v1  ;;  %251 = vst.msk [vmem:[#allocation2 + $0x2c] sm:$0x1] %vm241_vm1, %v5063_v1 }
  0x27   : > { %254 = vst.msk [vmem:[#allocation2 + $0x38] sm:$0x1] %vm241_vm1, %v5063_v1  ;;  %257 = vst.msk [vmem:[#allocation2 + $0x44] sm:$0x1] %vm241_vm1, %v5063_v1 }
  0x28   : > { %260 = vst.msk [vmem:[#allocation2 + $0x50] sm:$0x1] %vm241_vm1, %v5063_v1  ;;  %263 = vst.msk [vmem:[#allocation2 + $0x5c] sm:$0x1] %vm241_vm1, %v5063_v1 }
  0x29   : > { %266 = vst.msk [vmem:[#allocation2 + $0x68] sm:$0x1] %vm241_vm1, %v5063_v1  ;;  %269 = vst.msk [vmem:[#allocation2 + $0x74] sm:$0x1] %vm241_vm1, %v5063_v1 }
  0x2a   : > { %272 = vst.msk [vmem:[#allocation2 + $0x80] sm:$0x1] %vm241_vm1, %v5063_v1  ;;  %275 = vst.msk [vmem:[#allocation2 + $0x8c] sm:$0x1] %vm241_vm1, %v5063_v1 }
  0x2b   : > { %278 = vst.msk [vmem:[#allocation2 + $0x98] sm:$0x1] %vm241_vm1, %v5063_v1  ;;  %281 = vst.msk [vmem:[#allocation2 + $0xa4] sm:$0x1] %vm241_vm1, %v5063_v1 }
  0x2c   : > { %284 = vst.msk [vmem:[#allocation2 + $0xb0] sm:$0x1] %vm241_vm1, %v5063_v1  ;;  %287 = vst.msk [vmem:[#allocation2 + $0xbc] sm:$0x1] %vm241_vm1, %v5063_v1 }
  0x2d   : > { %290 = vst.msk [vmem:[#allocation2 + $0xc8] sm:$0x1] %vm241_vm1, %v5063_v1  ;;  %293 = vst.msk [vmem:[#allocation2 + $0xd4] sm:$0x1] %vm241_vm1, %v5063_v1 }
  0x2e PF: > { %p3997_p10 = scmp.ne.s32.totalorder %s5048_s16, 0 }
  0x30   : > { %296 = sbr.rel (%p3997_p10) target bundleno = 672 (0x2a0), region = 44 }
  0x37   : > { %v3998_v2 = vld [vmem:[%s6450_s1 + $0x2] sm:$0x3]  ;;  %vm1312_vm2 = vcmask 1041408   ;;  %v4130_v3 = vld [vmem:[%s6450_s1 + $0x8] sm:$0x3]  ;;  %vm1263_vm5 = vcmask 31744  }
  0x38   : > { %4952 = vmatprep.subr.msk.bf16.mxu1 %vm1312_vm2, %v3998_v2  ;;  %4956 = vmatprep.subr.msk.bf16.mxu0 %vm1312_vm2, %v4130_v3  ;;  %v1314_v4 = vsel %vm1312_vm2, %v3998_v2, 0  ;;  %v5209_v5 = vsel %vm1312_vm2, %v4130_v3, 0  ;;  %v771_v6 = vld [vmem:[#allocation2] sm:$0xf]  ;;  %v772_v7 = vld [vmem:[#allocation2 + $0x4] sm:$0xf] }
  0x39   : > { %6472 = vst [vmem:[#allocation8_spill] sm:$0xff] %v5209_v5  ;;  %4389 = vmatpush3.bf16.msra.mxu1 %v1314_v4  ;;  %4525 = vmatpush3.bf16.msra.mxu0 %v5209_v5  ;;  %v773_v8 = vld [vmem:[#allocation2 + $0x8] sm:$0x1]  ;;  %vm826_vm3 = vsmask.f32 3328  ;;  %v830_v9 = vshrl.u32 %v771_v6, 16 }
  0x3a   : > { %vm827_vm4 = vsmask.f32 7440  ;;  %v833_v10 = vshll.u32 %v771_v6, 16  ;;  %v839_v11 = vshll.u32 %v772_v7, 16  ;;  %v843_v12 = vshrl.u32 %v772_v7, 16  ;;  %s4233_s9 = sshll.u32 %s5044_s15, 7 }
  0x3b   : > { %v297_v13 = vld [vmem:[%s5142_s6] sm:$0xf]  ;;  %v849_v14 = vshll.u32 %v773_v8, 16  ;;  %v298_v15 = vld [vmem:[%s5142_s6 + $0x4] sm:$0xf]  ;;  %v832_v16 = vrot.slane %v830_v9, 4  ;;  %vm5216_vm8 = vmor %vm826_vm3, %vm827_vm4 }
  0x3c   : > { %vm329_vm6 = vsmask.f32 256  ;;  %v835_v17 = vrot.slane %v833_v10, 5  ;;  %v841_v18 = vrot.slane %v839_v11, 5  ;;  %v845_v19 = vrot.slane %v843_v12, 4  ;;  %s6271_s10 = scalar_lea.vmem [#allocation3], %s4233_s9 }
  0x3d   : > { %v851_v20 = vrot.slane %v849_v14, 5  ;;  %vm330_vm7 = vsmask.f32 4368  ;;  %v333_v21 = vshrl.u32 %v297_v13, 16  ;;  %v336_v22 = vshll.u32 %v297_v13, 16 }
  0x3e   : > { %v836_v24 = vor.u32 %v835_v17, %v832_v16  ;;  %v846_v25 = vor.u32 %v845_v19, %v841_v18  ;;  %v341_v26 = vshrl.u32 %v298_v15, 16  ;;  %v344_v27 = vshll.u32 %v298_v15, 16  ;;  %v656_v28 = vld [vmem:[#allocation2 + $0xc] sm:$0xf]  ;;  %v825_v29 = vld [vmem:[%s6450_s1] sm:$0x3]  ;;  %vm5224_vm9 = vmor %vm329_vm6, %vm330_vm7 }
  0x3f   : > { %v335_v31 = vrot.slane %v333_v21, 7  ;;  %vm653_vm10 = vcmask 27648   ;;  %vm654_vm11 = vsmask.f32 7938  ;;  %vm661_vm12 = vcmask 24576   ;;  %4953 = vmatprep.subr.msk.bf16.mxu1 %vm1312_vm2, %v825_v29 }
  0x40   : > { %v663_v32 = vld [vmem:[#allocation2 + $0x14] sm:$0x1]  ;;  %v837_v33 = vrot.slane %v836_v24, 4  ;;  %v847_v34 = vrot.slane %v846_v25, 4  ;;  %v343_v35 = vrot.slane %v341_v26, 7  ;;  %vm5230_vm13 = vmand %vm653_vm10, %vm654_vm11  ;;  %v5238_v38 = vsel %vm1312_vm2, %v825_v29, 0 }
  0x41   : > { %v4149_v37 = vld [vmem:[%s6450_s1 + $0xa] sm:$0x3]  ;;  %v338_v39 = vor.u32 %v336_v22, %v335_v31  ;;  %v339_v40 = vrot.slane %v335_v31, 4  ;;  %vm5241_vm14 = vmand %vm661_vm12, %vm329_vm6  ;;  %v300_v43 = vld [vmem:[%s5142_s6 + $0xc] sm:$0xf]  ;;  %vm1785_vm15 = vcmask 1042432  }
  0x42   : > { %4958 = vmatprep.subr.msk.bf16.mxu0 %vm1312_vm2, %v4149_v37  ;;  %v299_v42 = vld [vmem:[%s5142_s6 + $0x8] sm:$0xf]  ;;  %v5249_v44 = vsel %vm1312_vm2, %v4149_v37, 0  ;;  %v842_v45 = vsel %vm5216_vm8, %v837_v33, %v841_v18  ;;  %v852_v46 = vsel %vm5216_vm8, %v847_v34, %v851_v20  ;;  %v346_v47 = vor.u32 %v344_v27, %v343_v35  ;;  %v301_v53 = vld [vmem:[%s5142_s6 + $0x10] sm:$0xf] }
  0x43   : > { %v348_v48 = vrot.slane %v343_v35, 4  ;;  %v3999_v49 = vcombine.low %v842_v45, %v852_v46  ;;  %v657_v50 = vsel %vm5230_vm13, %v338_v39, %v656_v28  ;;  %v350_v51 = vshrl.u32 %v299_v42, 16  ;;  %v302_v54 = vld [vmem:[%s5142_s6 + $0x14] sm:$0xf]  ;;  %v666_v59 = vld [vmem:[#allocation2 + $0x18] sm:$0xf] }
  0x44   : > { %v353_v52 = vshll.u32 %v299_v42, 16  ;;  %v347_v55 = vsel %vm5224_vm9, %v339_v40, %v346_v47  ;;  %658 = vst [vmem:[#allocation2 + $0xc] sm:$0xf] %v657_v50  ;;  %v358_v57 = vshrl.u32 %v300_v43, 16  ;;  %v361_v58 = vshll.u32 %v300_v43, 16 }
  0x45   : > { %v664_v56 = vsel %vm5241_vm14, %v348_v48, %v663_v32  ;;  %4390 = vmatprep.mubr.msk.bf16.mxu1 %vm1263_vm5, %v3999_v49  ;;  %660 = vst.msk [vmem:[#allocation2 + $0x10] sm:$0xf] %vm653_vm10, %v347_v55  ;;  %v352_v60 = vrot.slane %v350_v51, 7  ;;  %v367_v61 = vshrl.u32 %v301_v53, 16  ;;  %v370_v62 = vshll.u32 %v301_v53, 16 }
  0x46   : > { %665 = vst [vmem:[#allocation2 + $0x14] sm:$0x1] %v664_v56  ;;  %v375_v63 = vshrl.u32 %v302_v54, 16  ;;  %v303_v0 = vld [vmem:[%s5142_s6 + $0x18] sm:$0xf]  ;;  %v360_v1 = vrot.slane %v358_v57, 7 }
  0x47   : > { %v378_v2 = vshll.u32 %v302_v54, 16  ;;  %v304_v3 = vld [vmem:[%s5142_s6 + $0x1c] sm:$0xf]  ;;  %v384_v4 = vshrl.u32 %v303_v0, 16  ;;  %v387_v6 = vshll.u32 %v303_v0, 16  ;;  %v355_v7 = vor.u32 %v353_v52, %v352_v60 }
  0x48   : > { %v356_v8 = vrot.slane %v352_v60, 4  ;;  %v670_v9 = vld [vmem:[#allocation2 + $0x20] sm:$0x1]  ;;  %v369_v10 = vrot.slane %v367_v61, 7  ;;  %v377_v11 = vrot.slane %v375_v63, 7  ;;  %v363_v12 = vor.u32 %v361_v58, %v360_v1 }
  0x49   : > { %v365_v13 = vrot.slane %v360_v1, 4  ;;  %v673_v14 = vld [vmem:[#allocation2 + $0x24] sm:$0xf]  ;;  %v386_v15 = vrot.slane %v384_v4, 7  ;;  %v392_v16 = vshrl.u32 %v304_v3, 16  ;;  %v667_v17 = vsel %vm5230_vm13, %v355_v7, %v666_v59 }
  0x4a   : > { %v372_v18 = vor.u32 %v370_v62, %v369_v10  ;;  %v373_v19 = vrot.slane %v369_v10, 4  ;;  %v380_v20 = vor.u32 %v378_v2, %v377_v11  ;;  %v677_v21 = vld [vmem:[#allocation2 + $0x2c] sm:$0x1]  ;;  %v680_v22 = vld [vmem:[#allocation2 + $0x30] sm:$0xf]  ;;  %v364_v24 = vsel %vm5224_vm9, %v356_v8, %v363_v12 }
  0x4b   : > { %668 = vst [vmem:[#allocation2 + $0x18] sm:$0xf] %v667_v17  ;;  %v671_v25 = vsel %vm5241_vm14, %v365_v13, %v670_v9  ;;  %v382_v26 = vrot.slane %v377_v11, 4  ;;  %v389_v27 = vor.u32 %v387_v6, %v386_v15  ;;  %v5273_v28 = vld [vmem:[#allocation2 + $0xc] sm:$0xf]  ;;  %v390_v32 = vrot.slane %v386_v15, 4 }
  0x4c   : > { %669 = vst.msk [vmem:[#allocation2 + $0x1c] sm:$0xf] %vm653_vm10, %v364_v24  ;;  %672 = vst [vmem:[#allocation2 + $0x20] sm:$0x1] %v671_v25  ;;  %v381_v29 = vsel %vm5224_vm9, %v373_v19, %v380_v20  ;;  %v674_v31 = vsel %vm5230_vm13, %v372_v18, %v673_v14  ;;  %v394_v33 = vrot.slane %v392_v16, 7  ;;  %v854_v39 = vshrl.u32 %v5273_v28, 16 }
  0x4d   : > { %v305_v34 = vld [vmem:[%s5142_s6 + $0x20] sm:$0xf]  ;;  %v5281_v35 = vld [vmem:[#allocation2 + $0x10] sm:$0xf]  ;;  %v5283_v37 = vld [vmem:[#allocation2 + $0x14] sm:$0x1]  ;;  %v678_v42 = vsel %vm5241_vm14, %v382_v26, %v677_v21  ;;  %v681_v43 = vsel %vm5230_vm13, %v389_v27, %v680_v22 }
  0x4e   : > { %v857_v40 = vshll.u32 %v5273_v28, 16  ;;  %675 = vst [vmem:[#allocation2 + $0x24] sm:$0xf] %v674_v31  ;;  %676 = vst.msk [vmem:[#allocation2 + $0x28] sm:$0xf] %vm653_vm10, %v381_v29  ;;  %v863_v45 = vshll.u32 %v5281_v35, 16 }
  0x4f   : > { %v867_v46 = vshrl.u32 %v5281_v35, 16  ;;  %v873_v47 = vshll.u32 %v5283_v37, 16  ;;  %679 = vst [vmem:[#allocation2 + $0x2c] sm:$0x1] %v678_v42  ;;  %v395_v48 = vshll.u32 %v304_v3, 16  ;;  %v856_v50 = vrot.slane %v854_v39, 4 }
  0x50   : > { %682 = vst [vmem:[#allocation2 + $0x30] sm:$0xf] %v681_v43  ;;  %v684_v49 = vld [vmem:[#allocation2 + $0x38] sm:$0x1]  ;;  %v859_v51 = vrot.slane %v857_v40, 5  ;;  %v399_v52 = vrot.slane %v394_v33, 4 }
  0x51   : > { %v5296_v53 = vld [vmem:[%s5142_s6 + $0x24] sm:$0xf]  ;;  %v401_v54 = vshrl.u32 %v305_v34, 16  ;;  %v865_v55 = vrot.slane %v863_v45, 5  ;;  %v869_v56 = vrot.slane %v867_v46, 4  ;;  %v875_v57 = vrot.slane %v873_v47, 5 }
  0x52   : > { %v397_v58 = vor.u32 %v395_v48, %v394_v33  ;;  %v860_v59 = vor.u32 %v859_v51, %v856_v50  ;;  %v685_v60 = vsel %vm5241_vm14, %v399_v52, %v684_v49  ;;  %v404_v62 = vshll.u32 %v305_v34, 16  ;;  %v5302_v0 = vld [vmem:[#allocation2 + $0x18] sm:$0xf]  ;;  %v320_v5 = vld [vmem:[%s5142_s6 + $0x5c] sm:$0xf] }
  0x53   : > { %v5300_v61 = vrot.slane %v401_v54, 7  ;;  %v870_v63 = vor.u32 %v869_v56, %v865_v55  ;;  %686 = vst [vmem:[#allocation2 + $0x38] sm:$0x1] %v685_v60  ;;  %v409_v2 = vshrl.u32 %v5296_v53, 16  ;;  %v412_v3 = vshll.u32 %v5296_v53, 16 }
  0x54   : > { %v398_v1 = vsel %vm5224_vm9, %v390_v32, %v397_v58  ;;  %v861_v4 = vrot.slane %v860_v59, 4  ;;  %v5308_v6 = vld [vmem:[#allocation2 + $0x1c] sm:$0xf]  ;;  %v5310_v7 = vld [vmem:[#allocation2 + $0x20] sm:$0x1]  ;;  %v878_v8 = vshrl.u32 %v5302_v0, 16 }
  0x55   : > { %683 = vst.msk [vmem:[#allocation2 + $0x34] sm:$0xf] %vm653_vm10, %v398_v1  ;;  %v5315_v9 = vor.u32 %v404_v62, %v5300_v61  ;;  %v871_v10 = vrot.slane %v870_v63, 4  ;;  %v881_v11 = vshll.u32 %v5302_v0, 16  ;;  %v887_v12 = vshll.u32 %v5308_v6, 16 }
  0x56   : > { %v891_v13 = vshrl.u32 %v5308_v6, 16  ;;  %v5320_v14 = vld [vmem:[#allocation2 + $0x24] sm:$0xf]  ;;  %v866_v15 = vsel %vm5216_vm8, %v861_v4, %v865_v55  ;;  %v880_v16 = vrot.slane %v878_v8, 4  ;;  %v897_v17 = vshll.u32 %v5310_v7, 16 }
  0x57   : > { %v1804_v18 = vrot.slane %v5308_v6, 5  ;;  %v5326_v19 = vld [vmem:[#allocation2 + $0x28] sm:$0xf]  ;;  %v876_v20 = vsel %vm5216_vm8, %v871_v10, %v875_v57  ;;  %v883_v21 = vrot.slane %v881_v11, 5  ;;  %v889_v22 = vrot.slane %v887_v12, 5 }
  0x58   : > { %v893_v24 = vrot.slane %v891_v13, 4  ;;  %v5330_v25 = vld [vmem:[#allocation2 + $0x2c] sm:$0x1]  ;;  %v4000_v26 = vcombine.low %v866_v15, %v876_v20  ;;  %v899_v27 = vrot.slane %v897_v17, 5  ;;  %v902_v31 = vshrl.u32 %v5320_v14, 16 }
  0x59   : > { %v5334_v32 = vld [vmem:[#allocation2 + $0x30] sm:$0xf]  ;;  %v884_v33 = vor.u32 %v883_v21, %v880_v16  ;;  %v905_v39 = vshll.u32 %v5320_v14, 16  ;;  %v911_v40 = vshll.u32 %v5326_v19, 16  ;;  %v915_v43 = vshrl.u32 %v5326_v19, 16 }
  0x5a   : > { %v894_v34 = vor.u32 %v893_v24, %v889_v22  ;;  %4391 = vmatmul.mubr.msk.bf16.vlgmr.msra.gmra.mrb[0].mxu1 %vm1263_vm5, %v4000_v26  ;;  %4526 = vmatprep.mubr.msk.bf16.mxu0 %vm1263_vm5, %v4000_v26  ;;  %v904_v42 = vrot.slane %v902_v31, 4  ;;  %v921_v45 = vshll.u32 %v5330_v25, 16  ;;  %v926_v46 = vshrl.u32 %v5334_v32, 16  ;;  %v5346_v55 = vld [vmem:[#allocation2 + $0x38] sm:$0x1] }
  0x5b   : > { %4423 = vmatpush3.bf16.msra.mxu1 %v5238_v38  ;;  %v885_v47 = vrot.slane %v884_v33, 4  ;;  %v907_v49 = vrot.slane %v905_v39, 5  ;;  %v913_v50 = vrot.slane %v911_v40, 5  ;;  %v917_v52 = vrot.slane %v915_v43, 4  ;;  %v687_v8 = vld [vmem:[#allocation2 + $0x3c] sm:$0xf] }
  0x5c   : > { %v895_v48 = vrot.slane %v894_v34, 4  ;;  %v5344_v51 = vld [vmem:[#allocation2 + $0x34] sm:$0xf]  ;;  %v923_v54 = vrot.slane %v921_v45, 5  ;;  %v928_v56 = vrot.slane %v926_v46, 4  ;;  %v929_v57 = vshll.u32 %v5334_v32, 16 }
  0x5d   : > { %v890_v58 = vsel %vm5216_vm8, %v885_v47, %v889_v22  ;;  %v908_v59 = vor.u32 %v907_v49, %v904_v42  ;;  %v935_v60 = vshll.u32 %v5344_v51, 16  ;;  %v918_v63 = vor.u32 %v917_v52, %v913_v50  ;;  %v307_v10 = vld [vmem:[%s5142_s6 + $0x28] sm:$0xf]  ;;  %v308_v26 = vld [vmem:[%s5142_s6 + $0x2c] sm:$0xf] }
  0x5e   : > { %v900_v38 = vsel %vm5216_vm8, %v895_v48, %v899_v27  ;;  %v931_v1 = vrot.slane %v929_v57, 5  ;;  %v939_v4 = vshrl.u32 %v5344_v51, 16  ;;  %v945_v13 = vshll.u32 %v5346_v55, 16  ;;  %v5376_v31 = vld [vmem:[%s6450_s1 + $0xc] sm:$0x3] }
  0x5f   : > { %v5354_v62 = vcombine.low %v890_v58, %v900_v38  ;;  %v909_v11 = vrot.slane %v908_v59, 4  ;;  %v937_v12 = vrot.slane %v935_v60, 5  ;;  %v407_v15 = vrot.slane %v5300_v61, 4  ;;  %v691_v39 = vld [vmem:[#allocation2 + $0x44] sm:$0x1] }
  0x60   : > { %v919_v16 = vrot.slane %v918_v63, 4  ;;  %v932_v17 = vor.u32 %v931_v1, %v928_v56  ;;  %v941_v20 = vrot.slane %v939_v4, 4  ;;  %v411_v21 = vrot.slane %v409_v2, 7  ;;  %v309_v45 = vld [vmem:[%s5142_s6 + $0x30] sm:$0xf] }
  0x61   : > { %6481 = vst [vmem:[#allocation9_spill] sm:$0xff] %v5354_v62  ;;  %4527 = vmatmul.mubr.msk.bf16.vlgmr.msra.gmra.mrb[0].mxu0 %vm1263_vm5, %v5354_v62  ;;  %4394 = vmatprep.mubr.msk.bf16.mxu1 %vm1263_vm5, %v5354_v62  ;;  %v914_v22 = vsel %vm5216_vm8, %v909_v11, %v913_v50  ;;  %v947_v24 = vrot.slane %v945_v13, 5  ;;  %v688_v61 = vsel %vm5230_vm13, %v5315_v9, %v687_v8  ;;  %v418_v27 = vshrl.u32 %v307_v10, 16  ;;  %v694_v48 = vld [vmem:[#allocation2 + $0x48] sm:$0xf] }
  0x62   : > { %4559 = vmatpush3.bf16.msra.mxu0 %v5249_v44  ;;  %v924_v2 = vsel %vm5216_vm8, %v919_v16, %v923_v54  ;;  %v933_v44 = vrot.slane %v932_v17, 4  ;;  %v942_v33 = vor.u32 %v941_v20, %v937_v12  ;;  %v414_v34 = vor.u32 %v412_v3, %v411_v21  ;;  %689 = vst [vmem:[#allocation2 + $0x3c] sm:$0xf] %v688_v61  ;;  %v310_v49 = vld [vmem:[%s5142_s6 + $0x34] sm:$0xf] }
  0x63   : > { %4959 = vmatprep.subr.msk.bf16.mxu0 %vm1312_vm2, %v5376_v31  ;;  %v5384_v9 = vcombine.low %v914_v22, %v924_v2  ;;  %v416_v40 = vrot.slane %v411_v21, 4  ;;  %v420_v42 = vrot.slane %v418_v27, 7  ;;  %v421_v43 = vshll.u32 %v307_v10, 16  ;;  %v311_v57 = vld [vmem:[%s5142_s6 + $0x38] sm:$0xf] }
  0x64   : > { %v938_v46 = vsel %vm5216_vm8, %v933_v44, %v937_v12  ;;  %v943_v47 = vrot.slane %v942_v33, 4  ;;  %v415_v53 = vsel %vm5224_vm9, %v407_v15, %v414_v34  ;;  %v426_v3 = vshrl.u32 %v308_v26, 16  ;;  %v312_v63 = vld [vmem:[%s5142_s6 + $0x3c] sm:$0xf]  ;;  %v698_v8 = vld [vmem:[#allocation2 + $0x50] sm:$0x1] }
  0x65   : > { %6482 = vst [vmem:[#allocation10_spill] sm:$0xff] %v5384_v9  ;;  %4395 = vmatmul.mubr.msk.bf16.gmra.mrb[4].mxu1 %vm1263_vm5, %v5384_v9  ;;  %4530 = vmatprep.mubr.msk.bf16.mxu0 %vm1263_vm5, %v5384_v9  ;;  %690 = vst.msk [vmem:[#allocation2 + $0x40] sm:$0xf] %vm653_vm10, %v415_v53  ;;  %v692_v50 = vsel %vm5241_vm14, %v416_v40, %v691_v39  ;;  %v423_v52 = vor.u32 %v421_v43, %v420_v42  ;;  %v424_v54 = vrot.slane %v420_v42, 4  ;;  %v701_v44 = vld [vmem:[#allocation2 + $0x54] sm:$0xf] }
  0x66   : > { %v429_v56 = vshll.u32 %v308_v26, 16  ;;  %v948_v58 = vsel %vm5216_vm8, %v943_v47, %v947_v24  ;;  %693 = vst [vmem:[#allocation2 + $0x44] sm:$0x1] %v692_v50  ;;  %v428_v38 = vrot.slane %v426_v3, 7  ;;  %v435_v59 = vshrl.u32 %v309_v45, 16 }
  0x67   : > { %v438_v60 = vshll.u32 %v309_v45, 16  ;;  %v5403_v1 = vcombine.low %v938_v46, %v948_v58  ;;  %v695_v4 = vsel %vm5230_vm13, %v423_v52, %v694_v48  ;;  %v443_v10 = vshrl.u32 %v310_v49, 16  ;;  %v705_v42 = vld [vmem:[#allocation2 + $0x5c] sm:$0x1] }
  0x68   : > { %v446_v11 = vshll.u32 %v310_v49, 16  ;;  %v431_v12 = vor.u32 %v429_v56, %v428_v38  ;;  %v433_v13 = vrot.slane %v428_v38, 4  ;;  %696 = vst [vmem:[#allocation2 + $0x48] sm:$0xf] %v695_v4  ;;  %v437_v15 = vrot.slane %v435_v59, 7 }
  0x69   : > { %6483 = vst [vmem:[#allocation11_spill] sm:$0xff] %v5403_v1  ;;  %v452_v16 = vshrl.u32 %v311_v57, 16  ;;  %4531 = vmatmul.mubr.msk.bf16.gmra.mrb[4].mxu0 %vm1263_vm5, %v5403_v1  ;;  %4398 = vmatprep.mubr.msk.bf16.mxu1 %vm1263_vm5, %v5403_v1  ;;  %v5411_v17 = vld [vmem:[#allocation2 + $0x3c] sm:$0xf]  ;;  %v445_v20 = vrot.slane %v443_v10, 7  ;;  %v455_v21 = vshll.u32 %v311_v57, 16 }
  0x6a   : > { %v460_v22 = vshrl.u32 %v312_v63, 16  ;;  %v463_v24 = vshll.u32 %v312_v63, 16  ;;  %v950_v61 = vshrl.u32 %v5411_v17, 16  ;;  %v953_v26 = vshll.u32 %v5411_v17, 16  ;;  %v708_v38 = vld [vmem:[#allocation2 + $0x60] sm:$0xf] }
  0x6b   : > { %v432_v27 = vsel %vm5224_vm9, %v424_v54, %v431_v12  ;;  %v699_v2 = vsel %vm5241_vm14, %v433_v13, %v698_v8  ;;  %v440_v33 = vor.u32 %v438_v60, %v437_v15  ;;  %v441_v34 = vrot.slane %v437_v15, 4 }
  0x6c   : > { %697 = vst.msk [vmem:[#allocation2 + $0x4c] sm:$0xf] %vm653_vm10, %v432_v27  ;;  %700 = vst [vmem:[#allocation2 + $0x50] sm:$0x1] %v699_v2  ;;  %v448_v39 = vor.u32 %v446_v11, %v445_v20  ;;  %v450_v40 = vrot.slane %v445_v20, 4  ;;  %v952_v45 = vrot.slane %v950_v61, 4 }
  0x6d   : > { %v5420_v43 = vld [vmem:[#allocation2 + $0x40] sm:$0xf]  ;;  %v955_v46 = vrot.slane %v953_v26, 5  ;;  %v454_v47 = vrot.slane %v452_v16, 7  ;;  %v462_v53 = vrot.slane %v460_v22, 7  ;;  %v702_v52 = vsel %vm5230_vm13, %v440_v33, %v701_v44 }
  0x6e   : > { %v5422_v3 = vld [vmem:[#allocation2 + $0x44] sm:$0x1]  ;;  %v959_v48 = vshll.u32 %v5420_v43, 16  ;;  %v963_v49 = vshrl.u32 %v5420_v43, 16  ;;  %v449_v50 = vsel %vm5224_vm9, %v441_v34, %v448_v39  ;;  %703 = vst [vmem:[#allocation2 + $0x54] sm:$0xf] %v702_v52  ;;  %v706_v57 = vsel %vm5241_vm14, %v450_v40, %v705_v42 }
  0x6f   : > { %v956_v54 = vor.u32 %v955_v46, %v952_v45  ;;  %v969_v56 = vshll.u32 %v5422_v3, 16  ;;  %704 = vst.msk [vmem:[#allocation2 + $0x58] sm:$0xf] %vm653_vm10, %v449_v50  ;;  %v457_v58 = vor.u32 %v455_v21, %v454_v47  ;;  %v5434_v63 = vld [vmem:[#allocation2 + $0x48] sm:$0xf]  ;;  %v458_v4 = vrot.slane %v454_v47, 4 }
  0x70   : > { %v961_v59 = vrot.slane %v959_v48, 5  ;;  %v965_v60 = vrot.slane %v963_v49, 4  ;;  %707 = vst [vmem:[#allocation2 + $0x5c] sm:$0x1] %v706_v57  ;;  %v465_v8 = vor.u32 %v463_v24, %v462_v53  ;;  %v974_v12 = vshrl.u32 %v5434_v63, 16 }
  0x71   : > { %v957_v10 = vrot.slane %v956_v54, 4  ;;  %v971_v11 = vrot.slane %v969_v56, 5  ;;  %v977_v13 = vshll.u32 %v5434_v63, 16  ;;  %v467_v20 = vrot.slane %v462_v53, 4  ;;  %v712_v22 = vld [vmem:[#allocation2 + $0x68] sm:$0x1] }
  0x72   : > { %v966_v15 = vor.u32 %v965_v60, %v961_v59  ;;  %v466_v16 = vsel %vm5224_vm9, %v458_v4, %v465_v8  ;;  %v709_v21 = vsel %vm5230_vm13, %v457_v58, %v708_v38  ;;  %v313_v61 = vld [vmem:[%s5142_s6 + $0x40] sm:$0xf]  ;;  %v976_v2 = vrot.slane %v974_v12, 4  ;;  %v5462_v48 = vld [vmem:[%s6450_s1 + $0x4] sm:$0x3] }
  0x73   : > { %v962_v26 = vsel %vm5216_vm8, %v957_v10, %v961_v59  ;;  %v5445_v24 = vld [vmem:[#allocation2 + $0x4c] sm:$0xf]  ;;  %v5447_v27 = vld [vmem:[#allocation2 + $0x50] sm:$0x1]  ;;  %v979_v44 = vrot.slane %v977_v13, 5  ;;  %v5452_v33 = vcombine.low %v5273_v28, %v5281_v35  ;;  %v713_v46 = vsel %vm5241_vm14, %v467_v20, %v712_v22  ;;  %4954 = vmatprep.subr.msk.bf16.mxu1 %vm1312_vm2, %v5462_v48 }
  0x74   : > { %710 = vst [vmem:[#allocation2 + $0x60] sm:$0xf] %v709_v21  ;;  %711 = vst.msk [vmem:[#allocation2 + $0x64] sm:$0xf] %vm653_vm10, %v466_v16  ;;  %v967_v34 = vrot.slane %v966_v15, 4  ;;  %v983_v39 = vshll.u32 %v5445_v24, 16  ;;  %v5479_v4 = vcombine.low %v5302_v0, %v5308_v6 }
  0x75   : > { %v987_v40 = vshrl.u32 %v5445_v24, 16  ;;  %v993_v42 = vshll.u32 %v5447_v27, 16  ;;  %v980_v45 = vor.u32 %v979_v44, %v976_v2  ;;  %v469_v47 = vshrl.u32 %v313_v61, 16  ;;  %v5466_v56 = vld [vmem:[#allocation2 + $0x54] sm:$0xf] }
  0x76   : > { %v472_v53 = vshll.u32 %v313_v61, 16  ;;  %v972_v49 = vsel %vm5216_vm8, %v967_v34, %v971_v11  ;;  %v985_v50 = vrot.slane %v983_v39, 5  ;;  %714 = vst [vmem:[#allocation2 + $0x68] sm:$0x1] %v713_v46  ;;  %v5472_v38 = vld [vmem:[#allocation2 + $0x58] sm:$0xf] }
  0x77   : > { %v989_v52 = vrot.slane %v987_v40, 4  ;;  %v995_v54 = vrot.slane %v993_v42, 5  ;;  %v5470_v57 = vcombine.low %v962_v26, %v972_v49  ;;  %v981_v58 = vrot.slane %v980_v45, 4  ;;  %v5474_v59 = vld [vmem:[#allocation2 + $0x5c] sm:$0x1] }
  0x78   : > { %v998_v60 = vshrl.u32 %v5466_v56, 16  ;;  %v1001_v10 = vshll.u32 %v5466_v56, 16  ;;  %v1007_v11 = vshll.u32 %v5472_v38, 16  ;;  %v1011_v12 = vshrl.u32 %v5472_v38, 16 }
  0x79   : > { %6484 = vst [vmem:[#allocation12_spill] sm:$0xff] %v5470_v57  ;;  %v990_v8 = vor.u32 %v989_v52, %v985_v50  ;;  %4399 = vmatmul.mubr.msk.bf16.gmra.mrb[8].mxu1 %vm1263_vm5, %v5470_v57  ;;  %4534 = vmatprep.mubr.msk.bf16.mxu0 %vm1263_vm5, %v5470_v57  ;;  %v986_v13 = vsel %vm5216_vm8, %v981_v58, %v985_v50  ;;  %v1017_v16 = vshll.u32 %v5474_v59, 16  ;;  %v471_v20 = vrot.slane %v469_v47, 7  ;;  %v314_v50 = vld [vmem:[%s5142_s6 + $0x44] sm:$0xf] }
  0x7a   : > { %v1000_v15 = vrot.slane %v998_v60, 4  ;;  %v1003_v22 = vrot.slane %v1001_v10, 5  ;;  %v1009_v61 = vrot.slane %v1007_v11, 5  ;;  %v1013_v26 = vrot.slane %v1011_v12, 4 }
  0x7b   : > { %v991_v21 = vrot.slane %v990_v8, 4  ;;  %v5491_v2 = vld [vmem:[#allocation2 + $0x60] sm:$0xf]  ;;  %v1019_v44 = vrot.slane %v1017_v16, 5  ;;  %v5493_v34 = vld [vmem:[#allocation2 + $0x64] sm:$0xf]  ;;  %v474_v42 = vor.u32 %v472_v53, %v471_v20 }
  0x7c   : > { %v1022_v39 = vshrl.u32 %v5491_v2, 16  ;;  %v1025_v40 = vshll.u32 %v5491_v2, 16  ;;  %v1004_v46 = vor.u32 %v1003_v22, %v1000_v15  ;;  %v1014_v49 = vor.u32 %v1013_v26, %v1009_v61  ;;  %v715_v22 = vld [vmem:[#allocation2 + $0x6c] sm:$0xf] }
  0x7d   : > { %v996_v45 = vsel %vm5216_vm8, %v991_v21, %v995_v54  ;;  %v1031_v47 = vshll.u32 %v5493_v34, 16  ;;  %v5503_v58 = vld [vmem:[#allocation2 + $0x68] sm:$0x1]  ;;  %v1035_v10 = vshrl.u32 %v5493_v34, 16  ;;  %v475_v15 = vrot.slane %v471_v20, 4 }
  0x7e   : > { %v5501_v52 = vcombine.low %v986_v13, %v996_v45  ;;  %v1024_v60 = vrot.slane %v1022_v39, 4  ;;  %v1027_v8 = vrot.slane %v1025_v40, 5  ;;  %v1005_v11 = vrot.slane %v1004_v46, 4  ;;  %v719_v20 = vld [vmem:[#allocation2 + $0x74] sm:$0x1] }
  0x7f   : > { %v1015_v12 = vrot.slane %v1014_v49, 4  ;;  %v1033_v16 = vrot.slane %v1031_v47, 5  ;;  %v1041_v53 = vshll.u32 %v5503_v58, 16  ;;  %v1037_v13 = vrot.slane %v1035_v10, 4 }
  0x80   : > { %6485 = vst [vmem:[#allocation13_spill] sm:$0xff] %v5501_v52  ;;  %4535 = vmatmul.mubr.msk.bf16.gmra.mrb[8].mxu0 %vm1263_vm5, %v5501_v52  ;;  %4402 = vmatprep.mubr.msk.bf16.mxu1 %vm1263_vm5, %v5501_v52  ;;  %v1028_v54 = vor.u32 %v1027_v8, %v1024_v60  ;;  %v477_v21 = vshrl.u32 %v314_v50, 16  ;;  %v1010_v26 = vsel %vm5216_vm8, %v1005_v11, %v1009_v61  ;;  %v480_v45 = vshll.u32 %v314_v50, 16  ;;  %v315_v11 = vld [vmem:[%s5142_s6 + $0x48] sm:$0xf] }
  0x81   : > { %v1020_v39 = vsel %vm5216_vm8, %v1015_v12, %v1019_v44  ;;  %v1043_v40 = vrot.slane %v1041_v53, 5  ;;  %v1038_v47 = vor.u32 %v1037_v13, %v1033_v16  ;;  %v716_v60 = vsel %vm5230_vm13, %v474_v42, %v715_v22 }
  0x82   : > { %v5515_v46 = vcombine.low %v1010_v26, %v1020_v39  ;;  %v1029_v49 = vrot.slane %v1028_v54, 4  ;;  %v479_v29 = vrot.slane %v477_v21, 7  ;;  %vm1786_vm0 = vcmask 1046532   ;;  %717 = vst [vmem:[#allocation2 + $0x6c] sm:$0xf] %v716_v60 }
  0x83   : > { %v4064_v61 = vrot.slane %v5273_v28, 9  ;;  %v1039_v50 = vrot.slane %v1038_v47, 4  ;;  %vm5526_vm1 = vmor %vm1785_vm15, %vm1786_vm0  ;;  %v1797_v28 = vrot.slane %v5281_v35, 5  ;;  %v1800_v12 = vrot.slane %v5283_v37, 5  ;;  %v317_v37 = vld [vmem:[%s5142_s6 + $0x50] sm:$0xf] }
  0x84   : > { %6486 = vst [vmem:[#allocation14_spill] sm:$0xff] %v5515_v46  ;;  %4403 = vmatmul.mubr.msk.bf16.gmra.mrb[12].mxu1 %vm1263_vm5, %v5515_v46  ;;  %4538 = vmatprep.mubr.msk.bf16.mxu0 %vm1263_vm5, %v5515_v46  ;;  %v1034_v44 = vsel %vm5216_vm8, %v1029_v49, %v1033_v16  ;;  %v482_v8 = vor.u32 %v480_v45, %v479_v29  ;;  %v484_v10 = vrot.slane %v479_v29, 4  ;;  %v4065_v53 = vrot.slane %v5302_v0, 9  ;;  %v316_v16 = vld [vmem:[%s5142_s6 + $0x4c] sm:$0xf] }
  0x85   : > { %v1806_v54 = vrot.slane %v1804_v18, 4  ;;  %v1044_v29 = vsel %vm5216_vm8, %v1039_v50, %v1043_v40  ;;  %v5545_v35 = vsel %vm1312_vm2, %v5376_v31, 0  ;;  %v1798_v22 = vsel %vm5526_vm1, %v4064_v61, %v1797_v28  ;;  %v318_v47 = vld [vmem:[%s5142_s6 + $0x54] sm:$0xf]  ;;  %v722_v50 = vld [vmem:[#allocation2 + $0x78] sm:$0xf] }
  0x86   : > { %v483_v13 = vsel %vm5224_vm9, %v475_v15, %v482_v8  ;;  %v720_v21 = vsel %vm5241_vm14, %v484_v10, %v719_v20  ;;  %v5548_v0 = vcombine.low %v1034_v44, %v1044_v29  ;;  %v1799_v26 = vrot.slane %v1797_v28, 4 }
  0x87   : > { %718 = vst.msk [vmem:[#allocation2 + $0x70] sm:$0xf] %vm653_vm10, %v483_v13  ;;  %721 = vst [vmem:[#allocation2 + $0x74] sm:$0x1] %v720_v21  ;;  %v1805_v15 = vsel %vm5526_vm1, %v4065_v53, %v1804_v18  ;;  %v6490_v39 = vrot.slane %v5310_v7, 5  ;;  %v486_v40 = vshrl.u32 %v315_v11, 16 }
  0x88   : > { %6489 = vst [vmem:[#allocation15_spill] sm:$0xff] %v5548_v0  ;;  %v489_v45 = vshll.u32 %v315_v11, 16  ;;  %v494_v49 = vshrl.u32 %v316_v16, 16  ;;  %4539 = vmatmul.mubr.msk.bf16.gmra.mrb[12].mxu0 %vm1263_vm5, %v5548_v0  ;;  %4406 = vmatprep.mubr.msk.bf16.mxu1 %vm1263_vm5, %v5548_v0  ;;  %v1801_v6 = vsel %vm5526_vm1, %v1799_v26, %v1800_v12  ;;  %v497_v18 = vshll.u32 %v316_v16, 16  ;;  %v726_v26 = vld [vmem:[#allocation2 + $0x80] sm:$0x1] }
  0x89   : > { %v1808_v31 = vsel %vm5526_vm1, %v1806_v54, %v6490_v39  ;;  %v503_v7 = vshrl.u32 %v317_v37, 16  ;;  %v5570_v20 = vcombine.low %v1798_v22, %v1801_v6  ;;  %v488_v61 = vrot.slane %v486_v40, 7  ;;  %v5572_v10 = vld [vmem:[#allocation2 + $0x6c] sm:$0xf]  ;;  %v729_v39 = vld [vmem:[#allocation2 + $0x84] sm:$0xf] }
  0x8a   : > { %v5568_v60 = vcombine.low %v1805_v15, %v1808_v31  ;;  %v496_v44 = vrot.slane %v494_v49, 7  ;;  %v506_v8 = vshll.u32 %v317_v37, 16  ;;  %v511_v28 = vshrl.u32 %v318_v47, 16 }
  0x8b   : > { %v505_v11 = vrot.slane %v503_v7, 7  ;;  %v514_v53 = vshll.u32 %v318_v47, 16  ;;  %v4066_v54 = vrot.slane %v5320_v14, 9  ;;  %v1046_v29 = vshrl.u32 %v5572_v10, 16  ;;  %4560 = vmatprep.mubr.msk.bf16.mxu0 %vm1263_vm5, %v5570_v20 }
  0x8c   : > { %v1049_v12 = vshll.u32 %v5572_v10, 16  ;;  %v491_v16 = vor.u32 %v489_v45, %v488_v61  ;;  %v492_v13 = vrot.slane %v488_v61, 4  ;;  %v499_v21 = vor.u32 %v497_v18, %v496_v44 }
  0x8d   : > { %v501_v22 = vrot.slane %v496_v44, 4  ;;  %v508_v37 = vor.u32 %v506_v8, %v505_v11  ;;  %v509_v15 = vrot.slane %v505_v11, 4  ;;  %v1048_v49 = vrot.slane %v1046_v29, 4  ;;  %v5602_v29 = vld [vmem:[%s6450_s1 + $0xe] sm:$0x3] }
  0x8e   : > { %v5579_v31 = vld [vmem:[#allocation2 + $0x70] sm:$0xf]  ;;  %v5581_v40 = vld [vmem:[#allocation2 + $0x74] sm:$0x1]  ;;  %v1051_v47 = vrot.slane %v1049_v12, 5  ;;  %v723_v6 = vsel %vm5230_vm13, %v491_v16, %v722_v50  ;;  %v5587_v7 = vcombine.low %v5320_v14, %v5326_v19  ;;  %v500_v44 = vsel %vm5224_vm9, %v492_v13, %v499_v21 }
  0x8f   : > { %v1055_v45 = vshll.u32 %v5579_v31, 16  ;;  %v1059_v18 = vshrl.u32 %v5579_v31, 16  ;;  %v1065_v61 = vshll.u32 %v5581_v40, 16  ;;  %724 = vst [vmem:[#allocation2 + $0x78] sm:$0xf] %v723_v6  ;;  %v727_v50 = vsel %vm5241_vm14, %v501_v22, %v726_v26 }
  0x90   : > { %v1052_v8 = vor.u32 %v1051_v47, %v1048_v49  ;;  %725 = vst.msk [vmem:[#allocation2 + $0x7c] sm:$0xf] %vm653_vm10, %v500_v44  ;;  %v513_v11 = vrot.slane %v511_v28, 7  ;;  %v730_v14 = vsel %vm5230_vm13, %v508_v37, %v729_v39  ;;  %4561 = vmatmul.mubr.msk.bf16.vlgmr.msra.gmra.mrb[0].mxu0 %vm1263_vm5, %v5568_v60  ;;  %728 = vst [vmem:[#allocation2 + $0x80] sm:$0x1] %v727_v50  ;;  %v1811_v28 = vrot.slane %v5326_v19, 5 }
  0x91   : > { %v1057_v12 = vrot.slane %v1055_v45, 5  ;;  %v1061_v16 = vrot.slane %v1059_v18, 4  ;;  %v1067_v13 = vrot.slane %v1065_v61, 5  ;;  %731 = vst [vmem:[#allocation2 + $0x84] sm:$0xf] %v730_v14  ;;  %4593 = vmatpush3.bf16.msra.mxu0 %v5545_v35  ;;  %v1814_v39 = vrot.slane %v5330_v25, 5 }
  0x92   : > { %v733_v21 = vld [vmem:[#allocation2 + $0x8c] sm:$0x1]  ;;  %v1053_v22 = vrot.slane %v1052_v8, 4  ;;  %v516_v26 = vor.u32 %v514_v53, %v513_v11  ;;  %v518_v37 = vrot.slane %v513_v11, 4  ;;  %v319_v49 = vld [vmem:[%s5142_s6 + $0x58] sm:$0xf]  ;;  %v1812_v6 = vsel %vm5526_vm1, %v4066_v54, %v1811_v28  ;;  %4960 = vmatprep.subr.msk.bf16.mxu0 %vm1312_vm2, %v5602_v29 }
  0x93   : > { %v1062_v47 = vor.u32 %v1061_v16, %v1057_v12  ;;  %v1813_v45 = vrot.slane %v1811_v28, 4  ;;  %v4067_v18 = vrot.slane %v5334_v32, 9  ;;  %v1818_v53 = vrot.slane %v5344_v51, 5 }
  0x94   : > { %v1058_v19 = vsel %vm5216_vm8, %v1053_v22, %v1057_v12  ;;  %v517_v35 = vsel %vm5224_vm9, %v509_v15, %v516_v26  ;;  %v734_v25 = vsel %vm5241_vm14, %v518_v37, %v733_v21  ;;  %v1821_v44 = vrot.slane %v5346_v55, 5 }
  0x95   : > { %v1063_v61 = vrot.slane %v1062_v47, 4  ;;  %732 = vst.msk [vmem:[#allocation2 + $0x88] sm:$0xf] %vm653_vm10, %v517_v35  ;;  %735 = vst [vmem:[#allocation2 + $0x8c] sm:$0x1] %v734_v25  ;;  %v1815_v54 = vsel %vm5526_vm1, %v1813_v45, %v1814_v39  ;;  %v520_v8 = vshrl.u32 %v319_v49, 16  ;;  %v1819_v15 = vsel %vm5526_vm1, %v4067_v18, %v1818_v53 }
  0x96   : > { %v5626_v50 = vld [vmem:[#allocation2 + $0x78] sm:$0xf]  ;;  %v5628_v11 = vcombine.low %v1812_v6, %v1815_v54  ;;  %v1820_v14 = vrot.slane %v1818_v53, 4  ;;  %v523_v12 = vshll.u32 %v319_v49, 16 }
  0x97   : > { %v1068_v16 = vsel %vm5216_vm8, %v1063_v61, %v1067_v13  ;;  %v5634_v21 = vld [vmem:[#allocation2 + $0x7c] sm:$0xf]  ;;  %v1070_v28 = vshrl.u32 %v5626_v50, 16  ;;  %v1073_v22 = vshll.u32 %v5626_v50, 16  ;;  %v5638_v55 = vrot.slane %v520_v8, 7 }
  0x98   : > { %v5640_v26 = vcombine.low %v1058_v19, %v1068_v16  ;;  %v5642_v37 = vld [vmem:[#allocation2 + $0x80] sm:$0x1]  ;;  %v1079_v39 = vshll.u32 %v5634_v21, 16  ;;  %v1083_v47 = vshrl.u32 %v5634_v21, 16  ;;  %v5646_v49 = vld [vmem:[#allocation2 + $0x84] sm:$0xf]  ;;  %4564 = vmatprep.mubr.msk.bf16.mxu0 %vm1263_vm5, %v5628_v11  ;;  %v1822_v13 = vsel %vm5526_vm1, %v1820_v14, %v1821_v44 }
  0x99   : > { %v1072_v6 = vrot.slane %v1070_v28, 4  ;;  %v1075_v45 = vrot.slane %v1073_v22, 5  ;;  %v1089_v18 = vshll.u32 %v5642_v37, 16  ;;  %v1094_v19 = vshrl.u32 %v5646_v49, 16 }
  0x9a   : > { %6491 = vst [vmem:[#allocation16_spill] sm:$0xff] %v5640_v26  ;;  %4407 = vmatmul.mubr.msk.bf16.gmra.mrb[16].mxu1 %vm1263_vm5, %v5640_v26  ;;  %v1081_v35 = vrot.slane %v1079_v39, 5  ;;  %v1085_v25 = vrot.slane %v1083_v47, 4  ;;  %v1097_v53 = vshll.u32 %v5646_v49, 16  ;;  %v5657_v61 = vcombine.low %v1819_v15, %v1822_v13  ;;  %v321_v26 = vld [vmem:[%s5142_s6 + $0x60] sm:$0xf] }
  0x9b   : > { %v1076_v54 = vor.u32 %v1075_v45, %v1072_v6  ;;  %v1091_v8 = vrot.slane %v1089_v18, 5  ;;  %v1096_v16 = vrot.slane %v1094_v19, 4  ;;  %v525_v44 = vor.u32 %v523_v12, %v5638_v55  ;;  %v736_v45 = vld [vmem:[#allocation2 + $0x90] sm:$0xf] }
  0x9c   : > { %v1086_v14 = vor.u32 %v1085_v25, %v1081_v35  ;;  %v5661_v28 = vld [vmem:[#allocation2 + $0x88] sm:$0xf]  ;;  %v5663_v22 = vld [vmem:[#allocation2 + $0x8c] sm:$0x1]  ;;  %v1099_v0 = vrot.slane %v1097_v53, 5  ;;  %4565 = vmatmul.mubr.msk.bf16.gmra.mrb[4].mxu0 %vm1263_vm5, %v5657_v61  ;;  %v526_v39 = vrot.slane %v5638_v55, 4  ;;  %v5670_v15 = vcombine.low %v5334_v32, %v5344_v51 }
  0x9d   : > { %v1077_v47 = vrot.slane %v1076_v54, 4  ;;  %v1103_v12 = vshll.u32 %v5661_v28, 16  ;;  %v1107_v13 = vshrl.u32 %v5661_v28, 16  ;;  %v1113_v6 = vshll.u32 %v5663_v22, 16  ;;  %v322_v51 = vld [vmem:[%s5142_s6 + $0x64] sm:$0xf] }
  0x9e   : > { %v1087_v18 = vrot.slane %v1086_v14, 4  ;;  %v1100_v19 = vor.u32 %v1099_v0, %v1096_v16  ;;  %v528_v25 = vshrl.u32 %v320_v5, 16  ;;  %v531_v53 = vshll.u32 %v320_v5, 16  ;;  %v740_v5 = vld [vmem:[#allocation2 + $0x98] sm:$0x1] }
  0x9f   : > { %v1082_v55 = vsel %vm5216_vm8, %v1077_v47, %v1081_v35  ;;  %v1105_v46 = vrot.slane %v1103_v12, 5  ;;  %v1109_v52 = vrot.slane %v1107_v13, 4  ;;  %v1115_v32 = vrot.slane %v1113_v6, 5 }
  0xa0   : > { %v1092_v54 = vsel %vm5216_vm8, %v1087_v18, %v1091_v8  ;;  %v1101_v57 = vrot.slane %v1100_v19, 4  ;;  %v530_v1 = vrot.slane %v528_v25, 7  ;;  %v737_v9 = vsel %vm5230_vm13, %v525_v44, %v736_v45  ;;  %v747_v25 = vld [vmem:[#allocation2 + $0xa4] sm:$0x1] }
  0xa1   : > { %v5683_v14 = vcombine.low %v1082_v55, %v1092_v54  ;;  %v1110_v0 = vor.u32 %v1109_v52, %v1105_v46  ;;  %738 = vst [vmem:[#allocation2 + $0x90] sm:$0xf] %v737_v9  ;;  %v537_v16 = vshrl.u32 %v321_v26, 16  ;;  %v540_v62 = vshll.u32 %v321_v26, 16 }
  0xa2   : > { %v1106_v35 = vsel %vm5216_vm8, %v1101_v57, %v1105_v46  ;;  %v533_v47 = vor.u32 %v531_v53, %v530_v1  ;;  %v535_v12 = vrot.slane %v530_v1, 4  ;;  %v545_v13 = vshrl.u32 %v322_v51, 16  ;;  %v743_v57 = vld [vmem:[#allocation2 + $0x9c] sm:$0xf] }
  0xa3   : > { %6492 = vst [vmem:[#allocation17_spill] sm:$0xff] %v5683_v14  ;;  %4410 = vmatprep.mubr.msk.bf16.mxu1 %vm1263_vm5, %v5683_v14  ;;  %v1111_v8 = vrot.slane %v1110_v0, 4  ;;  %v539_v6 = vrot.slane %v537_v16, 7  ;;  %v548_v44 = vshll.u32 %v322_v51, 16  ;;  %v4068_v45 = vrot.slane %v5411_v17, 9 }
  0xa4   : > { %v534_v9 = vsel %vm5224_vm9, %v526_v39, %v533_v47  ;;  %v741_v52 = vsel %vm5241_vm14, %v535_v12, %v740_v5  ;;  %v547_v26 = vrot.slane %v545_v13, 7  ;;  %v1825_v1 = vrot.slane %v5420_v43, 5  ;;  %v323_v39 = vld [vmem:[%s5142_s6 + $0x68] sm:$0xf]  ;;  %v324_v47 = vld [vmem:[%s5142_s6 + $0x6c] sm:$0xf] }
  0xa5   : > { %v1116_v46 = vsel %vm5216_vm8, %v1111_v8, %v1115_v32  ;;  %739 = vst.msk [vmem:[#allocation2 + $0x94] sm:$0xf] %vm653_vm10, %v534_v9  ;;  %742 = vst [vmem:[#allocation2 + $0x98] sm:$0x1] %v741_v52  ;;  %v542_v18 = vor.u32 %v540_v62, %v539_v6  ;;  %v543_v19 = vrot.slane %v539_v6, 4  ;;  %v1828_v17 = vrot.slane %v5422_v3, 5 }
  0xa6   : > { %v5700_v53 = vcombine.low %v1106_v35, %v1116_v46  ;;  %v550_v55 = vor.u32 %v548_v44, %v547_v26  ;;  %v552_v51 = vrot.slane %v547_v26, 4  ;;  %v1826_v43 = vsel %vm5526_vm1, %v4068_v45, %v1825_v1  ;;  %v5726_v6 = vld [vmem:[%s5142_s6 + $0x70] sm:$0xf]  ;;  %v750_v46 = vld [vmem:[#allocation2 + $0xa8] sm:$0xf] }
  0xa7   : > { %v744_v32 = vsel %vm5230_vm13, %v542_v18, %v743_v57  ;;  %v1827_v54 = vrot.slane %v1825_v1, 4  ;;  %v4069_v0 = vrot.slane %v5434_v63, 9  ;;  %v1832_v62 = vrot.slane %v5445_v24, 5 }
  0xa8   : > { %6493 = vst [vmem:[#allocation18_spill] sm:$0xff] %v5700_v53  ;;  %4411 = vmatmul.mubr.msk.bf16.gmra.mrb[20].mxu1 %vm1263_vm5, %v5700_v53  ;;  %v5710_v3 = vld [vmem:[#allocation2 + $0x90] sm:$0xf]  ;;  %v551_v5 = vsel %vm5224_vm9, %v543_v19, %v550_v55  ;;  %745 = vst [vmem:[#allocation2 + $0x9c] sm:$0xf] %v744_v32  ;;  %v748_v16 = vsel %vm5241_vm14, %v552_v51, %v747_v25  ;;  %v1835_v35 = vrot.slane %v5447_v27, 5 }
  0xa9   : > { %v554_v12 = vshrl.u32 %v323_v39, 16  ;;  %v1118_v63 = vshrl.u32 %v5710_v3, 16  ;;  %v1121_v24 = vshll.u32 %v5710_v3, 16  ;;  %746 = vst.msk [vmem:[#allocation2 + $0xa0] sm:$0xf] %vm653_vm10, %v551_v5  ;;  %v1829_v13 = vsel %vm5526_vm1, %v1827_v54, %v1828_v17 }
  0xaa   : > { %749 = vst [vmem:[#allocation2 + $0xa4] sm:$0x1] %v748_v16  ;;  %v1833_v8 = vsel %vm5526_vm1, %v4069_v0, %v1832_v62  ;;  %v5728_v44 = vcombine.low %v1826_v43, %v1829_v13  ;;  %v1834_v27 = vrot.slane %v1832_v62, 4  ;;  %v557_v9 = vshll.u32 %v323_v39, 16 }
  0xab   : > { %v556_v45 = vrot.slane %v554_v12, 7  ;;  %v1120_v52 = vrot.slane %v1118_v63, 4  ;;  %v1123_v26 = vrot.slane %v1121_v24, 5  ;;  %v562_v57 = vshrl.u32 %v324_v47, 16 }
  0xac   : > { %v565_v1 = vshll.u32 %v324_v47, 16  ;;  %v5730_v18 = vld [vmem:[#allocation2 + $0x94] sm:$0xf]  ;;  %v5732_v19 = vld [vmem:[#allocation2 + $0x98] sm:$0x1]  ;;  %4568 = vmatprep.mubr.msk.bf16.mxu0 %vm1263_vm5, %v5728_v44  ;;  %v1836_v25 = vsel %vm5526_vm1, %v1834_v27, %v1835_v35  ;;  %v571_v51 = vshrl.u32 %v5726_v6, 16 }
  0xad   : > { %v559_v17 = vor.u32 %v557_v9, %v556_v45  ;;  %v560_v55 = vrot.slane %v556_v45, 4  ;;  %v1124_v39 = vor.u32 %v1123_v26, %v1120_v52  ;;  %v1127_v43 = vshll.u32 %v5730_v18, 16 }
  0xae   : > { %v1131_v32 = vshrl.u32 %v5730_v18, 16  ;;  %v1137_v54 = vshll.u32 %v5732_v19, 16  ;;  %v5742_v0 = vcombine.low %v1833_v8, %v1836_v25  ;;  %v564_v62 = vrot.slane %v562_v57, 7  ;;  %v754_v25 = vld [vmem:[#allocation2 + $0xb0] sm:$0x1] }
  0xaf   : > { %v751_v5 = vsel %vm5230_vm13, %v559_v17, %v750_v46  ;;  %v5746_v16 = vrot.slane %v571_v51, 7  ;;  %v1125_v35 = vrot.slane %v1124_v39, 4  ;;  %v1129_v47 = vrot.slane %v1127_v43, 5  ;;  %v5748_v24 = vld [vmem:[#allocation2 + $0x9c] sm:$0xf] }
  0xb0   : > { %v1133_v12 = vrot.slane %v1131_v32, 4  ;;  %v1139_v63 = vrot.slane %v1137_v54, 5  ;;  %752 = vst [vmem:[#allocation2 + $0xa8] sm:$0xf] %v751_v5  ;;  %v5750_v13 = vld [vmem:[#allocation2 + $0xa0] sm:$0xf]  ;;  %4569 = vmatmul.mubr.msk.bf16.gmra.mrb[8].mxu0 %vm1263_vm5, %v5742_v0  ;;  %v567_v9 = vor.u32 %v565_v1, %v564_v62 }
  0xb1   : > { %v5752_v27 = vld [vmem:[#allocation2 + $0xa4] sm:$0x1]  ;;  %v1142_v8 = vshrl.u32 %v5748_v24, 16  ;;  %v1145_v45 = vshll.u32 %v5748_v24, 16  ;;  %v1130_v52 = vsel %vm5216_vm8, %v1125_v35, %v1129_v47  ;;  %v1151_v57 = vshll.u32 %v5750_v13, 16 }
  0xb2   : > { %v1134_v26 = vor.u32 %v1133_v12, %v1129_v47  ;;  %v1155_v46 = vshrl.u32 %v5750_v13, 16  ;;  %v1161_v39 = vshll.u32 %v5752_v27, 16  ;;  %v568_v43 = vsel %vm5224_vm9, %v560_v55, %v567_v9  ;;  %v326_v32 = vld [vmem:[%s5142_s6 + $0x74] sm:$0xf] }
  0xb3   : > { %v1144_v17 = vrot.slane %v1142_v8, 4  ;;  %v1147_v51 = vrot.slane %v1145_v45, 5  ;;  %v1153_v5 = vrot.slane %v1151_v57, 5  ;;  %v569_v53 = vrot.slane %v564_v62, 4  ;;  %753 = vst.msk [vmem:[#allocation2 + $0xac] sm:$0xf] %vm653_vm10, %v568_v43 }
  0xb4   : > { %v1135_v54 = vrot.slane %v1134_v26, 4  ;;  %v1157_v1 = vrot.slane %v1155_v46, 4  ;;  %v1163_v47 = vrot.slane %v1161_v39, 5  ;;  %v574_v12 = vshll.u32 %v5726_v6, 16  ;;  %v757_v26 = vld [vmem:[#allocation2 + $0xb4] sm:$0xf] }
  0xb5   : > { %v1148_v35 = vor.u32 %v1147_v51, %v1144_v17  ;;  %v577_v14 = vrot.slane %v5746_v16, 4  ;;  %v755_v55 = vsel %vm5241_vm14, %v569_v53, %v754_v25  ;;  %v579_v9 = vshrl.u32 %v326_v32, 16 }
  0xb6   : > { %v1140_v8 = vsel %vm5216_vm8, %v1135_v54, %v1139_v63  ;;  %v1158_v45 = vor.u32 %v1157_v1, %v1153_v5  ;;  %756 = vst [vmem:[#allocation2 + $0xb0] sm:$0x1] %v755_v55  ;;  %v576_v17 = vor.u32 %v574_v12, %v5746_v16  ;;  %v582_v6 = vshll.u32 %v326_v32, 16  ;;  %v761_v12 = vld [vmem:[#allocation2 + $0xbc] sm:$0x1] }
  0xb7   : > { %v5773_v57 = vcombine.low %v1130_v52, %v1140_v8  ;;  %v1149_v62 = vrot.slane %v1148_v35, 4  ;;  %v5775_v46 = vld [vmem:[#allocation2 + $0xa8] sm:$0xf]  ;;  %v581_v43 = vrot.slane %v579_v9, 7  ;;  %v4070_v25 = vrot.slane %v5466_v56, 9 }
  0xb8   : > { %v1159_v51 = vrot.slane %v1158_v45, 4  ;;  %v1166_v39 = vshrl.u32 %v5775_v46, 16  ;;  %v1169_v63 = vshll.u32 %v5775_v46, 16  ;;  %v758_v52 = vsel %vm5230_vm13, %v576_v17, %v757_v26 }
  0xb9   : > { %4414 = vmatprep.mubr.msk.bf16.mxu1 %vm1263_vm5, %v5773_v57  ;;  %v1154_v53 = vsel %vm5216_vm8, %v1149_v62, %v1153_v5  ;;  %v1839_v16 = vrot.slane %v5472_v38, 5  ;;  %v584_v35 = vor.u32 %v582_v6, %v581_v43  ;;  %759 = vst [vmem:[#allocation2 + $0xb4] sm:$0xf] %v758_v52  ;;  %v586_v5 = vrot.slane %v581_v43, 4 }
  0xba   : > { %v1164_v32 = vsel %vm5216_vm8, %v1159_v51, %v1163_v47  ;;  %v1168_v54 = vrot.slane %v1166_v39, 4  ;;  %v1171_v1 = vrot.slane %v1169_v63, 5  ;;  %v5792_v45 = vld [vmem:[#allocation2 + $0xac] sm:$0xf]  ;;  %v1842_v17 = vrot.slane %v5474_v59, 5 }
  0xbb   : > { %v5790_v8 = vcombine.low %v1154_v53, %v1164_v32  ;;  %v1840_v55 = vsel %vm5526_vm1, %v4070_v25, %v1839_v16  ;;  %v1841_v9 = vrot.slane %v1839_v16, 4  ;;  %v1175_v38 = vshll.u32 %v5792_v45, 16 }
  0xbc   : > { %v1172_v56 = vor.u32 %v1171_v1, %v1168_v54  ;;  %v1179_v26 = vshrl.u32 %v5792_v45, 16  ;;  %v585_v47 = vsel %vm5224_vm9, %v577_v14, %v584_v35  ;;  %v762_v62 = vsel %vm5241_vm14, %v586_v5, %v761_v12 }
  0xbd   : > { %4415 = vmatmul.mubr.msk.bf16.gmra.mrb[24].mxu1 %vm1263_vm5, %v5790_v8  ;;  %760 = vst.msk [vmem:[#allocation2 + $0xb8] sm:$0xf] %vm653_vm10, %v585_v47  ;;  %v4071_v6 = vrot.slane %v5491_v2, 9  ;;  %v1846_v51 = vrot.slane %v5493_v34, 5  ;;  %v5808_v39 = vld [vmem:[#allocation2 + $0xb0] sm:$0x1]  ;;  %v1843_v25 = vsel %vm5526_vm1, %v1841_v9, %v1842_v17 }
  0xbe   : > { %v1173_v63 = vrot.slane %v1172_v56, 4  ;;  %v1177_v43 = vrot.slane %v1175_v38, 5  ;;  %v1181_v53 = vrot.slane %v1179_v26, 4  ;;  %763 = vst [vmem:[#allocation2 + $0xbc] sm:$0x1] %v762_v62  ;;  %v1849_v14 = vrot.slane %v5503_v58, 5 }
  0xbf   : > { %v1185_v52 = vshll.u32 %v5808_v39, 16  ;;  %v1847_v59 = vsel %vm5526_vm1, %v4071_v6, %v1846_v51  ;;  %v1848_v16 = vrot.slane %v1846_v51, 4  ;;  %v5818_v54 = vcombine.low %v1840_v55, %v1843_v25 }
  0xc0   : > { %v1178_v2 = vsel %vm5216_vm8, %v1173_v63, %v1177_v43  ;;  %v1182_v32 = vor.u32 %v1181_v53, %v1177_v43  ;;  %v4072_v1 = vrot.slane %v5572_v10, 9  ;;  %v5821_v12 = vld [vmem:[#allocation2 + $0xb4] sm:$0xf]  ;;  %v1853_v5 = vrot.slane %v5579_v31, 5 }
  0xc1   : > { %v1187_v35 = vrot.slane %v1185_v52, 5  ;;  %v1850_v58 = vsel %vm5526_vm1, %v1848_v16, %v1849_v14  ;;  %v1856_v9 = vrot.slane %v5581_v40, 5  ;;  %v1190_v38 = vshrl.u32 %v5821_v12, 16  ;;  %4572 = vmatprep.mubr.msk.bf16.mxu0 %vm1263_vm5, %v5818_v54 }
  0xc2   : > { %v1183_v56 = vrot.slane %v1182_v32, 4  ;;  %v1193_v26 = vshll.u32 %v5821_v12, 16  ;;  %v5831_v55 = vcombine.low %v1847_v59, %v1850_v58  ;;  %v1854_v47 = vsel %vm5526_vm1, %v4072_v1, %v1853_v5 }
  0xc3   : > { %v1855_v62 = vrot.slane %v1853_v5, 4  ;;  %v4073_v17 = vrot.slane %v5626_v50, 9  ;;  %v1192_v51 = vrot.slane %v1190_v38, 4  ;;  %v1860_v43 = vrot.slane %v5634_v21, 5 }
  0xc4   : > { %v1188_v6 = vsel %vm5216_vm8, %v1183_v56, %v1187_v35  ;;  %v5838_v40 = vld [vmem:[#allocation2 + $0xb8] sm:$0xf]  ;;  %v1195_v63 = vrot.slane %v1193_v26, 5  ;;  %4573 = vmatmul.mubr.msk.bf16.gmra.mrb[12].mxu0 %vm1263_vm5, %v5831_v55  ;;  %v1863_v56 = vrot.slane %v5642_v37, 5 }
  0xc5   : > { %v5843_v53 = vcombine.low %v1178_v2, %v1188_v6  ;;  %v5845_v14 = vld [vmem:[#allocation2 + $0xbc] sm:$0x1]  ;;  %v1199_v52 = vshll.u32 %v5838_v40, 16  ;;  %v1203_v25 = vshrl.u32 %v5838_v40, 16  ;;  %v1857_v59 = vsel %vm5526_vm1, %v1855_v62, %v1856_v9 }
  0xc6   : > { %v1196_v16 = vor.u32 %v1195_v63, %v1192_v51  ;;  %v1209_v32 = vshll.u32 %v5845_v14, 16  ;;  %v5852_v1 = vcombine.low %v1854_v47, %v1857_v59  ;;  %v1861_v35 = vsel %vm5526_vm1, %v4073_v17, %v1860_v43 }
  0xc7   : > { %6494 = vst [vmem:[#allocation19_spill] sm:$0xff] %v5843_v53  ;;  %4418 = vmatprep.mubr.msk.bf16.mxu1 %vm1263_vm5, %v5843_v53  ;;  %v1201_v2 = vrot.slane %v1199_v52, 5  ;;  %v1205_v58 = vrot.slane %v1203_v25, 4  ;;  %v1862_v5 = vrot.slane %v1860_v43, 4  ;;  %v4074_v9 = vrot.slane %v5646_v49, 9 }
  0xc8   : > { %v1197_v38 = vrot.slane %v1196_v16, 4  ;;  %v1211_v26 = vrot.slane %v1209_v32, 5  ;;  %4576 = vmatprep.mubr.msk.bf16.mxu0 %vm1263_vm5, %v5852_v1  ;;  %v1867_v47 = vrot.slane %v5661_v28, 5  ;;  %v1870_v6 = vrot.slane %v5663_v22, 5  ;;  %v5878_v22 = vld [vmem:[#allocation2 + $0x4] sm:$0xf] }
  0xc9   : > { %v1206_v62 = vor.u32 %v1205_v58, %v1201_v2  ;;  %v1864_v17 = vsel %vm5526_vm1, %v1862_v5, %v1863_v56  ;;  %v4075_v51 = vrot.slane %v5710_v3, 9  ;;  %v1874_v59 = vrot.slane %v5730_v18, 5  ;;  %v5876_v58 = vld [vmem:[#allocation2] sm:$0xf] }
  0xca   : > { %v1202_v37 = vsel %vm5216_vm8, %v1197_v38, %v1201_v2  ;;  %v5869_v63 = vcombine.low %v1861_v35, %v1864_v17  ;;  %v1868_v43 = vsel %vm5526_vm1, %v4074_v9, %v1867_v47  ;;  %v1869_v52 = vrot.slane %v1867_v47, 4 }
  0xcb   : > { %v1207_v25 = vrot.slane %v1206_v62, 4  ;;  %v1877_v16 = vrot.slane %v5732_v19, 5  ;;  %v4076_v32 = vrot.slane %v5748_v24, 9  ;;  %v4031_v35 = vcombine.low %v5876_v58, %v5878_v22 }
  0xcc   : > { %4577 = vmatmul.mubr.msk.bf16.gmra.mrb[16].mxu0 %vm1263_vm5, %v5869_v63  ;;  %v1871_v2 = vsel %vm5526_vm1, %v1869_v52, %v1870_v6  ;;  %v1881_v5 = vrot.slane %v5750_v13, 5  ;;  %v1884_v19 = vrot.slane %v5752_v27, 5  ;;  %v1875_v9 = vsel %vm5526_vm1, %v4075_v51, %v1874_v59 }
  0xcd   : > { %v1212_v56 = vsel %vm5216_vm8, %v1207_v25, %v1211_v26  ;;  %v5890_v38 = vcombine.low %v1868_v43, %v1871_v2  ;;  %v1876_v47 = vrot.slane %v1874_v59, 4  ;;  %v1888_v6 = vrot.slane %v5792_v45, 5  ;;  %v327_v26 = vld [vmem:[%s5142_s6 + $0x78] sm:$0xf]  ;;  %v328_v43 = vld [vmem:[%s5142_s6 + $0x7c] sm:$0xf] }
  0xce   : > { %v5894_v62 = vcombine.low %v1202_v37, %v1212_v56  ;;  %v1882_v17 = vsel %vm5526_vm1, %v4076_v32, %v1881_v5  ;;  %v1883_v53 = vrot.slane %v1881_v5, 4  ;;  %v4077_v52 = vrot.slane %v5775_v46, 9 }
  0xcf   : > { %4580 = vmatprep.mubr.msk.bf16.mxu0 %vm1263_vm5, %v5890_v38  ;;  %v1878_v27 = vsel %vm5526_vm1, %v1876_v47, %v1877_v16  ;;  %v1891_v25 = vrot.slane %v5808_v39, 5  ;;  %v1890_v32 = vrot.slane %v1888_v6, 4  ;;  %v4078_v16 = vrot.slane %v5821_v12, 9 }
  0xd0   : > { %6495 = vst [vmem:[#allocation20_spill] sm:$0xff] %v5894_v62  ;;  %4419 = vmatmul.mubr.msk.bf16.gmra.mrb[28].mxu1 %vm1263_vm5, %v5894_v62  ;;  %v5907_v51 = vcombine.low %v1875_v9, %v1878_v27  ;;  %v1885_v37 = vsel %vm5526_vm1, %v1883_v53, %v1884_v19  ;;  %v1895_v2 = vrot.slane %v5838_v40, 5  ;;  %v1898_v5 = vrot.slane %v5845_v14, 5  ;;  %v768_v62 = vld [vmem:[#allocation2 + $0xc8] sm:$0x1] }
  0xd1   : > { %4424 = vmatprep.mubr.msk.bf16.mxu1 %vm1263_vm5, %v4031_v35  ;;  %v5914_v59 = vcombine.low %v1882_v17, %v1885_v37  ;;  %v588_v56 = vshrl.u32 %v327_v26, 16  ;;  %v591_v9 = vshll.u32 %v327_v26, 16  ;;  %v596_v47 = vshrl.u32 %v328_v43, 16 }
  0xd2   : > { %v1897_v27 = vrot.slane %v1895_v2, 4  ;;  %v599_v53 = vshll.u32 %v328_v43, 16  ;;  %v1999_v19 = vsel %vm1312_vm2, %v5462_v48, 0  ;;  %v1889_v39 = vsel %vm5526_vm1, %v4077_v52, %v1888_v6  ;;  %v764_v43 = vld [vmem:[#allocation2 + $0xc0] sm:$0xf] }
  0xd3   : > { %v590_v35 = vrot.slane %v588_v56, 7  ;;  %v598_v17 = vrot.slane %v596_v47, 7  ;;  %v1892_v14 = vsel %vm5526_vm1, %v1890_v32, %v1891_v25  ;;  %v1896_v26 = vsel %vm5526_vm1, %v4078_v16, %v1895_v2  ;;  %v5011_v2 = vld [vmem:[#allocation2 + $0x3c] sm:$0xf] }
  0xd4   : > { %4581 = vmatmul.mubr.msk.bf16.gmra.mrb[20].mxu0 %vm1263_vm5, %v5907_v51  ;;  %v5933_v48 = vcombine.low %v5626_v50, %v5634_v21  ;;  %v5937_v37 = vcombine.low %v5646_v49, %v5661_v28  ;;  %v1899_v6 = vsel %vm5526_vm1, %v1897_v27, %v1898_v5  ;;  %v5943_v32 = vcombine.low %v5710_v3, %v5730_v18  ;;  %v5956_v49 = vld [vmem:[%s6450_s1 + $0x6] sm:$0x3]  ;;  %v5012_v5 = vld [vmem:[#allocation2 + $0x40] sm:$0xf]  ;;  %v5013_v27 = vld [vmem:[#allocation2 + $0x48] sm:$0xf] }
  0xd5   : > { %4584 = vmatprep.mubr.msk.bf16.mxu0 %vm1263_vm5, %v5914_v59  ;;  %v593_v52 = vor.u32 %v591_v9, %v590_v35  ;;  %v594_v56 = vrot.slane %v590_v35, 4  ;;  %v601_v47 = vor.u32 %v599_v53, %v598_v17  ;;  %v603_v25 = vrot.slane %v598_v17, 4  ;;  %v5014_v53 = vld [vmem:[#allocation2 + $0x4c] sm:$0xf] }
  0xd6   : > { %v5947_v50 = vcombine.low %v5748_v24, %v5750_v13  ;;  %v5951_v21 = vcombine.low %v5775_v46, %v5792_v45  ;;  %v5960_v28 = vcombine.low %v1889_v39, %v1892_v14  ;;  %v5968_v24 = vcombine.low %v5821_v12, %v5838_v40 }
  0xd7   : > { %v602_v3 = vsel %vm5224_vm9, %v594_v56, %v601_v47  ;;  %v765_v18 = vsel %vm5230_vm13, %v593_v52, %v764_v43  ;;  %v5972_v13 = vcombine.low %v1896_v26, %v1899_v6  ;;  %v769_v30 = vsel %vm5241_vm14, %v603_v25, %v768_v62 }
  0xd8   : > { %4425 = vmatmul.mubr.msk.bf16.vlgmr.msra.gmra.mrb[0].mxu1 %vm1263_vm5, %v5452_v33  ;;  %766 = vst [vmem:[#allocation2 + $0xc0] sm:$0xf] %v765_v18  ;;  %767 = vst.msk [vmem:[#allocation2 + $0xc4] sm:$0xf] %vm653_vm10, %v602_v3  ;;  %v5995_v9 = vcombine.low %v5011_v2, %v5012_v5  ;;  %v5017_v2 = vld [vmem:[#allocation2 + $0x60] sm:$0xf] }
  0xd9   : > { %4457 = vmatpush3.bf16.msra.mxu1 %v1999_v19  ;;  %4428 = vmatprep.mubr.msk.bf16.mxu1 %vm1263_vm5, %v5479_v4  ;;  %770 = vst [vmem:[#allocation2 + $0xc8] sm:$0x1] %v769_v30  ;;  %v5997_v19 = vcombine.low %v5013_v27, %v5014_v53  ;;  %v6018_v5 = vcombine.low %v5017_v2, %v5493_v34  ;;  %v3079_v53 = vsel %vm1312_vm2, %v5602_v29, 0  ;;  %v6505_v2 = vld [vmem:[#allocation18_spill] sm:$0xff] }
  0xda   : > { %4955 = vmatprep.subr.msk.bf16.mxu1 %vm1312_vm2, %v5956_v49  ;;  %v6042_v34 = vcombine.low %v5572_v10, %v5579_v31  ;;  %v1790_v10 = vrot.slane %v5878_v22, 5  ;;  %v5018_v31 = vld [vmem:[#allocation2 + $0x8] sm:$0x1] }
  0xdb   : > { %v1793_v29 = vrot.slane %v5018_v31, 5 }
  0xdc   : > { %4585 = vmatmul.mubr.msk.bf16.gmra.mrb[24].mxu0 %vm1263_vm5, %v5960_v28 }
  0xdd   : > { %4588 = vmatprep.mubr.msk.bf16.mxu0 %vm1263_vm5, %v5972_v13 }
  0xdf   : > { %v5985_v36 = vld [vmem:[#allocation2 + $0xc0] sm:$0xf]  ;;  %v5987_v46 = vld [vmem:[#allocation2 + $0xc4] sm:$0xf] }
  0xe0   : > { %4429 = vmatmul.mubr.msk.bf16.gmra.mrb[4].mxu1 %vm1263_vm5, %v5587_v7  ;;  %v821_v41 = vld [vmem:[#allocation2 + $0xc8] sm:$0x1]  ;;  %v4148_v45 = vrot.slane %v5985_v36, 9  ;;  %v2631_v12 = vrot.slane %v5987_v46, 5  ;;  %v2401_v35 = vshrl.u32 %v5985_v36, 16  ;;  %v2404_v17 = vshll.u32 %v5985_v36, 16 }
  0xe1   : > { %4432 = vmatprep.mubr.msk.bf16.mxu1 %vm1263_vm5, %v5670_v15  ;;  %v2634_v40 = vrot.slane %v821_v41, 5  ;;  %v2410_v14 = vshll.u32 %v5987_v46, 16  ;;  %v2414_v43 = vshrl.u32 %v5987_v46, 16  ;;  %v2420_v3 = vshll.u32 %v821_v41, 16 }
  0xe2   : > { %v2632_v62 = vsel %vm5526_vm1, %v4148_v45, %v2631_v12  ;;  %v2633_v16 = vrot.slane %v2631_v12, 4  ;;  %v2403_v6 = vrot.slane %v2401_v35, 4  ;;  %v2406_v52 = vrot.slane %v2404_v17, 5  ;;  %v5015_v12 = vld [vmem:[#allocation2 + $0x54] sm:$0xf] }
  0xe3   : > { %v2412_v56 = vrot.slane %v2410_v14, 5  ;;  %v2416_v47 = vrot.slane %v2414_v43, 4  ;;  %v2422_v45 = vrot.slane %v2420_v3, 5  ;;  %v4063_v17 = vrot.slane %v5876_v58, 9  ;;  %v6498_v3 = vld [vmem:[#allocation11_spill] sm:$0xff] }
  0xe4   : > { %v2635_v39 = vsel %vm5526_vm1, %v2633_v16, %v2634_v40  ;;  %v2407_v25 = vor.u32 %v2406_v52, %v2403_v6  ;;  %v5016_v40 = vld [vmem:[#allocation2 + $0x58] sm:$0xf]  ;;  %v1792_v14 = vrot.slane %v1790_v10, 4  ;;  %v2205_v6 = vsel %vm1312_vm2, %v5956_v49, 0  ;;  %v5019_v52 = vld [vmem:[%s6450_s1 + $0x8] sm:$0x3] }
  0xe5   : > { %v6004_v26 = vcombine.low %v2632_v62, %v2635_v39  ;;  %v2417_v18 = vor.u32 %v2416_v47, %v2412_v56  ;;  %v6015_v62 = vcombine.low %v5015_v12, %v5016_v40  ;;  %v4204_v39 = vld [vmem:[%s6450_s1 + $0x10] sm:$0x3]  ;;  %v1791_v22 = vsel %vm5526_vm1, %v4063_v17, %v1790_v10  ;;  %v6502_v12 = vld [vmem:[#allocation15_spill] sm:$0xff]  ;;  %v6503_v40 = vld [vmem:[#allocation16_spill] sm:$0xff] }
  0xe6   : > { %v2408_v30 = vrot.slane %v2407_v25, 4  ;;  %v1794_v43 = vsel %vm5526_vm1, %v1792_v14, %v1793_v29  ;;  %v6097_v49 = vcombine.low %v5985_v36, %v5987_v46  ;;  %v6496_v46 = vld [vmem:[#allocation9_spill] sm:$0xff]  ;;  %v3291_v47 = vsel %vm1312_vm2, %v4204_v39, 0  ;;  %v6497_v25 = vld [vmem:[#allocation10_spill] sm:$0xff]  ;;  %v824_v14 = vld [vmem:[#allocation2 + $0xd4] sm:$0x1] }
  0xe7   : > { %4589 = vmatmul.mubr.msk.bf16.gmra.mrb[28].mxu0 %vm1263_vm5, %v6004_v26  ;;  %v2418_v16 = vrot.slane %v2417_v18, 4  ;;  %v4080_v58 = vcombine.low %v1791_v22, %v1794_v43  ;;  %v6499_v18 = vld [vmem:[#allocation12_spill] sm:$0xff] }
  0xe8   : > { %4433 = vmatmul.mubr.msk.bf16.gmra.mrb[8].mxu1 %vm1263_vm5, %v5995_v9  ;;  %4594 = vmatprep.mubr.msk.bf16.mxu0 %vm1263_vm5, %v5479_v4  ;;  %v2413_v27 = vsel %vm5216_vm8, %v2408_v30, %v2412_v56  ;;  %v6109_v56 = vld [vmem:[#allocation2 + $0xd0] sm:$0xf]  ;;  %v6500_v30 = vld [vmem:[#allocation13_spill] sm:$0xff]  ;;  %v6506_v22 = vld [vmem:[#allocation8_spill] sm:$0xff] }
  0xe9   : > { %4436 = vmatprep.mubr.msk.bf16.mxu1 %vm1263_vm5, %v5997_v19  ;;  %v2423_v41 = vsel %vm5216_vm8, %v2418_v16, %v2422_v45  ;;  %v6501_v45 = vld [vmem:[#allocation14_spill] sm:$0xff]  ;;  %v6504_v16 = vld [vmem:[#allocation17_spill] sm:$0xff]  ;;  %v3277_v23 = vrot.slane %v6109_v56, 5 }
  0xea   : > { %v6029_v35 = vcombine.low %v2413_v27, %v2423_v41  ;;  %v3060_v41 = vshrl.u32 %v6109_v56, 16 }
  0xec   : > { %v3062_v17 = vrot.slane %v3060_v41, 4 }
  0xef   : > { %4595 = vmatmul.mubr.msk.bf16.vlgmr.msra.gmra.mrb[0].mxu0 %vm1263_vm5, %v5587_v7 }
  0xf0   : > { %4437 = vmatmul.mubr.msk.bf16.gmra.mrb[12].mxu1 %vm1263_vm5, %v6015_v62  ;;  %4627 = vmatpush3.bf16.msra.mxu0 %v3079_v53 }
  0xf1   : > { %4440 = vmatprep.mubr.msk.bf16.mxu1 %vm1263_vm5, %v6018_v5  ;;  %4598 = vmatprep.mubr.msk.bf16.mxu0 %vm1263_vm5, %v5670_v15 }
  0xf2   : > { %4961 = vmatprep.subr.msk.bf16.mxu0 %vm1312_vm2, %v4204_v39  ;;  %v3056_v39 = vshll.u32 %v6109_v56, 16 }
  0xf4   : > { %v3058_v29 = vrot.slane %v3056_v39, 5 }
  0xf6   : > { %v3063_v43 = vor.u32 %v3062_v17, %v3058_v29 }
  0xf7   : > { %4599 = vmatmul.mubr.msk.bf16.gmra.mrb[4].mxu0 %vm1263_vm5, %v5995_v9 }
  0xf8   : > { %4441 = vmatmul.mubr.msk.bf16.gmra.mrb[16].mxu1 %vm1263_vm5, %v6042_v34  ;;  %4602 = vmatprep.mubr.msk.bf16.mxu0 %vm1263_vm5, %v5997_v19 }
  0xf9   : > { %4444 = vmatprep.mubr.msk.bf16.mxu1 %vm1263_vm5, %v5933_v48 }
  0xff   : > { %4603 = vmatmul.mubr.msk.bf16.gmra.mrb[8].mxu0 %vm1263_vm5, %v6015_v62 }
 0x100   : > { %4445 = vmatmul.mubr.msk.bf16.gmra.mrb[20].mxu1 %vm1263_vm5, %v5937_v37  ;;  %4606 = vmatprep.mubr.msk.bf16.mxu0 %vm1263_vm5, %v6018_v5 }
 0x101   : > { %4448 = vmatprep.mubr.msk.bf16.mxu1 %vm1263_vm5, %v5943_v32 }
 0x107   : > { %4607 = vmatmul.mubr.msk.bf16.gmra.mrb[12].mxu0 %vm1263_vm5, %v6042_v34 }
 0x108   : > { %4449 = vmatmul.mubr.msk.bf16.gmra.mrb[24].mxu1 %vm1263_vm5, %v5947_v50  ;;  %4610 = vmatprep.mubr.msk.bf16.mxu0 %vm1263_vm5, %v5933_v48 }
 0x109   : > { %4452 = vmatprep.mubr.msk.bf16.mxu1 %vm1263_vm5, %v5951_v21 }
 0x10f   : > { %4611 = vmatmul.mubr.msk.bf16.gmra.mrb[16].mxu0 %vm1263_vm5, %v5937_v37 }
 0x110   : > { %4453 = vmatmul.mubr.msk.bf16.gmra.mrb[28].mxu1 %vm1263_vm5, %v5968_v24  ;;  %4614 = vmatprep.mubr.msk.bf16.mxu0 %vm1263_vm5, %v5943_v32 }
 0x111   : > { %4458 = vmatprep.mubr.msk.bf16.mxu1 %vm1263_vm5, %v4080_v58  ;;  %v3066_v58 = vshll.u32 %v824_v14, 16 }
 0x117   : > { %4615 = vmatmul.mubr.msk.bf16.gmra.mrb[20].mxu0 %vm1263_vm5, %v5947_v50 }
 0x118   : > { %4459 = vmatmul.mubr.msk.bf16.vlgmr.msra.gmra.mrb[0].mxu1 %vm1263_vm5, %v5570_v20  ;;  %4618 = vmatprep.mubr.msk.bf16.mxu0 %vm1263_vm5, %v5951_v21  ;;  %v6107_v20 = vld [vmem:[#allocation2 + $0xcc] sm:$0xf] }
 0x119   : > { %4491 = vmatpush3.bf16.msra.mxu1 %v2205_v6  ;;  %4462 = vmatprep.mubr.msk.bf16.mxu1 %vm1263_vm5, %v5568_v60  ;;  %v4168_v36 = vcombine.low %v6107_v20, %v6109_v56  ;;  %v3047_v27 = vshrl.u32 %v6107_v20, 16  ;;  %v3050_v53 = vshll.u32 %v6107_v20, 16  ;;  %v6507_v6 = vld [vmem:[#allocation19_spill] sm:$0xff] }
 0x11a   : > { %4957 = vmatprep.subr.msk.bf16.mxu1 %vm1312_vm2, %v5019_v52 }
 0x11b   : > { %v3049_v10 = vrot.slane %v3047_v27, 4  ;;  %v3052_v31 = vrot.slane %v3050_v53, 5 }
 0x11f   : > { %4619 = vmatmul.mubr.msk.bf16.gmra.mrb[24].mxu0 %vm1263_vm5, %v5968_v24 }
 0x120   : > { %4463 = vmatmul.mubr.msk.bf16.gmra.mrb[4].mxu1 %vm1263_vm5, %v5628_v11  ;;  %4622 = vmatprep.mubr.msk.bf16.mxu0 %vm1263_vm5, %v6097_v49 }
 0x121   : > { %4466 = vmatprep.mubr.msk.bf16.mxu1 %vm1263_vm5, %v5657_v61 }
 0x127   : > { %4623 = vmatmul.mubr.msk.bf16.gmra.mrb[28].mxu0 %vm1263_vm5, %v4168_v36  ;;  %v3064_v36 = vrot.slane %v3063_v43, 4 }
 0x128   : > { %4467 = vmatmul.mubr.msk.bf16.gmra.mrb[8].mxu1 %vm1263_vm5, %v5728_v44  ;;  %4628 = vmatprep.mubr.msk.bf16.mxu0 %vm1263_vm5, %v6496_v46  ;;  %v3068_v46 = vrot.slane %v3066_v58, 5 }
 0x129   : > { %4470 = vmatprep.mubr.msk.bf16.mxu1 %vm1263_vm5, %v5742_v0 }
 0x12f   : > { %4629 = vmatmul.mubr.msk.bf16.vlgmr.msra.gmra.mrb[0].mxu0 %vm1263_vm5, %v6497_v25 }
 0x130   : > { %4471 = vmatmul.mubr.msk.bf16.gmra.mrb[12].mxu1 %vm1263_vm5, %v5818_v54  ;;  %4661 = vmatpush3.bf16.msra.mxu0 %v3291_v47  ;;  %v3069_v47 = vsel %vm5216_vm8, %v3064_v36, %v3068_v46 }
 0x131   : > { %4474 = vmatprep.mubr.msk.bf16.mxu1 %vm1263_vm5, %v5831_v55  ;;  %4632 = vmatprep.mubr.msk.bf16.mxu0 %vm1263_vm5, %v6498_v3 }
 0x137   : > { %4633 = vmatmul.mubr.msk.bf16.gmra.mrb[4].mxu0 %vm1263_vm5, %v6499_v18 }
 0x138   : > { %4475 = vmatmul.mubr.msk.bf16.gmra.mrb[16].mxu1 %vm1263_vm5, %v5852_v1  ;;  %4636 = vmatprep.mubr.msk.bf16.mxu0 %vm1263_vm5, %v6500_v30 }
 0x139   : > { %4478 = vmatprep.mubr.msk.bf16.mxu1 %vm1263_vm5, %v5869_v63 }
 0x13f   : > { %4637 = vmatmul.mubr.msk.bf16.gmra.mrb[8].mxu0 %vm1263_vm5, %v6501_v45 }
 0x140   : > { %4479 = vmatmul.mubr.msk.bf16.gmra.mrb[20].mxu1 %vm1263_vm5, %v5890_v38  ;;  %4640 = vmatprep.mubr.msk.bf16.mxu0 %vm1263_vm5, %v6502_v12 }
 0x141   : > { %4482 = vmatprep.mubr.msk.bf16.mxu1 %vm1263_vm5, %v5907_v51 }
 0x147   : > { %4641 = vmatmul.mubr.msk.bf16.gmra.mrb[12].mxu0 %vm1263_vm5, %v6503_v40 }
 0x148   : > { %4483 = vmatmul.mubr.msk.bf16.gmra.mrb[24].mxu1 %vm1263_vm5, %v5914_v59  ;;  %4644 = vmatprep.mubr.msk.bf16.mxu0 %vm1263_vm5, %v6504_v16 }
 0x149   : > { %4486 = vmatprep.mubr.msk.bf16.mxu1 %vm1263_vm5, %v5960_v28 }
 0x14f   : > { %4645 = vmatmul.mubr.msk.bf16.gmra.mrb[16].mxu0 %vm1263_vm5, %v6505_v2 }
 0x150   : > { %4487 = vmatmul.mubr.msk.bf16.gmra.mrb[28].mxu1 %vm1263_vm5, %v5972_v13  ;;  %4648 = vmatprep.mubr.msk.bf16.mxu0 %vm1263_vm5, %v5773_v57 }
 0x151   : > { %4492 = vmatprep.mubr.msk.bf16.mxu1 %vm1263_vm5, %v5452_v33  ;;  %v3053_v33 = vor.u32 %v3052_v31, %v3049_v10 }
 0x153   : > { %v3054_v52 = vrot.slane %v3053_v33, 4 }
 0x157   : > { %4649 = vmatmul.mubr.msk.bf16.gmra.mrb[20].mxu0 %vm1263_vm5, %v5790_v8 }
 0x158   : > { %4493 = vmatmul.mubr.msk.bf16.vlgmr.msra.gmra.mrb[0].mxu1 %vm1263_vm5, %v5479_v4  ;;  %4652 = vmatprep.mubr.msk.bf16.mxu0 %vm1263_vm5, %v6507_v6  ;;  %v6508_v4 = vld [vmem:[#allocation20_spill] sm:$0xff] }
 0x159   : > { %4695 = vmatpush3.bf16.msra.mxu1 %v6506_v22  ;;  %4496 = vmatprep.mubr.msk.bf16.mxu1 %vm1263_vm5, %v5587_v7  ;;  %v3059_v7 = vsel %vm5216_vm8, %v3054_v52, %v3058_v29 }
 0x15a   : > { %v4186_v25 = vcombine.low %v3059_v7, %v3069_v47 }
 0x15f   : > { %4653 = vmatmul.mubr.msk.bf16.gmra.mrb[24].mxu0 %vm1263_vm5, %v6508_v4 }
 0x160   : > { %4497 = vmatmul.mubr.msk.bf16.gmra.mrb[4].mxu1 %vm1263_vm5, %v5670_v15  ;;  %4656 = vmatprep.mubr.msk.bf16.mxu0 %vm1263_vm5, %v6029_v35 }
 0x161   : > { %4500 = vmatprep.mubr.msk.bf16.mxu1 %vm1263_vm5, %v5995_v9 }
 0x167   : > { %4657 = vmatmul.mubr.msk.bf16.gmra.mrb[28].mxu0 %vm1263_vm5, %v4186_v25 }
 0x168   : > { %4501 = vmatmul.mubr.msk.bf16.gmra.mrb[8].mxu1 %vm1263_vm5, %v5997_v19  ;;  %4662 = vmatprep.mubr.msk.bf16.mxu0 %vm1263_vm5, %v5568_v60  ;;  %v4203_v60 = vrot.slane %v6107_v20, 9 }
 0x169   : > { %4504 = vmatprep.mubr.msk.bf16.mxu1 %vm1263_vm5, %v6015_v62 }
 0x16a   : > { %v3278_v15 = vsel %vm5526_vm1, %v4203_v60, %v3277_v23 }
 0x16f   : > { %4663 = vmatmul.mubr.msk.bf16.vlgmr.msra.gmra.mrb[0].mxu0 %vm1263_vm5, %v5628_v11  ;;  %v3279_v11 = vrot.slane %v3277_v23, 4 }
 0x170   : > { %4505 = vmatmul.mubr.msk.bf16.gmra.mrb[12].mxu1 %vm1263_vm5, %v6018_v5  ;;  %4666 = vmatprep.mubr.msk.bf16.mxu0 %vm1263_vm5, %v5657_v61  ;;  %v3280_v61 = vrot.slane %v824_v14, 5 }
 0x171   : > { %4508 = vmatprep.mubr.msk.bf16.mxu1 %vm1263_vm5, %v6042_v34 }
 0x177   : > { %4667 = vmatmul.mubr.msk.bf16.gmra.mrb[4].mxu0 %vm1263_vm5, %v5728_v44  ;;  %v3281_v44 = vsel %vm5526_vm1, %v3279_v11, %v3280_v61 }
 0x178   : > { %4509 = vmatmul.mubr.msk.bf16.gmra.mrb[16].mxu1 %vm1263_vm5, %v5933_v48  ;;  %4670 = vmatprep.mubr.msk.bf16.mxu0 %vm1263_vm5, %v5742_v0  ;;  %v4205_v0 = vcombine.low %v3278_v15, %v3281_v44 }
 0x179   : > { %4512 = vmatprep.mubr.msk.bf16.mxu1 %vm1263_vm5, %v5937_v37 }
 0x17f   : > { %4671 = vmatmul.mubr.msk.bf16.gmra.mrb[8].mxu0 %vm1263_vm5, %v5818_v54 }
 0x180   : > { %4513 = vmatmul.mubr.msk.bf16.gmra.mrb[20].mxu1 %vm1263_vm5, %v5943_v32  ;;  %4674 = vmatprep.mubr.msk.bf16.mxu0 %vm1263_vm5, %v5831_v55 }
 0x181   : > { %4516 = vmatprep.mubr.msk.bf16.mxu1 %vm1263_vm5, %v5947_v50 }
 0x187   : > { %4675 = vmatmul.mubr.msk.bf16.gmra.mrb[12].mxu0 %vm1263_vm5, %v5852_v1 }
 0x188   : > { %4517 = vmatmul.mubr.msk.bf16.gmra.mrb[24].mxu1 %vm1263_vm5, %v5951_v21  ;;  %4678 = vmatprep.mubr.msk.bf16.mxu0 %vm1263_vm5, %v5869_v63 }
 0x189   : > { %4520 = vmatprep.mubr.msk.bf16.mxu1 %vm1263_vm5, %v5968_v24 }
 0x18f   : > { %4679 = vmatmul.mubr.msk.bf16.gmra.mrb[16].mxu0 %vm1263_vm5, %v5890_v38 }
 0x190   : > { %4521 = vmatmul.mubr.msk.bf16.gmra.mrb[28].mxu1 %vm1263_vm5, %v6097_v49  ;;  %4682 = vmatprep.mubr.msk.bf16.mxu0 %vm1263_vm5, %v5907_v51 }
 0x191   : > { %4542 = vmatprep.mubr.msk.bf16.mxu1 %vm1263_vm5, %v6503_v40 }
 0x197   : > { %4683 = vmatmul.mubr.msk.bf16.gmra.mrb[20].mxu0 %vm1263_vm5, %v5914_v59 }
 0x198   : > { %4543 = vmatmul.mubr.msk.bf16.vlgmr.msra.gmra.mrb[16].mxu1 %vm1263_vm5, %v6504_v16  ;;  %4686 = vmatprep.mubr.msk.bf16.mxu0 %vm1263_vm5, %v5960_v28 }
 0x199   : > { %4546 = vmatprep.mubr.msk.bf16.mxu1 %vm1263_vm5, %v6505_v2 }
 0x19f   : > { %4687 = vmatmul.mubr.msk.bf16.gmra.mrb[24].mxu0 %vm1263_vm5, %v5972_v13 }
 0x1a0   : > { %4547 = vmatmul.mubr.msk.bf16.gmra.mrb[20].mxu1 %vm1263_vm5, %v5773_v57  ;;  %4690 = vmatprep.mubr.msk.bf16.mxu0 %vm1263_vm5, %v6004_v26 }
 0x1a1   : > { %4550 = vmatprep.mubr.msk.bf16.mxu1 %vm1263_vm5, %v5790_v8 }
 0x1a7   : > { %4691 = vmatmul.mubr.msk.bf16.gmra.mrb[28].mxu0 %vm1263_vm5, %v4205_v0 }
 0x1a8   : > { %4551 = vmatmul.mubr.msk.bf16.gmra.mrb[24].mxu1 %vm1263_vm5, %v6507_v6 }
 0x1a9   : > { %4554 = vmatprep.mubr.msk.bf16.mxu1 %vm1263_vm5, %v6508_v4 }
 0x1b0   : > { %4555 = vmatmul.mubr.msk.bf16.gmra.mrb[28].mxu1 %vm1263_vm5, %v6029_v35 }
 0x22b   : > { %v4494_v57 = vpop.f32.mrb[0].mxu1 }
 0x22c   : > { %v2241_v8 = vpop.f32.mrb[1].mxu1 }
 0x22d   : > { %v4495_v54 = vpop.f32.mrb[2].mxu1 }
 0x22e   : > { %v2244_v55 = vpop.f32.mrb[3].mxu1 }
 0x233   : > { %v4498_v1 = vpop.f32.mrb[4].mxu1 }
 0x234   : > { %v2257_v42 = vpop.f32.mrb[5].mxu1 }
 0x235   : > { %v4499_v63 = vpop.f32.mrb[6].mxu1 }
 0x236   : > { %v2260_v38 = vpop.f32.mrb[7].mxu1 }
 0x23b   : > { %v4502_v51 = vpop.f32.mrb[8].mxu1 }
 0x23c   : > { %v2273_v59 = vpop.f32.mrb[9].mxu1 }
 0x23d   : > { %v4503_v48 = vpop.f32.mrb[10].mxu1 }
 0x23e   : > { %v2276_v37 = vpop.f32.mrb[11].mxu1 }
 0x242   : > { %v4664_v50 = vpop.f32.mrb[0].mxu0 }
 0x243   : > { %v6262_v32 = vpop.f32.mrb[12].mxu1  ;;  %v4696_v28 = vadd.f32 %v4664_v50, %v4494_v57  ;;  %v3327_v24 = vpop.f32.mrb[1].mxu0 }
 0x244   : > { %v6264_v21 = vpop.f32.mrb[13].mxu1  ;;  %v4697_v9 = vadd.f32 %v3327_v24, %v2241_v8  ;;  %v4665_v19 = vpop.f32.mrb[2].mxu0 }
 0x245   : > { %v6267_v13 = vpop.f32.mrb[14].mxu1  ;;  %v4698_v62 = vadd.f32 %v4665_v19, %v4495_v54  ;;  %v3330_v5 = vpop.f32.mrb[3].mxu0  ;;  %v3529_v18 = vmul.f32 %v4696_v28, %v4696_v28 }
 0x246   : > { %v6269_v26 = vpop.f32.mrb[15].mxu1  ;;  %v4699_v35 = vadd.f32 %v3330_v5, %v2244_v55  ;;  %v3527_v49 = vmul.f32 %v4697_v9, %v4697_v9 }
 0x247   : > { %v3599_v34 = vpack.c.bf16 %v4698_v62, %v4696_v28  ;;  %v3530_v2 = vmul.f32 %v4698_v62, %v4698_v62 }
 0x248   : > { %v3487_v20 = vadd.f32 %v4699_v35, %v4697_v9  ;;  %v3528_v56 = vmul.f32 %v4699_v35, %v4699_v35  ;;  %v3598_v3 = vpack.c.bf16 %v4699_v35, %v4697_v9 }
 0x249   : > { %3618 = vst [vmem:[%s6271_s10 + $0x8] sm:$0xff] %v3599_v34 }
 0x24a   : > { %v3488_v30 = vadd.f32 %v4696_v28, %v3487_v20  ;;  %v3559_v45 = vadd.f32 %v3528_v56, %v3527_v49  ;;  %3617 = vst [vmem:[%s6271_s10] sm:$0xff] %v3598_v3  ;;  %v4668_v12 = vpop.f32.mrb[4].mxu0 }
 0x24b   : > { %v4700_v40 = vadd.f32 %v4668_v12, %v4498_v1  ;;  %v3343_v16 = vpop.f32.mrb[5].mxu0 }
 0x24c   : > { %v3560_v27 = vadd.f32 %v3559_v45, %v3529_v18  ;;  %v4701_v53 = vadd.f32 %v3343_v16, %v2257_v42  ;;  %v3489_v41 = vadd.f32 %v4698_v62, %v3488_v30  ;;  %v4669_v39 = vpop.f32.mrb[6].mxu0 }
 0x24d   : > { %v4702_v10 = vadd.f32 %v4669_v39, %v4499_v63  ;;  %v3346_v31 = vpop.f32.mrb[7].mxu0  ;;  %v3533_v36 = vmul.f32 %v4700_v40, %v4700_v40 }
 0x24e   : > { %v3490_v29 = vadd.f32 %v4701_v53, %v3489_v41  ;;  %v3531_v17 = vmul.f32 %v4701_v53, %v4701_v53  ;;  %v3561_v14 = vadd.f32 %v3560_v27, %v3530_v2  ;;  %v4703_v22 = vadd.f32 %v3346_v31, %v2260_v38 }
 0x24f   : > { %v3601_v33 = vpack.c.bf16 %v4702_v10, %v4700_v40  ;;  %v3534_v23 = vmul.f32 %v4702_v10, %v4702_v10 }
 0x250   : > { %v3562_v43 = vadd.f32 %v3561_v14, %v3531_v17  ;;  %v3491_v58 = vadd.f32 %v4703_v22, %v3490_v29  ;;  %v3532_v6 = vmul.f32 %v4703_v22, %v4703_v22  ;;  %v3600_v52 = vpack.c.bf16 %v4703_v22, %v4701_v53 }
 0x251   : > { %3620 = vst [vmem:[%s6271_s10 + $0x18] sm:$0xff] %v3601_v33 }
 0x252   : > { %v3492_v46 = vadd.f32 %v4700_v40, %v3491_v58  ;;  %v3563_v4 = vadd.f32 %v3562_v43, %v3532_v6  ;;  %3619 = vst [vmem:[%s6271_s10 + $0x10] sm:$0xff] %v3600_v52  ;;  %v4672_v7 = vpop.f32.mrb[8].mxu0 }
 0x253   : > { %v4704_v47 = vadd.f32 %v4672_v7, %v4502_v51  ;;  %v3359_v25 = vpop.f32.mrb[9].mxu0 }
 0x254   : > { %v3564_v60 = vadd.f32 %v3563_v4, %v3533_v36  ;;  %v4705_v11 = vadd.f32 %v3359_v25, %v2273_v59  ;;  %v3493_v61 = vadd.f32 %v4702_v10, %v3492_v46  ;;  %v4673_v15 = vpop.f32.mrb[10].mxu0 }
 0x255   : > { %v4706_v44 = vadd.f32 %v4673_v15, %v4503_v48  ;;  %v3362_v0 = vpop.f32.mrb[11].mxu0  ;;  %v3537_v51 = vmul.f32 %v4704_v47, %v4704_v47 }
 0x256   : > { %v3494_v57 = vadd.f32 %v4705_v11, %v3493_v61  ;;  %v3535_v8 = vmul.f32 %v4705_v11, %v4705_v11  ;;  %v3565_v54 = vadd.f32 %v3564_v60, %v3534_v23  ;;  %v4707_v55 = vadd.f32 %v3362_v0, %v2276_v37 }
 0x257   : > { %v3603_v1 = vpack.c.bf16 %v4706_v44, %v4704_v47  ;;  %v3538_v48 = vmul.f32 %v4706_v44, %v4706_v44 }
 0x258   : > { %v3566_v42 = vadd.f32 %v3565_v54, %v3535_v8  ;;  %v3495_v63 = vadd.f32 %v4707_v55, %v3494_v57  ;;  %v3536_v38 = vmul.f32 %v4707_v55, %v4707_v55  ;;  %v3602_v50 = vpack.c.bf16 %v4707_v55, %v4705_v11 }
 0x259   : > { %3622 = vst [vmem:[%s6271_s10 + $0x28] sm:$0xff] %v3603_v1 }
 0x25a   : > { %v3496_v28 = vadd.f32 %v4704_v47, %v3495_v63  ;;  %v3567_v24 = vadd.f32 %v3566_v42, %v3536_v38  ;;  %3621 = vst [vmem:[%s6271_s10 + $0x20] sm:$0xff] %v3602_v50  ;;  %v4676_v59 = vpop.f32.mrb[12].mxu0 }
 0x25b   : > { %v4708_v9 = vadd.f32 %v4676_v59, %v6262_v32  ;;  %v3375_v19 = vpop.f32.mrb[13].mxu0 }
 0x25c   : > { %v3568_v62 = vadd.f32 %v3567_v24, %v3537_v51  ;;  %v4709_v5 = vadd.f32 %v3375_v19, %v6264_v21  ;;  %v3497_v37 = vadd.f32 %v4706_v44, %v3496_v28  ;;  %v4677_v35 = vpop.f32.mrb[14].mxu0 }
 0x25d   : > { %v4710_v34 = vadd.f32 %v4677_v35, %v6267_v13  ;;  %v3378_v49 = vpop.f32.mrb[15].mxu0  ;;  %v3541_v16 = vmul.f32 %v4708_v9, %v4708_v9 }
 0x25e   : > { %v3498_v20 = vadd.f32 %v4709_v5, %v3497_v37  ;;  %v3539_v56 = vmul.f32 %v4709_v5, %v4709_v5  ;;  %v3569_v3 = vadd.f32 %v3568_v62, %v3538_v48  ;;  %v4711_v18 = vadd.f32 %v3378_v49, %v6269_v26 }
 0x25f   : > { %v3605_v30 = vpack.c.bf16 %v4710_v34, %v4708_v9  ;;  %v3542_v41 = vmul.f32 %v4710_v34, %v4710_v34 }
 0x260   : > { %v3570_v45 = vadd.f32 %v3569_v3, %v3539_v56  ;;  %v3499_v32 = vadd.f32 %v4711_v18, %v3498_v20  ;;  %v3540_v12 = vmul.f32 %v4711_v18, %v4711_v18  ;;  %v3604_v40 = vpack.c.bf16 %v4711_v18, %v4709_v5 }
 0x261   : > { %3624 = vst [vmem:[%s6271_s10 + $0x38] sm:$0xff] %v3605_v30 }
 0x262   : > { %v3500_v2 = vadd.f32 %v4708_v9, %v3499_v32  ;;  %v3571_v21 = vadd.f32 %v3570_v45, %v3540_v12  ;;  %3623 = vst [vmem:[%s6271_s10 + $0x30] sm:$0xff] %v3604_v40  ;;  %v4680_v27 = vpop.f32.mrb[16].mxu0 }
 0x263   : > { %v3391_v53 = vpop.f32.mrb[17].mxu0 }
 0x264   : > { %v3572_v13 = vadd.f32 %v3571_v21, %v3541_v16  ;;  %v3501_v39 = vadd.f32 %v4710_v34, %v3500_v2  ;;  %v4681_v10 = vpop.f32.mrb[18].mxu0 }
 0x265   : > { %v3394_v31 = vpop.f32.mrb[19].mxu0 }
 0x266   : > { %v3573_v29 = vadd.f32 %v3572_v13, %v3542_v41 }
 0x26a   : > { %v4684_v26 = vpop.f32.mrb[20].mxu0 }
 0x26b   : > { %v4544_v17 = vpop.f32.mrb[16].mxu1  ;;  %v3407_v33 = vpop.f32.mrb[21].mxu0 }
 0x26c   : > { %v2533_v14 = vpop.f32.mrb[17].mxu1  ;;  %v4712_v22 = vadd.f32 %v4680_v27, %v4544_v17  ;;  %v4685_v6 = vpop.f32.mrb[22].mxu0 }
 0x26d   : > { %v4545_v43 = vpop.f32.mrb[18].mxu1  ;;  %v4713_v58 = vadd.f32 %v3391_v53, %v2533_v14  ;;  %v3410_v46 = vpop.f32.mrb[23].mxu0 }
 0x26e   : > { %v2536_v52 = vpop.f32.mrb[19].mxu1  ;;  %v4714_v36 = vadd.f32 %v4681_v10, %v4545_v43  ;;  %v3545_v15 = vmul.f32 %v4712_v22, %v4712_v22 }
 0x26f   : > { %v3502_v4 = vadd.f32 %v4713_v58, %v3501_v39  ;;  %v3543_v7 = vmul.f32 %v4713_v58, %v4713_v58  ;;  %v4715_v47 = vadd.f32 %v3394_v31, %v2536_v52 }
 0x270   : > { %v3607_v25 = vpack.c.bf16 %v4714_v36, %v4712_v22  ;;  %v3546_v42 = vmul.f32 %v4714_v36, %v4714_v36 }
 0x271   : > { %v3574_v23 = vadd.f32 %v3573_v29, %v3543_v7  ;;  %v3503_v60 = vadd.f32 %v4715_v47, %v3502_v4  ;;  %v3544_v11 = vmul.f32 %v4715_v47, %v4715_v47  ;;  %v3606_v61 = vpack.c.bf16 %v4715_v47, %v4713_v58 }
 0x272   : > { %3626 = vst [vmem:[%s6271_s10 + $0x48] sm:$0xff] %v3607_v25  ;;  %v4688_v8 = vpop.f32.mrb[24].mxu0 }
 0x273   : > { %v3504_v44 = vadd.f32 %v4712_v22, %v3503_v60  ;;  %v3575_v0 = vadd.f32 %v3574_v23, %v3544_v11  ;;  %3625 = vst [vmem:[%s6271_s10 + $0x40] sm:$0xff] %v3606_v61  ;;  %v4548_v57 = vpop.f32.mrb[20].mxu1  ;;  %v3423_v1 = vpop.f32.mrb[25].mxu0 }
 0x274   : > { %v2549_v54 = vpop.f32.mrb[21].mxu1  ;;  %v4716_v55 = vadd.f32 %v4684_v26, %v4548_v57  ;;  %v4689_v28 = vpop.f32.mrb[26].mxu0 }
 0x275   : > { %v3576_v63 = vadd.f32 %v3575_v0, %v3545_v15  ;;  %v4549_v38 = vpop.f32.mrb[22].mxu1  ;;  %v4717_v50 = vadd.f32 %v3407_v33, %v2549_v54  ;;  %v3505_v51 = vadd.f32 %v4714_v36, %v3504_v44  ;;  %v3426_v9 = vpop.f32.mrb[27].mxu0 }
 0x276   : > { %v2552_v24 = vpop.f32.mrb[23].mxu1  ;;  %v4718_v59 = vadd.f32 %v4685_v6, %v4549_v38  ;;  %v3549_v56 = vmul.f32 %v4716_v55, %v4716_v55 }
 0x277   : > { %v3506_v19 = vadd.f32 %v4717_v50, %v3505_v51  ;;  %v3547_v48 = vmul.f32 %v4717_v50, %v4717_v50  ;;  %v3577_v62 = vadd.f32 %v3576_v63, %v3546_v42  ;;  %v4719_v5 = vadd.f32 %v3410_v46, %v2552_v24 }
 0x278   : > { %v3609_v37 = vpack.c.bf16 %v4718_v59, %v4716_v55  ;;  %v3550_v16 = vmul.f32 %v4718_v59, %v4718_v59 }
 0x279   : > { %v3578_v35 = vadd.f32 %v3577_v62, %v3547_v48  ;;  %v3507_v34 = vadd.f32 %v4719_v5, %v3506_v19  ;;  %v3548_v49 = vmul.f32 %v4719_v5, %v4719_v5  ;;  %v3608_v20 = vpack.c.bf16 %v4719_v5, %v4717_v50 }
 0x27a   : > { %3628 = vst [vmem:[%s6271_s10 + $0x58] sm:$0xff] %v3609_v37  ;;  %v4692_v45 = vpop.f32.mrb[28].mxu0 }
 0x27b   : > { %v3508_v3 = vadd.f32 %v4716_v55, %v3507_v34  ;;  %v3579_v18 = vadd.f32 %v3578_v35, %v3548_v49  ;;  %3627 = vst [vmem:[%s6271_s10 + $0x50] sm:$0xff] %v3608_v20  ;;  %v4552_v30 = vpop.f32.mrb[24].mxu1  ;;  %v3439_v40 = vpop.f32.mrb[29].mxu0 }
 0x27c   : > { %v2565_v32 = vpop.f32.mrb[25].mxu1  ;;  %v4720_v12 = vadd.f32 %v4688_v8, %v4552_v30  ;;  %v4693_v41 = vpop.f32.mrb[30].mxu0  ;;  %v3526_v30 = vld [vmem:[#allocation5] sm:$0x1] }
 0x27d   : > { %v3580_v2 = vadd.f32 %v3579_v18, %v3549_v56  ;;  %v4553_v21 = vpop.f32.mrb[26].mxu1  ;;  %v4721_v27 = vadd.f32 %v3423_v1, %v2565_v32  ;;  %v3509_v53 = vadd.f32 %v4718_v59, %v3508_v3  ;;  %v3442_v10 = vpop.f32.mrb[31].mxu0  ;;  %v3486_v56 = vld [vmem:[#allocation4] sm:$0x1] }
 0x27e   : > { %v2568_v13 = vpop.f32.mrb[27].mxu1  ;;  %v4722_v39 = vadd.f32 %v4689_v28, %v4553_v21  ;;  %v3553_v6 = vmul.f32 %v4720_v12, %v4720_v12 }
 0x27f   : > { %v3510_v31 = vadd.f32 %v4721_v27, %v3509_v53  ;;  %v3551_v29 = vmul.f32 %v4721_v27, %v4721_v27  ;;  %v3581_v17 = vadd.f32 %v3580_v2, %v3550_v16  ;;  %v4723_v26 = vadd.f32 %v3426_v9, %v2568_v13 }
 0x280   : > { %v3611_v14 = vpack.c.bf16 %v4722_v39, %v4720_v12  ;;  %v3554_v47 = vmul.f32 %v4722_v39, %v4722_v39 }
 0x281   : > { %v3582_v22 = vadd.f32 %v3581_v17, %v3551_v29  ;;  %v3511_v33 = vadd.f32 %v4723_v26, %v3510_v31  ;;  %v3552_v43 = vmul.f32 %v4723_v26, %v4723_v26  ;;  %v3610_v58 = vpack.c.bf16 %v4723_v26, %v4721_v27 }
 0x282   : > { %3630 = vst [vmem:[%s6271_s10 + $0x68] sm:$0xff] %v3611_v14 }
 0x283   : > { %v3512_v52 = vadd.f32 %v4720_v12, %v3511_v33  ;;  %v3583_v36 = vadd.f32 %v3582_v22, %v3552_v43  ;;  %3629 = vst [vmem:[%s6271_s10 + $0x60] sm:$0xff] %v3610_v58  ;;  %v4556_v46 = vpop.f32.mrb[28].mxu1 }
 0x284   : > { %v2581_v4 = vpop.f32.mrb[29].mxu1  ;;  %v4724_v7 = vadd.f32 %v4692_v45, %v4556_v46 }
 0x285   : > { %v3584_v25 = vadd.f32 %v3583_v36, %v3553_v6  ;;  %v4557_v23 = vpop.f32.mrb[30].mxu1  ;;  %v4725_v60 = vadd.f32 %v3439_v40, %v2581_v4  ;;  %v3513_v11 = vadd.f32 %v4722_v39, %v3512_v52 }
 0x286   : > { %v2584_v61 = vpop.f32.mrb[31].mxu1  ;;  %v4726_v15 = vadd.f32 %v4693_v41, %v4557_v23  ;;  %v3557_v38 = vmul.f32 %v4724_v7, %v4724_v7 }
 0x287   : > { %v3514_v44 = vadd.f32 %v4725_v60, %v3513_v11  ;;  %v3555_v0 = vmul.f32 %v4725_v60, %v4725_v60  ;;  %v3585_v57 = vadd.f32 %v3584_v25, %v3554_v47  ;;  %v4727_v8 = vadd.f32 %v3442_v10, %v2584_v61 }
 0x288   : > { %v3613_v54 = vpack.c.bf16 %v4726_v15, %v4724_v7  ;;  %v3558_v28 = vmul.f32 %v4726_v15, %v4726_v15 }
 0x289   : > { %v3586_v55 = vadd.f32 %v3585_v57, %v3555_v0  ;;  %v3515_v1 = vadd.f32 %v4727_v8, %v3514_v44  ;;  %v3556_v42 = vmul.f32 %v4727_v8, %v4727_v8  ;;  %v3612_v63 = vpack.c.bf16 %v4727_v8, %v4725_v60 }
 0x28a   : > { %3632 = vst [vmem:[%s6271_s10 + $0x78] sm:$0xff] %v3613_v54 }
 0x28b   : > { %v3516_v50 = vadd.f32 %v4724_v7, %v3515_v1  ;;  %v3587_v51 = vadd.f32 %v3586_v55, %v3556_v42  ;;  %3631 = vst [vmem:[%s6271_s10 + $0x70] sm:$0xff] %v3612_v63 }
 0x28d   : > { %v3517_v24 = vadd.f32 %v4726_v15, %v3516_v50  ;;  %v3588_v59 = vadd.f32 %v3587_v51, %v3557_v38 }
 0x28f   : > { %v3518_v9 = vrot.slane %v3517_v24, 4  ;;  %v3589_v19 = vadd.f32 %v3588_v59, %v3558_v28 }
 0x291   : > { %v3519_v48 = vadd.f32 %v3518_v9, %v3517_v24  ;;  %v3590_v62 = vrot.slane %v3589_v19, 4 }
 0x293   : > { %v3520_v5 = vrot.slane %v3519_v48, 2  ;;  %v3591_v37 = vadd.f32 %v3590_v62, %v3589_v19 }
 0x295   : > { %v3521_v35 = vadd.f32 %v3520_v5, %v3519_v48  ;;  %v3592_v34 = vrot.slane %v3591_v37, 2 }
 0x297   : > { %v3522_v49 = vrot.slane %v3521_v35, 1  ;;  %v3593_v20 = vadd.f32 %v3592_v34, %v3591_v37 }
 0x299   : > { %v3523_v3 = vadd.f32 %v3522_v49, %v3521_v35  ;;  %v3594_v18 = vrot.slane %v3593_v20, 1 }
 0x29b   : > { %v3524_v45 = vadd.f32 %v3523_v3, %v3486_v56  ;;  %v3595_v32 = vadd.f32 %v3594_v18, %v3593_v20 }
 0x29d   : > { %3525 = vst [vmem:[#allocation4] sm:$0x1] %v3524_v45  ;;  %v3596_v12 = vadd.f32 %v3595_v32, %v3526_v30 }
 0x29f   : > { %3597 = vst [vmem:[#allocation5] sm:$0x1] %v3596_v12 }
 0x2a0 PF: > { %p3633_p11 = scmp.eq.s32.totalorder %s5048_s16, 1 }
 0x2a2   : > { %p3634_p12 = pnand %p3633_p11, %p231_p7 }
 0x2a3   : > { %s5064_s11 = smov (!%p3634_p12), 96   ;;  %s5065_s12 = smov (!%p3634_p12), 64   ;;  %v3680_v52 = vlaneseq (!%p3634_p12)  ;;  %v3672_v46 = vld [vmem:[%s6451_s2] sm:$0x1] (!%p3634_p12)  ;;  %vm3693_vm2 = vcmask (!%p3634_p12), 261120   ;;  %vm3695_vm3 = vcmask (!%p3634_p12), 523264  }
 0x2a4   : > { %3637 = sbr.rel (%p3634_p12) target bundleno = 956 (0x3bc), region = 48  ;;  %v3638_v40 = vld [vmem:[#allocation4] sm:$0x1] (!%p3634_p12)  ;;  %s5066_s13 = smov (!%p3634_p12), 32   ;;  %v3676_v25 = vld [vmem:[%s6452_s3] sm:$0x1] (!%p3634_p12) }
 0x2a5   : > { %3641 = vrot.lane.b32.xlu0 (!%p3634_p12), %v3638_v40, %s5064_s11  ;;  %v3681_v36 = vshrl.u32 (!%p3634_p12), %v3680_v52, 7  ;;  %vm3697_vm4 = vcmask (!%p3634_p12), 785408  }
 0x2a6   : > { %v3639_v16 = vld [vmem:[#allocation5] sm:$0x1] (!%p3634_p12) }
 0x2a7   : > { %3654 = vrot.lane.b32.xlu1 (!%p3634_p12), %v3639_v16, %s5064_s11  ;;  %v3682_v4 = vsub.s32 (!%p3634_p12), 0, %v3681_v36 }
 0x2a9   : > { %3645 = vrot.lane.b32.xlu0 (!%p3634_p12), %v3638_v40, %s5065_s12 }
 0x2ab   : > { %3649 = vrot.lane.b32.xlu1 %v3638_v40, %s5066_s13 }
 0x2ad   : > { %3658 = vrot.lane.b32.xlu0 %v3639_v16, %s5065_s12 }
 0x2af   : > { %3662 = vrot.lane.b32.xlu1 %v3639_v16, %s5066_s13 }
 0x317   : > { %v3642_v2 = vpop.permute.xlu0 %3641 }
 0x318   : > { %v3644_v27 = vadd.f32 %v3642_v2, %v3638_v40 }
 0x319   : > { %v3655_v21 = vpop.permute.xlu1 %3654 }
 0x31a   : > { %v3657_v39 = vadd.f32 %v3655_v21, %v3639_v16 }
 0x31b   : > { %v3646_v53 = vpop.permute.xlu0 %3645 }
 0x31c   : > { %v3648_v13 = vadd.f32 %v3646_v53, %v3644_v27 }
 0x31d   : > { %v3650_v41 = vpop.permute.xlu1 %3649 }
 0x31e   : > { %v3652_v10 = vadd.f32 %v3650_v41, %v3648_v13 }
 0x31f   : > { %v3659_v31 = vpop.permute.xlu0 %3658 }
 0x320   : > { %v3667_v17 = vmul.f32 0.00048828125, %v3652_v10  ;;  %v3661_v26 = vadd.f32 %v3659_v31, %v3657_v39 }
 0x321   : > { %v3663_v29 = vpop.permute.xlu1 %3662 }
 0x322   : > { %v3665_v14 = vadd.f32 %v3663_v29, %v3661_v26  ;;  %v3669_v22 = vmul.f32 %v3667_v17, %v3667_v17 }
 0x324   : > { %v3668_v33 = vmul.f32 0.00048828125, %v3665_v14 }
 0x326   : > { %v3670_v43 = vsub.f32 %v3668_v33, %v3669_v22 }
 0x328   : > { %v3671_v58 = vmax.f32 %v3670_v43, 0.0 }
 0x32a   : > { %v3673_v6 = vadd.f32 1e-05, %v3671_v58 }
 0x32c   : > { %5020 = vrsqrt.f32 %v3673_v6 }
 0x336   : > { %v5021_v7 = vpop.eup %5020 }
 0x337   : > { %v3675_v47 = vmul.f32 %v5021_v7, %v3672_v46 }
 0x339   : > { %v3683_v23 = vrot.slane %v3675_v47, %v3682_v4  ;;  %v3677_v60 = vmul.f32 %v3675_v47, %v3667_v17 }
 0x33b   : > { %3684 = vrot.lane.b32.xlu0 %v3683_v23, %s5066_s13  ;;  %v3678_v11 = vsub.f32 %v3676_v25, %v3677_v60 }
 0x33d   : > { %v3704_v61 = vrot.slane %v3678_v11, %v3682_v4 }
 0x33f   : > { %3687 = vrot.lane.b32.xlu0 %v3683_v23, %s5065_s12  ;;  %3705 = vrot.lane.b32.xlu1 %v3704_v61, %s5066_s13 }
 0x343   : > { %3690 = vrot.lane.b32.xlu0 %v3683_v23, %s5064_s11  ;;  %3708 = vrot.lane.b32.xlu1 %v3704_v61, %s5065_s12 }
 0x347   : > { %3711 = vrot.lane.b32.xlu1 %v3704_v61, %s5064_s11 }
 0x3ad   : > { %v3685_v15 = vpop.permute.xlu0 %3684 }
 0x3ae   : > { %v3694_v57 = vsel %vm3693_vm2, %v3675_v47, %v3685_v15 }
 0x3b1   : > { %v3688_v44 = vpop.permute.xlu0 %3687  ;;  %v3706_v0 = vpop.permute.xlu1 %3705 }
 0x3b2   : > { %v3696_v8 = vsel %vm3695_vm3, %v3694_v57, %v3688_v44  ;;  %v3714_v42 = vsel %vm3693_vm2, %v3678_v11, %v3706_v0 }
 0x3b5   : > { %v3691_v54 = vpop.permute.xlu0 %3690  ;;  %v3709_v55 = vpop.permute.xlu1 %3708 }
 0x3b6   : > { %v3698_v1 = vsel %vm3697_vm4, %v3696_v8, %v3691_v54  ;;  %v3715_v63 = vsel %vm3695_vm3, %v3714_v42, %v3709_v55 }
 0x3b7   : > { %3699 = vst [vmem:[#allocation6] sm:$0x1] %v3698_v1 }
 0x3b9   : > { %v3712_v38 = vpop.permute.xlu1 %3711 }
 0x3ba   : > { %v3716_v50 = vsel %vm3697_vm4, %v3715_v63, %v3712_v38 }
 0x3bb   : > { %3717 = vst [vmem:[#allocation7] sm:$0x1] %v3716_v50 }
 0x3bc PF: > { %p4224_p13 = scmp.ne.s32.totalorder %s5048_s16, 1 }
 0x3bd   : > { %s4234_s25 = sshll.u32 (!%p4224_p13), %s5044_s15, 7 }
 0x3be   : > { %3720 = sbr.rel (%p4224_p13) target bundleno = 996 (0x3e4), region = 52  ;;  %v6316_v51 = vld [vmem:[#allocation6] ss:$0 sm:$0xff] (!%p4224_p13)  ;;  %s6318_s26 = scalar_lea.vmem (!%p4224_p13), [#allocation3], %s4234_s25 }
 0x3bf   : > { %v3724_v28 = vld [vmem:[%s6318_s26] sm:$0xff] (!%p4224_p13)  ;;  %v3725_v24 = vld [vmem:[%s6318_s26 + $0x8] sm:$0xff] (!%p4224_p13)  ;;  %v3726_v59 = vld [vmem:[%s6318_s26 + $0x10] sm:$0xff] (!%p4224_p13) }
 0x3c0   : > { %v3740_v9 = vunpack.c.l.bf16 (!%p4224_p13), %v3724_v28  ;;  %v3741_v19 = vunpack.c.h.bf16 (!%p4224_p13), %v3724_v28  ;;  %v3742_v48 = vunpack.c.l.bf16 (!%p4224_p13), %v3725_v24  ;;  %v3743_v62 = vunpack.c.h.bf16 (!%p4224_p13), %v3725_v24  ;;  %v3727_v5 = vld [vmem:[%s6318_s26 + $0x18] sm:$0xff] (!%p4224_p13)  ;;  %v3728_v10 = vld [vmem:[%s6318_s26 + $0x20] sm:$0xff] (!%p4224_p13)  ;;  %v3729_v31 = vld [vmem:[%s6318_s26 + $0x28] sm:$0xff] (!%p4224_p13) }
 0x3c1   : > { %v3744_v35 = vunpack.c.l.bf16 (!%p4224_p13), %v3726_v59  ;;  %v3745_v34 = vunpack.c.h.bf16 (!%p4224_p13), %v3726_v59  ;;  %v3746_v49 = vunpack.c.l.bf16 (!%p4224_p13), %v3727_v5  ;;  %v3747_v20 = vunpack.c.h.bf16 (!%p4224_p13), %v3727_v5  ;;  %v3730_v22 = vld [vmem:[%s6318_s26 + $0x30] sm:$0xff] (!%p4224_p13)  ;;  %v3731_v33 = vld [vmem:[%s6318_s26 + $0x38] sm:$0xff] (!%p4224_p13)  ;;  %v3732_v59 = vld [vmem:[%s6318_s26 + $0x40] sm:$0xff] (!%p4224_p13) }
 0x3c2   : > { %v6324_v37 = vld [vmem:[#allocation7] ss:$0 sm:$0xff] (!%p4224_p13)  ;;  %v3779_v56 = vmul.f32 (!%p4224_p13), %v6316_v51, %v3740_v9  ;;  %v3780_v3 = vmul.f32 (!%p4224_p13), %v6316_v51, %v3741_v19  ;;  %v3781_v18 = vmul.f32 (!%p4224_p13), %v6316_v51, %v3742_v48  ;;  %v3782_v30 = vmul.f32 (!%p4224_p13), %v6316_v51, %v3743_v62  ;;  %v3733_v9 = vld [vmem:[%s6318_s26 + $0x48] sm:$0xff] (!%p4224_p13) }
 0x3c3   : > { %v3783_v45 = vmul.f32 (!%p4224_p13), %v6316_v51, %v3744_v35  ;;  %v3784_v32 = vmul.f32 (!%p4224_p13), %v6316_v51, %v3745_v34  ;;  %v3785_v12 = vmul.f32 (!%p4224_p13), %v6316_v51, %v3746_v49  ;;  %v3786_v40 = vmul.f32 (!%p4224_p13), %v6316_v51, %v3747_v20  ;;  %v3734_v35 = vld [vmem:[%s6318_s26 + $0x50] sm:$0xff] (!%p4224_p13)  ;;  %v3735_v34 = vld [vmem:[%s6318_s26 + $0x58] sm:$0xff] (!%p4224_p13) }
 0x3c4   : > { %v3818_v16 = vadd.f32 (!%p4224_p13), %v6324_v37, %v3779_v56  ;;  %v3819_v2 = vadd.f32 (!%p4224_p13), %v6324_v37, %v3780_v3  ;;  %v3820_v21 = vadd.f32 (!%p4224_p13), %v6324_v37, %v3781_v18  ;;  %v3821_v27 = vadd.f32 (!%p4224_p13), %v6324_v37, %v3782_v30 }
 0x3c5   : > { %v3822_v53 = vadd.f32 %v6324_v37, %v3783_v45  ;;  %v3823_v41 = vadd.f32 %v6324_v37, %v3784_v32  ;;  %v3824_v13 = vadd.f32 %v6324_v37, %v3785_v12  ;;  %v3825_v39 = vadd.f32 %v6324_v37, %v3786_v40 }
 0x3c6   : > { %v3850_v29 = vmax.f32 %v3818_v16, 0.0  ;;  %v3851_v17 = vmax.f32 %v3819_v2, 0.0  ;;  %v3852_v26 = vmax.f32 %v3820_v21, 0.0  ;;  %v3853_v14 = vmax.f32 %v3821_v27, 0.0 }
 0x3c7   : > { %v3854_v43 = vmax.f32 %v3822_v53, 0.0  ;;  %v3855_v58 = vmax.f32 %v3823_v41, 0.0  ;;  %v3856_v6 = vmax.f32 %v3824_v13, 0.0  ;;  %v3857_v52 = vmax.f32 %v3825_v39, 0.0 }
 0x3c8   : > { %3882 = vst [vmem:[%s5137_s29] sm:$0xff] %v3850_v29  ;;  %3883 = vst [vmem:[%s5137_s29 + $0x8] sm:$0xff] %v3851_v17  ;;  %v3748_v36 = vunpack.c.l.bf16 %v3728_v10  ;;  %v3749_v46 = vunpack.c.h.bf16 %v3728_v10  ;;  %v3750_v4 = vunpack.c.l.bf16 %v3729_v31  ;;  %v3751_v7 = vunpack.c.h.bf16 %v3729_v31 }
 0x3c9   : > { %3884 = vst [vmem:[%s5137_s29 + $0x10] sm:$0xff] %v3852_v26  ;;  %3885 = vst [vmem:[%s5137_s29 + $0x18] sm:$0xff] %v3853_v14  ;;  %v3752_v47 = vunpack.c.l.bf16 %v3730_v22  ;;  %v3753_v25 = vunpack.c.h.bf16 %v3730_v22  ;;  %v3754_v23 = vunpack.c.l.bf16 %v3731_v33  ;;  %v3755_v60 = vunpack.c.h.bf16 %v3731_v33 }
 0x3ca   : > { %3886 = vst [vmem:[%s5137_s29 + $0x20] sm:$0xff] %v3854_v43  ;;  %3887 = vst [vmem:[%s5137_s29 + $0x28] sm:$0xff] %v3855_v58  ;;  %v3787_v11 = vmul.f32 %v6316_v51, %v3748_v36  ;;  %v3788_v61 = vmul.f32 %v6316_v51, %v3749_v46  ;;  %v3789_v15 = vmul.f32 %v6316_v51, %v3750_v4  ;;  %v3756_v18 = vunpack.c.l.bf16 %v3732_v59 }
 0x3cb   : > { %3888 = vst [vmem:[%s5137_s29 + $0x30] sm:$0xff] %v3856_v6  ;;  %3889 = vst [vmem:[%s5137_s29 + $0x38] sm:$0xff] %v3857_v52  ;;  %v3790_v44 = vmul.f32 %v6316_v51, %v3751_v7  ;;  %v3791_v0 = vmul.f32 %v6316_v51, %v3752_v47  ;;  %v3792_v57 = vmul.f32 %v6316_v51, %v3753_v25  ;;  %v3757_v30 = vunpack.c.h.bf16 %v3732_v59  ;;  %v3736_v6 = vld [vmem:[%s6318_s26 + $0x60] sm:$0xff]  ;;  %v3737_v52 = vld [vmem:[%s6318_s26 + $0x68] sm:$0xff] }
 0x3cc   : > { %v3793_v8 = vmul.f32 %v6316_v51, %v3754_v23  ;;  %v3794_v54 = vmul.f32 %v6316_v51, %v3755_v60  ;;  %v3826_v55 = vadd.f32 %v6324_v37, %v3787_v11  ;;  %v3827_v1 = vadd.f32 %v6324_v37, %v3788_v61  ;;  %v3738_v47 = vld [vmem:[%s6318_s26 + $0x70] sm:$0xff]  ;;  %v3739_v25 = vld [vmem:[%s6318_s26 + $0x78] sm:$0xff] }
 0x3cd   : > { %v3828_v42 = vadd.f32 %v6324_v37, %v3789_v15  ;;  %v3829_v63 = vadd.f32 %v6324_v37, %v3790_v44  ;;  %v3830_v38 = vadd.f32 %v6324_v37, %v3791_v0  ;;  %v3831_v50 = vadd.f32 %v6324_v37, %v3792_v57 }
 0x3ce   : > { %v3832_v28 = vadd.f32 %v6324_v37, %v3793_v8  ;;  %v3833_v24 = vadd.f32 %v6324_v37, %v3794_v54  ;;  %v3858_v19 = vmax.f32 %v3826_v55, 0.0  ;;  %v3859_v48 = vmax.f32 %v3827_v1, 0.0 }
 0x3cf   : > { %v3860_v62 = vmax.f32 %v3828_v42, 0.0  ;;  %v3861_v5 = vmax.f32 %v3829_v63, 0.0  ;;  %v3862_v49 = vmax.f32 %v3830_v38, 0.0  ;;  %v3863_v20 = vmax.f32 %v3831_v50, 0.0 }
 0x3d0   : > { %v3864_v56 = vmax.f32 %v3832_v28, 0.0  ;;  %v3865_v3 = vmax.f32 %v3833_v24, 0.0  ;;  %3890 = vst [vmem:[%s5137_s29 + $0x40] sm:$0xff] %v3858_v19  ;;  %3891 = vst [vmem:[%s5137_s29 + $0x48] sm:$0xff] %v3859_v48  ;;  %v3758_v45 = vunpack.c.l.bf16 %v3733_v9  ;;  %v3759_v32 = vunpack.c.h.bf16 %v3733_v9 }
 0x3d1   : > { %3892 = vst [vmem:[%s5137_s29 + $0x50] sm:$0xff] %v3860_v62  ;;  %3893 = vst [vmem:[%s5137_s29 + $0x58] sm:$0xff] %v3861_v5  ;;  %v3760_v12 = vunpack.c.l.bf16 %v3734_v35  ;;  %v3761_v40 = vunpack.c.h.bf16 %v3734_v35  ;;  %v3762_v16 = vunpack.c.l.bf16 %v3735_v34  ;;  %v3763_v2 = vunpack.c.h.bf16 %v3735_v34 }
 0x3d2   : > { %3894 = vst [vmem:[%s5137_s29 + $0x60] sm:$0xff] %v3862_v49  ;;  %3895 = vst [vmem:[%s5137_s29 + $0x68] sm:$0xff] %v3863_v20  ;;  %v3795_v21 = vmul.f32 %v6316_v51, %v3756_v18  ;;  %v3796_v27 = vmul.f32 %v6316_v51, %v3757_v30  ;;  %v3797_v53 = vmul.f32 %v6316_v51, %v3758_v45  ;;  %v3764_v15 = vunpack.c.l.bf16 %v3736_v6 }
 0x3d3   : > { %3896 = vst [vmem:[%s5137_s29 + $0x70] sm:$0xff] %v3864_v56  ;;  %3897 = vst [vmem:[%s5137_s29 + $0x78] sm:$0xff] %v3865_v3  ;;  %v3798_v41 = vmul.f32 %v6316_v51, %v3759_v32  ;;  %v3799_v13 = vmul.f32 %v6316_v51, %v3760_v12  ;;  %v3800_v39 = vmul.f32 %v6316_v51, %v3761_v40  ;;  %v3765_v44 = vunpack.c.h.bf16 %v3736_v6 }
 0x3d4   : > { %v3801_v10 = vmul.f32 %v6316_v51, %v3762_v16  ;;  %v3802_v31 = vmul.f32 %v6316_v51, %v3763_v2  ;;  %v3834_v29 = vadd.f32 %v6324_v37, %v3795_v21  ;;  %v3835_v17 = vadd.f32 %v6324_v37, %v3796_v27 }
 0x3d5   : > { %v3836_v26 = vadd.f32 %v6324_v37, %v3797_v53  ;;  %v3837_v14 = vadd.f32 %v6324_v37, %v3798_v41  ;;  %v3838_v22 = vadd.f32 %v6324_v37, %v3799_v13  ;;  %v3839_v33 = vadd.f32 %v6324_v37, %v3800_v39 }
 0x3d6   : > { %v3840_v43 = vadd.f32 %v6324_v37, %v3801_v10  ;;  %v3841_v58 = vadd.f32 %v6324_v37, %v3802_v31  ;;  %v3866_v36 = vmax.f32 %v3834_v29, 0.0  ;;  %v3867_v46 = vmax.f32 %v3835_v17, 0.0 }
 0x3d7   : > { %v3868_v4 = vmax.f32 %v3836_v26, 0.0  ;;  %v3869_v7 = vmax.f32 %v3837_v14, 0.0  ;;  %v3870_v23 = vmax.f32 %v3838_v22, 0.0  ;;  %v3871_v60 = vmax.f32 %v3839_v33, 0.0 }
 0x3d8   : > { %v3872_v11 = vmax.f32 %v3840_v43, 0.0  ;;  %v3873_v61 = vmax.f32 %v3841_v58, 0.0  ;;  %3898 = vst [vmem:[%s5137_s29 + $0x80] sm:$0xff] %v3866_v36  ;;  %3899 = vst [vmem:[%s5137_s29 + $0x88] sm:$0xff] %v3867_v46  ;;  %v3766_v0 = vunpack.c.l.bf16 %v3737_v52  ;;  %v3767_v57 = vunpack.c.h.bf16 %v3737_v52 }
 0x3d9   : > { %3900 = vst [vmem:[%s5137_s29 + $0x90] sm:$0xff] %v3868_v4  ;;  %3901 = vst [vmem:[%s5137_s29 + $0x98] sm:$0xff] %v3869_v7  ;;  %v3768_v8 = vunpack.c.l.bf16 %v3738_v47  ;;  %v3769_v54 = vunpack.c.h.bf16 %v3738_v47  ;;  %v3770_v55 = vunpack.c.l.bf16 %v3739_v25  ;;  %v3771_v1 = vunpack.c.h.bf16 %v3739_v25 }
 0x3da   : > { %3902 = vst [vmem:[%s5137_s29 + $0xa0] sm:$0xff] %v3870_v23  ;;  %3903 = vst [vmem:[%s5137_s29 + $0xa8] sm:$0xff] %v3871_v60  ;;  %v3803_v42 = vmul.f32 %v6316_v51, %v3764_v15  ;;  %v3804_v63 = vmul.f32 %v6316_v51, %v3765_v44  ;;  %v3805_v38 = vmul.f32 %v6316_v51, %v3766_v0 }
 0x3db   : > { %3904 = vst [vmem:[%s5137_s29 + $0xb0] sm:$0xff] %v3872_v11  ;;  %3905 = vst [vmem:[%s5137_s29 + $0xb8] sm:$0xff] %v3873_v61  ;;  %v3806_v50 = vmul.f32 %v6316_v51, %v3767_v57  ;;  %v3807_v28 = vmul.f32 %v6316_v51, %v3768_v8  ;;  %v3808_v24 = vmul.f32 %v6316_v51, %v3769_v54 }
 0x3dc   : > { %v3809_v59 = vmul.f32 %v6316_v51, %v3770_v55  ;;  %v3810_v9 = vmul.f32 %v6316_v51, %v3771_v1  ;;  %v3842_v19 = vadd.f32 %v6324_v37, %v3803_v42  ;;  %v3843_v48 = vadd.f32 %v6324_v37, %v3804_v63 }
 0x3dd   : > { %v3844_v62 = vadd.f32 %v6324_v37, %v3805_v38  ;;  %v3845_v5 = vadd.f32 %v6324_v37, %v3806_v50  ;;  %v3846_v35 = vadd.f32 %v6324_v37, %v3807_v28  ;;  %v3847_v34 = vadd.f32 %v6324_v37, %v3808_v24 }
 0x3de   : > { %v3848_v51 = vadd.f32 %v6324_v37, %v3809_v59  ;;  %v3849_v49 = vadd.f32 %v6324_v37, %v3810_v9  ;;  %v3874_v20 = vmax.f32 %v3842_v19, 0.0  ;;  %v3875_v56 = vmax.f32 %v3843_v48, 0.0 }
 0x3df   : > { %v3876_v3 = vmax.f32 %v3844_v62, 0.0  ;;  %v3877_v18 = vmax.f32 %v3845_v5, 0.0  ;;  %v3878_v30 = vmax.f32 %v3846_v35, 0.0  ;;  %v3879_v45 = vmax.f32 %v3847_v34, 0.0 }
 0x3e0   : > { %v3880_v32 = vmax.f32 %v3848_v51, 0.0  ;;  %v3881_v12 = vmax.f32 %v3849_v49, 0.0  ;;  %3906 = vst [vmem:[%s5137_s29 + $0xc0] sm:$0xff] %v3874_v20  ;;  %3907 = vst [vmem:[%s5137_s29 + $0xc8] sm:$0xff] %v3875_v56 }
 0x3e1   : > { %3908 = vst [vmem:[%s5137_s29 + $0xd0] sm:$0xff] %v3876_v3  ;;  %3909 = vst [vmem:[%s5137_s29 + $0xd8] sm:$0xff] %v3877_v18 }
 0x3e2   : > { %3910 = vst [vmem:[%s5137_s29 + $0xe0] sm:$0xff] %v3878_v30  ;;  %3911 = vst [vmem:[%s5137_s29 + $0xe8] sm:$0xff] %v3879_v45 }
 0x3e3   : > { %3912 = vst [vmem:[%s5137_s29 + $0xf0] sm:$0xff] %v3880_v32  ;;  %3913 = vst [vmem:[%s5137_s29 + $0xf8] sm:$0xff] %v3881_v12 }
 0x3e4 PF: > { %s14_s19 = sadd.s32 1, %s5060_s19   ;;  %s6509_s15 = smov %s5052_s17 }
 0x3e5   : > { %p11_p0 = scmp.ge.s32.totalorder %s14_s19, 6   ;;  %s6510_s16 = smov %s5056_s18 }
 0x3e6   : > { %s6511_s17 = smov %s6514_s20  ;;  %s6512_s18 = smov %s6518_s21 }
 0x3e7   :  { %13 = sbr.rel (!%p11_p0) target bundleno = 3 (0x3), region = 93 }

</bundles_post_ra>
